<compile_context>
chip_gen: v6e
topology: v6e:2x2x1
jax: 0.10.0
libtpu: 0.0.40
codegen_flags: <defaults>
</compile_context>

<pallas_src>
import functools

import jax
import jax.numpy as jnp
from jax.experimental import pallas as pl
from jax.experimental.pallas import tpu as pltpu

BN_EPS = 1e-5
_MIB = 1024 * 1024


# ---------------------------------------------------------------------------
# Kernels
# ---------------------------------------------------------------------------
def _hidden_epilogue(acc_f32, xi_bf16, wl_ref, wr_ref, b_ref, o_ref):
    """relu(agg @ Wl' + x_self @ Wr' + b') with BN pre-folded into Wl'/Wr'/b'."""
    h = (jnp.dot(acc_f32.astype(jnp.bfloat16), wl_ref[...],
                 preferred_element_type=jnp.float32)
         + jnp.dot(xi_bf16, wr_ref[...], preferred_element_type=jnp.float32)
         + b_ref[...])
    o_ref[...] = jnp.maximum(h, 0.0).astype(o_ref.dtype)


def _sage_hidden_stream_kernel(a_ref, xk_ref, xi_ref, wl_ref, wr_ref, b_ref,
                               o_ref, acc_ref):
    """One (row-tile, K-tile) step; x streamed as bf16 (tk,F)/(tm,F) tiles."""
    k = pl.program_id(1)

    @pl.when(k == 0)
    def _():
        acc_ref[...] = jnp.zeros_like(acc_ref)

    # Mean aggregation: acc += A_norm[i, k] @ x[k]  (bf16 MXU, f32 accumulate).
    acc_ref[...] += jnp.dot(a_ref[...], xk_ref[...],
                            preferred_element_type=jnp.float32)

    @pl.when(k == pl.num_programs(1) - 1)
    def _():
        _hidden_epilogue(acc_ref[...], xi_ref[...], wl_ref, wr_ref, b_ref, o_ref)


def _sage_hidden_resident_kernel(a_ref, x_ref, wl_ref, wr_ref, b_ref,
                                 o_ref, acc_ref, *, tm, tk):
    """Same op; x is VMEM-resident (single DMA, constant block index) and
    sliced in-kernel, eliminating the per-row-tile re-stream of x."""
    i = pl.program_id(0)
    k = pl.program_id(1)

    @pl.when(k == 0)
    def _():
        acc_ref[...] = jnp.zeros_like(acc_ref)

    xk = x_ref[pl.ds(pl.multiple_of(k * tk, tk), tk), :]
    acc_ref[...] += jnp.dot(a_ref[...], xk, preferred_element_type=jnp.float32)

    @pl.when(k == pl.num_programs(1) - 1)
    def _():
        xi = x_ref[pl.ds(pl.multiple_of(i * tm, tm), tm), :]
        _hidden_epilogue(acc_ref[...], xi, wl_ref, wr_ref, b_ref, o_ref)


def _sage_final_kernel(a_ref, xl_ref, xr_ref, o_ref, acc_ref):
    """log_softmax(A_norm @ (x@Wl) + (x@Wr + b)); projections hoisted outside."""
    k = pl.program_id(1)

    @pl.when(k == 0)
    def _():
        acc_ref[...] = jnp.zeros_like(acc_ref)

    acc_ref[...] += jnp.dot(a_ref[...], xl_ref[...],
                            preferred_element_type=jnp.float32)

    @pl.when(k == pl.num_programs(1) - 1)
    def _():
        h = acc_ref[...] + xr_ref[...]
        # Numerically-stable log_softmax along the class dimension, in f32.
        mx = jnp.max(h, axis=-1, keepdims=True)
        sh = h - mx
        lse = jnp.log(jnp.sum(jnp.exp(sh), axis=-1, keepdims=True))
        o_ref[...] = sh - lse


# ---------------------------------------------------------------------------
# pallas_call wrappers
# ---------------------------------------------------------------------------
def _full_spec(shape):
    return pl.BlockSpec(shape, lambda i, k: (0,) * len(shape))


def _compiler_params(working_set_bytes):
    # Let the scoped VMEM limit follow the tile working set (the 32 MiB default
    # starves large tiles on 128 MiB parts); cap well below 100 MiB ceilings.
    # On v7x (64 MiB VMEM) pick tiles whose estimate stays <= ~48-56 MiB.
    limit = int(min(100 * _MIB, max(32 * _MIB, 1.3 * working_set_bytes + 2 * _MIB)))
    return pltpu.CompilerParams(
        dimension_semantics=("parallel", "arbitrary"),
        vmem_limit_bytes=limit,
    )


def sage_hidden_layer(adj_bf16, x_bf16, wl, wr, b, *, tm, tk,
                      x_resident_budget_bytes=24 * _MIB):
    n, f_in = x_bf16.shape
    f_out = wl.shape[1]
    tm = min(tm, n)
    tk = min(tk, n)
    assert n % tm == 0 and n % tk == 0, "N must be divisible by the tile sizes"
    assert wl.shape == (f_in, f_out) and wr.shape == (f_in, f_out)

    x_bytes = n * f_in * 2                              # bf16
    resident = x_bytes <= x_resident_budget_bytes

    common = (2 * tm * tk * 2                           # adj double-buffer (bf16)
              + 2 * tm * f_out * 2                      # output double-buffer
              + tm * f_in * 4                           # f32 accumulator
              + 2 * (2 * f_in * f_out * 2 + f_out * 4))  # weights + bias buffers

    if resident:
        est = common + 2 * x_bytes                      # Pallas still 2x-buffers x
        kernel = functools.partial(_sage_hidden_resident_kernel, tm=tm, tk=tk)
        x_specs = [pl.BlockSpec((n, f_in), lambda i, k: (0, 0))]
        x_args = (x_bf16,)
    else:
        est = common + 2 * (tk + tm) * f_in * 2
        kernel = _sage_hidden_stream_kernel
        x_specs = [pl.BlockSpec((tk, f_in), lambda i, k: (k, 0)),   # aggregation rows
                   pl.BlockSpec((tm, f_in), lambda i, k: (i, 0))]   # self rows
        x_args = (x_bf16, x_bf16)

    return pl.pallas_call(
        kernel,
        out_shape=jax.ShapeDtypeStruct((n, f_out), jnp.bfloat16),
        grid_spec=pltpu.PrefetchScalarGridSpec(
            num_scalar_prefetch=0,
            grid=(n // tm, n // tk),
            in_specs=[pl.BlockSpec((tm, tk), lambda i, k: (i, k))]   # adj tile
            + x_specs
            + [_full_spec((f_in, f_out)),                            # folded Wl' (bf16)
               _full_spec((f_in, f_out)),                            # folded Wr' (bf16)
               _full_spec((1, f_out))],                              # folded bias (f32)
            out_specs=pl.BlockSpec((tm, f_out), lambda i, k: (i, 0)),
            scratch_shapes=[pltpu.VMEM((tm, f_in), jnp.float32)],
        ),
        compiler_params=_compiler_params(est),
    )(adj_bf16, *x_args, wl, wr, b)


def sage_final_layer(adj_bf16, xl_bf16, xr_f32, *, tm, tk):
    n, f_out = xl_bf16.shape
    tm = min(tm, n)
    tk = min(tk, n)
    assert n % tm == 0 and n % tk == 0, "N must be divisible by the tile sizes"

    est = (2 * tm * tk * 2 + 2 * tk * f_out * 2 + 2 * tm * f_out * 4
           + 2 * tm * f_out * 4 + tm * f_out * 4)

    return pl.pallas_call(
        _sage_final_kernel,
        out_shape=jax.ShapeDtypeStruct((n, f_out), jnp.float32),
        grid_spec=pltpu.PrefetchScalarGridSpec(
            num_scalar_prefetch=0,
            grid=(n // tm, n // tk),
            in_specs=[
                pl.BlockSpec((tm, tk), lambda i, k: (i, k)),      # adj tile
                pl.BlockSpec((tk, f_out), lambda i, k: (k, 0)),   # xl = x @ Wl (bf16)
                pl.BlockSpec((tm, f_out), lambda i, k: (i, 0)),   # xr = x @ Wr + b (f32)
            ],
            out_specs=pl.BlockSpec((tm, f_out), lambda i, k: (i, 0)),
            scratch_shapes=[pltpu.VMEM((tm, f_out), jnp.float32)],
        ),
        compiler_params=_compiler_params(est),
    )(adj_bf16, xl_bf16, xr_f32)


# ---------------------------------------------------------------------------
# Parameters / forward
# ---------------------------------------------------------------------------
def _glorot(key, f_in, f_out):
    lim = (6.0 / (f_in + f_out)) ** 0.5
    return jax.random.uniform(key, (f_in, f_out), jnp.float32, -lim, lim)


def init_sage_params(key, in_channels, hidden_channels, out_channels, num_layers):
    dims = [in_channels] + [hidden_channels] * (num_layers - 1) + [out_channels]
    convs, bns = [], []
    for i in range(num_layers):
        key, k1, k2 = jax.random.split(key, 3)
        wl = _glorot(k1, dims[i], dims[i + 1])   # lin_l (neighbor/aggregated path)
        wr = _glorot(k2, dims[i], dims[i + 1])   # lin_r (root/self path)
        b = jnp.zeros((1, dims[i + 1]), jnp.float32)
        convs.append((wl, wr, b))
    for i in range(num_layers - 1):
        key, k1, k2, k3, k4 = jax.random.split(key, 5)
        f = dims[i + 1]
        gamma = 1.0 + 0.1 * jax.random.normal(k1, (1, f), jnp.float32)
        beta = 0.1 * jax.random.normal(k2, (1, f), jnp.float32)
        mean = 0.1 * jax.random.normal(k3, (1, f), jnp.float32)
        var = 1.0 + 0.5 * jax.random.uniform(k4, (1, f), jnp.float32)
        bns.append((gamma, beta, mean, var))
    return {"convs": convs, "bns": bns}


@functools.partial(jax.jit,
                   static_argnames=("tm", "tk", "x_resident_budget_bytes"))
def sage_forward(params, x, adj_bf16, *, tm=512, tk=2048,
                 x_resident_budget_bytes=24 * _MIB):
    convs, bns = params["convs"], params["bns"]
    h = x.astype(jnp.bfloat16)          # stream activations in bf16 end-to-end
    for i in range(len(convs) - 1):
        wl, wr, b = convs[i]
        gamma, beta, mean, var = bns[i]
        # Fold eval-mode BatchNorm into the projection weights / bias.
        scale = gamma * jax.lax.rsqrt(var + BN_EPS)              # (1, F_out)
        wl_f = (wl * scale).astype(jnp.bfloat16)
        wr_f = (wr * scale).astype(jnp.bfloat16)
        b_f = (b - mean) * scale + beta                          # (1, F_out) f32
        h = sage_hidden_layer(adj_bf16, h, wl_f, wr_f, b_f, tm=tm, tk=tk,
                              x_resident_budget_bytes=x_resident_budget_bytes)
        # dropout: identity in inference mode
    wl, wr, b = convs[-1]
    # Hoist the final projections out of the K loop: one cheap XLA matmul each,
    # and the streamed aggregation operand shrinks from (N, F) to (N, F_out).
    h32 = h.astype(jnp.float32)
    xl = jnp.dot(h32, wl).astype(jnp.bfloat16)
    xr = jnp.dot(h32, wr) + b
    return sage_final_layer(adj_bf16, xl, xr, tm=tm, tk=tk)


def sage_reference(params, x, adj):
    """Pure-JAX f32 reference (matches the PyTorch module in eval mode)."""
    convs, bns = params["convs"], params["bns"]
    h = x
    for i in range(len(convs) - 1):
        wl, wr, b = convs[i]
        gamma, beta, mean, var = bns[i]
        z = (adj @ h) @ wl + h @ wr + b
        z = (z - mean) * jax.lax.rsqrt(var + BN_EPS) * gamma + beta
        h = jnp.maximum(z, 0.0)
    wl, wr, b = convs[-1]
    z = (adj @ h) @ wl + h @ wr + b
    return jax.nn.log_softmax(z, axis=-1)


if __name__ == "__main__":
    N = 512             # number of graph nodes (small demo)
    IN_C = 64           # in_channels
    HID_C = 64          # hidden_channels
    OUT_C = 16          # out_channels (classes)
    NUM_LAYERS = 3
    DROPOUT = 0.5       # unused (inference mode)
    # Small demo tiles -> 2x2 grid. Production: tm=512-1024, tk=2048-4096
    # (adj tile >= 2 MiB), keeping N/tm >= 2 (even) on v7x for both TensorCores.
    TM, TK = 256, 256

    key = jax.random.PRNGKey(0)
    k_feat, k_adj, k_params = jax.random.split(key, 3)

    # Node features.
    x = jax.random.normal(k_feat, (N, IN_C), jnp.float32)

    # Random sparse-ish adjacency, row-normalized (mean aggregation).
    edges = (jax.random.uniform(k_adj, (N, N)) < 0.05).astype(jnp.float32)
    deg = jnp.maximum(edges.sum(axis=1, keepdims=True), 1.0)
    adj = edges / deg
    adj_bf16 = adj.astype(jnp.bfloat16)   # halve HBM bytes of the dominant operand

    params = init_sage_params(k_params, IN_C, HID_C, OUT_C, NUM_LAYERS)
    ref = sage_reference(params, x, adj)

    # Path 1: x kept VMEM-resident inside the hidden-layer kernels (default).
    out_res = jax.block_until_ready(sage_forward(params, x, adj_bf16, tm=TM, tk=TK))
    # Path 2: force the streaming (tiled-x) hidden kernels.
    out_str = jax.block_until_ready(
        sage_forward(params, x, adj_bf16, tm=TM, tk=TK, x_resident_budget_bytes=0))

    for out in (out_res, out_str):
        assert out.shape == (N, OUT_C)
        assert bool(jnp.all(jnp.isfinite(out)))
        # Rows of log_softmax must exp-sum to 1.
        assert bool(jnp.allclose(jnp.exp(out).sum(axis=-1), 1.0, atol=1e-4))
        # Match the f32 reference (bf16 adjacency/activation/weight tolerance).
        err = float(jnp.max(jnp.abs(out - ref)))
        assert err < 1e-1, err
    assert bool(jnp.allclose(out_res, out_str, atol=2e-2))

    print("KERNEL_OK")
</pallas_src>

<mosaic_0001>
module attributes {stable_mosaic.version = 11 : i64} {
  func.func @_sage_hidden_resident_kernel(%arg0: i32, %arg1: i32, %arg2: memref<256x256xbf16, #tpu.memory_space<vmem>>, %arg3: memref<512x64xbf16, #tpu.memory_space<vmem>>, %arg4: memref<64x64xbf16, #tpu.memory_space<vmem>>, %arg5: memref<64x64xbf16, #tpu.memory_space<vmem>>, %arg6: memref<1x64xf32, #tpu.memory_space<vmem>>, %arg7: memref<256x64xbf16, #tpu.memory_space<vmem>>, %arg8: memref<256x64xf32, #tpu.memory_space<vmem>>) attributes {dimension_semantics = [#tpu.dimension_semantics<parallel>, #tpu.dimension_semantics<arbitrary>], iteration_bounds = array<i64: 2, 2>, scalar_prefetch = 0 : i64, scratch_operands = 1 : i64, tpu.core_type = #tpu.core_type<tc>, window_params = [{transform_indices = @transform_0, window_bounds = array<i64: 256, 256>}, {pipeline_mode = #tpu.pipeline_mode<synchronous>, transform_indices = @transform_1, window_bounds = array<i64: 512, 64>}, {pipeline_mode = #tpu.pipeline_mode<synchronous>, transform_indices = @transform_2, window_bounds = array<i64: 64, 64>}, {pipeline_mode = #tpu.pipeline_mode<synchronous>, transform_indices = @transform_3, window_bounds = array<i64: 64, 64>}, {pipeline_mode = #tpu.pipeline_mode<synchronous>, transform_indices = @transform_4, window_bounds = array<i64: 1, 64>}, {transform_indices = @transform_5, window_bounds = array<i64: 256, 64>}]} {
    %c0_i32 = arith.constant 0 : i32
    %0 = arith.cmpi eq, %arg1, %c0_i32 : i32
    %1 = arith.extui %0 : i1 to i32
    %c0_i32_0 = arith.constant 0 : i32
    %2 = arith.cmpi ne, %1, %c0_i32_0 : i32
    scf.if %2 {
      %cst_8 = arith.constant 0.000000e+00 : f32
      %15 = vector.broadcast %cst_8 : f32 to vector<256x64xf32>
      %c0_9 = arith.constant 0 : index
      %c0_10 = arith.constant 0 : index
      %16 = vector.load %arg8[%c0_9, %c0_10] : memref<256x64xf32, #tpu.memory_space<vmem>>, vector<256x64xf32>
      tpu.vector_store %arg8[%c0_9, %c0_10], %15 {strides = array<i32>} : memref<256x64xf32, #tpu.memory_space<vmem>>, vector<256x64xf32>,
    } else {
    }
    %c256_i32 = arith.constant 256 : i32
    %3 = arith.muli %arg1, %c256_i32 : i32
    %4 = tpu.assume_multiple %3, 256 : i32
    %5 = arith.index_cast %4 : i32 to index
    %c0 = arith.constant 0 : index
    %6 = vector.load %arg3[%5, %c0] : memref<512x64xbf16, #tpu.memory_space<vmem>>, vector<256x64xbf16>
    %c0_1 = arith.constant 0 : index
    %c0_2 = arith.constant 0 : index
    %7 = vector.load %arg8[%c0_1, %c0_2] : memref<256x64xf32, #tpu.memory_space<vmem>>, vector<256x64xf32>
    %c0_3 = arith.constant 0 : index
    %c0_4 = arith.constant 0 : index
    %8 = vector.load %arg2[%c0_3, %c0_4] : memref<256x256xbf16, #tpu.memory_space<vmem>>, vector<256x256xbf16>
    %cst = arith.constant dense<0.000000e+00> : vector<256x64xf32>
    %9 = tpu.matmul %8, %6, %cst {dimension_numbers = #tpu.dot_dimension_numbers<[1], [0], [0], [1], [0, 0, 1, 1], [], []>} : vector<256x256xbf16>, vector<256x64xbf16>, vector<256x64xf32> -> vector<256x64xf32>
    %10 = arith.addf %7, %9 : vector<256x64xf32>
    %c0_5 = arith.constant 0 : index
    %c0_6 = arith.constant 0 : index
    %11 = vector.load %arg8[%c0_5, %c0_6] : memref<256x64xf32, #tpu.memory_space<vmem>>, vector<256x64xf32>
    tpu.vector_store %arg8[%c0_5, %c0_6], %10 {strides = array<i32>} : memref<256x64xf32, #tpu.memory_space<vmem>>, vector<256x64xf32>,
    %c1_i32 = arith.constant 1 : i32
    %12 = arith.cmpi eq, %arg1, %c1_i32 : i32
    %13 = arith.extui %12 : i1 to i32
    %c0_i32_7 = arith.constant 0 : i32
    %14 = arith.cmpi ne, %13, %c0_i32_7 : i32
    scf.if %14 {
      %c256_i32_8 = arith.constant 256 : i32
      %15 = arith.muli %arg0, %c256_i32_8 : i32
      %16 = tpu.assume_multiple %15, 256 : i32
      %17 = arith.index_cast %16 : i32 to index
      %c0_9 = arith.constant 0 : index
      %18 = vector.load %arg3[%17, %c0_9] : memref<512x64xbf16, #tpu.memory_space<vmem>>, vector<256x64xbf16>
      %c0_10 = arith.constant 0 : index
      %c0_11 = arith.constant 0 : index
      %19 = vector.load %arg8[%c0_10, %c0_11] : memref<256x64xf32, #tpu.memory_space<vmem>>, vector<256x64xf32>
      %20 = arith.truncf %19 : vector<256x64xf32> to vector<256x64xbf16>
      %c0_12 = arith.constant 0 : index
      %c0_13 = arith.constant 0 : index
      %21 = vector.load %arg4[%c0_12, %c0_13] : memref<64x64xbf16, #tpu.memory_space<vmem>>, vector<64x64xbf16>
      %cst_14 = arith.constant dense<0.000000e+00> : vector<256x64xf32>
      %22 = tpu.matmul %20, %21, %cst_14 {dimension_numbers = #tpu.dot_dimension_numbers<[1], [0], [0], [1], [0, 0, 1, 1], [], []>} : vector<256x64xbf16>, vector<64x64xbf16>, vector<256x64xf32> -> vector<256x64xf32>
      %c0_15 = arith.constant 0 : index
      %c0_16 = arith.constant 0 : index
      %23 = vector.load %arg5[%c0_15, %c0_16] : memref<64x64xbf16, #tpu.memory_space<vmem>>, vector<64x64xbf16>
      %cst_17 = arith.constant dense<0.000000e+00> : vector<256x64xf32>
      %24 = tpu.matmul %18, %23, %cst_17 {dimension_numbers = #tpu.dot_dimension_numbers<[1], [0], [0], [1], [0, 0, 1, 1], [], []>} : vector<256x64xbf16>, vector<64x64xbf16>, vector<256x64xf32> -> vector<256x64xf32>
      %25 = arith.addf %22, %24 : vector<256x64xf32>
      %c0_18 = arith.constant 0 : index
      %c0_19 = arith.constant 0 : index
      %26 = vector.load %arg6[%c0_18, %c0_19] : memref<1x64xf32, #tpu.memory_space<vmem>>, vector<1x64xf32>
      %27 = vector.broadcast %26 : vector<1x64xf32> to vector<256x64xf32>
      %28 = arith.addf %25, %27 : vector<256x64xf32>
      %cst_20 = arith.constant 0.000000e+00 : f32
      %29 = vector.broadcast %cst_20 : f32 to vector<256x64xf32>
      %30 = arith.maximumf %28, %29 : vector<256x64xf32>
      %31 = arith.truncf %30 : vector<256x64xf32> to vector<256x64xbf16>
      %c0_21 = arith.constant 0 : index
      %c0_22 = arith.constant 0 : index
      %32 = vector.load %arg7[%c0_21, %c0_22] : memref<256x64xbf16, #tpu.memory_space<vmem>>, vector<256x64xbf16>
      tpu.vector_store %arg7[%c0_21, %c0_22], %31 {strides = array<i32>} : memref<256x64xbf16, #tpu.memory_space<vmem>>, vector<256x64xbf16>,
    } else {
    }
    return
  }
  func.func @transform_0(%arg0: i32, %arg1: i32) -> (i32, i32) {
    %c0_i32 = arith.constant 0 : i32
    return %arg0, %arg1 : i32, i32
  }
  func.func @transform_1(%arg0: i32, %arg1: i32) -> (i32, i32) {
    %c0_i32 = arith.constant 0 : i32
    %c0_i32_0 = arith.constant 0 : i32
    %c0_i32_1 = arith.constant 0 : i32
    return %c0_i32, %c0_i32_0 : i32, i32
  }
  func.func @transform_2(%arg0: i32, %arg1: i32) -> (i32, i32) {
    %c0_i32 = arith.constant 0 : i32
    %c0_i32_0 = arith.constant 0 : i32
    %c0_i32_1 = arith.constant 0 : i32
    return %c0_i32, %c0_i32_0 : i32, i32
  }
  func.func @transform_3(%arg0: i32, %arg1: i32) -> (i32, i32) {
    %c0_i32 = arith.constant 0 : i32
    %c0_i32_0 = arith.constant 0 : i32
    %c0_i32_1 = arith.constant 0 : i32
    return %c0_i32, %c0_i32_0 : i32, i32
  }
  func.func @transform_4(%arg0: i32, %arg1: i32) -> (i32, i32) {
    %c0_i32 = arith.constant 0 : i32
    %c0_i32_0 = arith.constant 0 : i32
    %c0_i32_1 = arith.constant 0 : i32
    return %c0_i32, %c0_i32_0 : i32, i32
  }
  func.func @transform_5(%arg0: i32, %arg1: i32) -> (i32, i32) {
    %c0_i32 = arith.constant 0 : i32
    %c0_i32_0 = arith.constant 0 : i32
    return %arg0, %c0_i32 : i32, i32
  }
}

module attributes {stable_mosaic.version = 11 : i64} {
  func.func @_sage_final_kernel(%arg0: i32, %arg1: i32, %arg2: memref<256x256xbf16, #tpu.memory_space<vmem>>, %arg3: memref<256x16xbf16, #tpu.memory_space<vmem>>, %arg4: memref<256x16xf32, #tpu.memory_space<vmem>>, %arg5: memref<256x16xf32, #tpu.memory_space<vmem>>, %arg6: memref<256x16xf32, #tpu.memory_space<vmem>>) attributes {dimension_semantics = [#tpu.dimension_semantics<parallel>, #tpu.dimension_semantics<arbitrary>], iteration_bounds = array<i64: 2, 2>, scalar_prefetch = 0 : i64, scratch_operands = 1 : i64, tpu.core_type = #tpu.core_type<tc>, window_params = [{transform_indices = @transform_0, window_bounds = array<i64: 256, 256>}, {transform_indices = @transform_1, window_bounds = array<i64: 256, 16>}, {transform_indices = @transform_2, window_bounds = array<i64: 256, 16>}, {transform_indices = @transform_3, window_bounds = array<i64: 256, 16>}]} {
    %c0_i32 = arith.constant 0 : i32
    %0 = arith.cmpi eq, %arg1, %c0_i32 : i32
    %1 = arith.extui %0 : i1 to i32
    %c0_i32_0 = arith.constant 0 : i32
    %2 = arith.cmpi ne, %1, %c0_i32_0 : i32
    scf.if %2 {
      %cst_9 = arith.constant 0.000000e+00 : f32
      %12 = vector.broadcast %cst_9 : f32 to vector<256x16xf32>
      %c0_10 = arith.constant 0 : index
      %c0_11 = arith.constant 0 : index
      %13 = vector.load %arg6[%c0_10, %c0_11] : memref<256x16xf32, #tpu.memory_space<vmem>>, vector<256x16xf32>
      tpu.vector_store %arg6[%c0_10, %c0_11], %12 {strides = array<i32>} : memref<256x16xf32, #tpu.memory_space<vmem>>, vector<256x16xf32>,
    } else {
    }
    %c0 = arith.constant 0 : index
    %c0_1 = arith.constant 0 : index
    %3 = vector.load %arg6[%c0, %c0_1] : memref<256x16xf32, #tpu.memory_space<vmem>>, vector<256x16xf32>
    %c0_2 = arith.constant 0 : index
    %c0_3 = arith.constant 0 : index
    %4 = vector.load %arg2[%c0_2, %c0_3] : memref<256x256xbf16, #tpu.memory_space<vmem>>, vector<256x256xbf16>
    %c0_4 = arith.constant 0 : index
    %c0_5 = arith.constant 0 : index
    %5 = vector.load %arg3[%c0_4, %c0_5] : memref<256x16xbf16, #tpu.memory_space<vmem>>, vector<256x16xbf16>
    %cst = arith.constant dense<0.000000e+00> : vector<256x16xf32>
    %6 = tpu.matmul %4, %5, %cst {dimension_numbers = #tpu.dot_dimension_numbers<[1], [0], [0], [1], [0, 0, 1, 1], [], []>} : vector<256x256xbf16>, vector<256x16xbf16>, vector<256x16xf32> -> vector<256x16xf32>
    %7 = arith.addf %3, %6 : vector<256x16xf32>
    %c0_6 = arith.constant 0 : index
    %c0_7 = arith.constant 0 : index
    %8 = vector.load %arg6[%c0_6, %c0_7] : memref<256x16xf32, #tpu.memory_space<vmem>>, vector<256x16xf32>
    tpu.vector_store %arg6[%c0_6, %c0_7], %7 {strides = array<i32>} : memref<256x16xf32, #tpu.memory_space<vmem>>, vector<256x16xf32>,
    %c1_i32 = arith.constant 1 : i32
    %9 = arith.cmpi eq, %arg1, %c1_i32 : i32
    %10 = arith.extui %9 : i1 to i32
    %c0_i32_8 = arith.constant 0 : i32
    %11 = arith.cmpi ne, %10, %c0_i32_8 : i32
    scf.if %11 {
      %c0_9 = arith.constant 0 : index
      %c0_10 = arith.constant 0 : index
      %12 = vector.load %arg6[%c0_9, %c0_10] : memref<256x16xf32, #tpu.memory_space<vmem>>, vector<256x16xf32>
      %c0_11 = arith.constant 0 : index
      %c0_12 = arith.constant 0 : index
      %13 = vector.load %arg4[%c0_11, %c0_12] : memref<256x16xf32, #tpu.memory_space<vmem>>, vector<256x16xf32>
      %14 = arith.addf %12, %13 : vector<256x16xf32>
      %cst_13 = arith.constant dense<0xFF800000> : vector<256xf32>
      %15 = vector.multi_reduction <maximumf>, %14, %cst_13 [1] : vector<256x16xf32> to vector<256xf32>
      %16 = vector.shape_cast %15 : vector<256xf32> to vector<256x1xf32>
      %17 = vector.broadcast %16 : vector<256x1xf32> to vector<256x16xf32>
      %18 = arith.subf %14, %17 : vector<256x16xf32>
      %19 = math.exp %18 : vector<256x16xf32>
      %cst_14 = arith.constant dense<0.000000e+00> : vector<256xf32>
      %20 = vector.multi_reduction <add>, %19, %cst_14 [1] : vector<256x16xf32> to vector<256xf32>
      %21 = vector.shape_cast %20 : vector<256xf32> to vector<256x1xf32>
      %22 = math.log %21 : vector<256x1xf32>
      %23 = vector.broadcast %22 : vector<256x1xf32> to vector<256x16xf32>
      %24 = arith.subf %18, %23 : vector<256x16xf32>
      %c0_15 = arith.constant 0 : index
      %c0_16 = arith.constant 0 : index
      %25 = vector.load %arg5[%c0_15, %c0_16] : memref<256x16xf32, #tpu.memory_space<vmem>>, vector<256x16xf32>
      tpu.vector_store %arg5[%c0_15, %c0_16], %24 {strides = array<i32>} : memref<256x16xf32, #tpu.memory_space<vmem>>, vector<256x16xf32>,
    } else {
    }
    return
  }
  func.func @transform_0(%arg0: i32, %arg1: i32) -> (i32, i32) {
    %c0_i32 = arith.constant 0 : i32
    return %arg0, %arg1 : i32, i32
  }
  func.func @transform_1(%arg0: i32, %arg1: i32) -> (i32, i32) {
    %c0_i32 = arith.constant 0 : i32
    %c0_i32_0 = arith.constant 0 : i32
    return %arg1, %c0_i32 : i32, i32
  }
  func.func @transform_2(%arg0: i32, %arg1: i32) -> (i32, i32) {
    %c0_i32 = arith.constant 0 : i32
    %c0_i32_0 = arith.constant 0 : i32
    return %arg0, %c0_i32 : i32, i32
  }
  func.func @transform_3(%arg0: i32, %arg1: i32) -> (i32, i32) {
    %c0_i32 = arith.constant 0 : i32
    %c0_i32_0 = arith.constant 0 : i32
    return %arg0, %c0_i32 : i32, i32
  }
}

</mosaic_0001>

<bundles_post_ra>
// kernel: sage_forward.5
= control target key start
LH: loop header
LB: loop body
LE: loop exit
PB: predicated region body
PF: predicated region fallthrough
CT: control target
= control target key end

     0   :  { %s2152_s12 = smov 0   ;;  %s2154_s13 = smov 0   ;;  %s2853_s0 = inlined_call_operand.vmem [shape: bf16[512,512], index: 0, kind: input, shape index: {}]   ;;  %s2854_s1 = inlined_call_operand.vmem [shape: bf16[512,16], index: 1, kind: input, shape index: {}]   ;;  %s2855_s2 = inlined_call_operand.vmem [shape: f32[512,16], index: 2, kind: input, shape index: {}]   ;;  %s2856_s3 = inlined_call_operand.vmem [shape: f32[512,16], index: 3, kind: output, shape index: {}]  }
   0x1   :  { %s2156_s14 = smov 0   ;;  %s2158_s15 = smov 0  }
   0x2   :  { %s2160_s16 = smov 0   ;;  %s2162_s17 = smov 0  }
   0x3   :  { %s2164_s18 = smov 0  }
   0x4 LB: > { %s22_s19 = sadd.s32 1, %s2121_s16  ;;  %s25_s20 = sadd.s32 1, %s2125_s17  ;;  %s2129_s18 = sphi %s2164_s18, %s13_s18   ;;  %s2125_s17 = sphi %s2162_s17, %s2862_s17   ;;  %s2121_s16 = sphi %s2160_s16, %s2861_s16   ;;  %s2117_s15 = sphi %s2158_s15, %s2860_s15   ;;  %s2113_s14 = sphi %s2156_s14, %s2859_s14   ;;  %s2109_s13 = sphi %s2154_s13, %s2858_s13   ;;  %s2105_s12 = sphi %s2152_s12, %s2857_s12  }
   0x5   : > { %p23_p0 = scmp.ge.s32.totalorder %s22_s19, 2  ;;  %p41_p1 = scmp.ne.s32.totalorder %s2109_s13, %s2105_s12 }
   0x6   : > { %p42_p2 = scmp.eq.s32.totalorder %s2129_s18, 0  ;;  %s34_s24 = sadd.s32 1, %s2109_s13 }
   0x7   : > { %s2864_s19 = smov (%p23_p0, %s22_s19), 0  ;;  %s2866_s20 = smov (!%p23_p0, %s25_s20), %s2125_s17 }
   0x8   : > { %p43_p3 = por %p42_p2, %p41_p1  ;;  %p27_p4 = scmp.ge.s32.totalorder %s2866_s20, 2 }
   0x9   : > { %s30_s21 = ssub.s32 %s2121_s16, %s2864_s19  ;;  %p1631_p6 = scmp.ge.s32.totalorder %s2129_s18, 4 }
   0xa   : > { %s2868_s20 = smov (%p27_p4, %s2866_s20), 0 }
   0xb   : > { %s29_s22 = ssub.s32 %s2125_s17, %s2868_s20  ;;  %145 = sbr.rel (%p1631_p6) target bundleno = 39 (0x27), region = 16 }
   0xc   : > { %s31_s23 = sor.u32 %s30_s21, %s29_s22 }
   0xd   : > { %p32_p5 = scmp.eq.s32.totalorder %s31_s23, 0 }
   0xf   : > { %s2203_s25 = scalar_select %p32_p5, %s2109_s13, %s34_s24  }
  0x10   : > { %148 = sbr.rel (!%p43_p3) target bundleno = 39 (0x27), region = 20  ;;  %s150_s26 = sand.u32 (%p43_p3), 1, %s2109_s13  }
  0x11   : > { %s1634_s27 = sshll.u32 (%p43_p3), %s2121_s16, 1  ;;  %s1632_s28 = sshll.u32 (%p43_p3), %s150_s26, 8 }
  0x12   : > { %s1697_s29 = sshll.u32 (%p43_p3), %s2125_s17, 7  ;;  %s2217_s8 = scalar_lea.vmem (%p43_p3), [#allocation3], %s1632_s28 }
  0x13   : > { %s156_s30 = sadd.s32 (%p43_p3), %s1697_s29, %s1634_s27 }
  0x14   : > { %s1636_s4 = sshll.u32 (%p43_p3), %s156_s30, 2 }
  0x15   : > { %s2212_s7 = scalar_lea.vmem %s2853_s0, %s1636_s4 }
  0x16   : > { %v249_v0 = vld [vmem:[%s2212_s7] sm:$0xff]  ;;  %v251_v1 = vld [vmem:[%s2212_s7 + $0x10] sm:$0xff] }
  0x17   : > { %v253_v2 = vld [vmem:[%s2212_s7 + $0x20] sm:$0xff]  ;;  %250 = vst [vmem:[%s2217_s8] sm:$0xff] %v249_v0  ;;  %252 = vst [vmem:[%s2217_s8 + $0x8] sm:$0xff] %v251_v1  ;;  %v255_v3 = vld [vmem:[%s2212_s7 + $0x30] sm:$0xff] }
  0x18   : > { %254 = vst [vmem:[%s2217_s8 + $0x10] sm:$0xff] %v253_v2  ;;  %v257_v4 = vld [vmem:[%s2212_s7 + $0x40] sm:$0xff]  ;;  %v259_v5 = vld [vmem:[%s2212_s7 + $0x50] sm:$0xff]  ;;  %256 = vst [vmem:[%s2217_s8 + $0x18] sm:$0xff] %v255_v3 }
  0x19   : > { %258 = vst [vmem:[%s2217_s8 + $0x20] sm:$0xff] %v257_v4  ;;  %260 = vst [vmem:[%s2217_s8 + $0x28] sm:$0xff] %v259_v5  ;;  %v261_v6 = vld [vmem:[%s2212_s7 + $0x60] sm:$0xff]  ;;  %v263_v7 = vld [vmem:[%s2212_s7 + $0x70] sm:$0xff] }
  0x1a   : > { %v265_v8 = vld [vmem:[%s2212_s7 + $0x80] sm:$0xff]  ;;  %262 = vst [vmem:[%s2217_s8 + $0x30] sm:$0xff] %v261_v6  ;;  %264 = vst [vmem:[%s2217_s8 + $0x38] sm:$0xff] %v263_v7  ;;  %v267_v9 = vld [vmem:[%s2212_s7 + $0x90] sm:$0xff] }
  0x1b   : > { %266 = vst [vmem:[%s2217_s8 + $0x40] sm:$0xff] %v265_v8  ;;  %v269_v10 = vld [vmem:[%s2212_s7 + $0xa0] sm:$0xff]  ;;  %v271_v11 = vld [vmem:[%s2212_s7 + $0xb0] sm:$0xff]  ;;  %268 = vst [vmem:[%s2217_s8 + $0x48] sm:$0xff] %v267_v9 }
  0x1c   : > { %270 = vst [vmem:[%s2217_s8 + $0x50] sm:$0xff] %v269_v10  ;;  %272 = vst [vmem:[%s2217_s8 + $0x58] sm:$0xff] %v271_v11  ;;  %v273_v12 = vld [vmem:[%s2212_s7 + $0xc0] sm:$0xff]  ;;  %v275_v13 = vld [vmem:[%s2212_s7 + $0xd0] sm:$0xff] }
  0x1d   : > { %v277_v14 = vld [vmem:[%s2212_s7 + $0xe0] sm:$0xff]  ;;  %274 = vst [vmem:[%s2217_s8 + $0x60] sm:$0xff] %v273_v12  ;;  %276 = vst [vmem:[%s2217_s8 + $0x68] sm:$0xff] %v275_v13  ;;  %v279_v15 = vld [vmem:[%s2212_s7 + $0xf0] sm:$0xff] }
  0x1e   : > { %278 = vst [vmem:[%s2217_s8 + $0x70] sm:$0xff] %v277_v14  ;;  %v281_v16 = vld [vmem:[%s2212_s7 + $0x100] sm:$0xff]  ;;  %v283_v17 = vld [vmem:[%s2212_s7 + $0x110] sm:$0xff]  ;;  %280 = vst [vmem:[%s2217_s8 + $0x78] sm:$0xff] %v279_v15 }
  0x1f   : > { %282 = vst [vmem:[%s2217_s8 + $0x80] sm:$0xff] %v281_v16  ;;  %284 = vst [vmem:[%s2217_s8 + $0x88] sm:$0xff] %v283_v17  ;;  %v285_v18 = vld [vmem:[%s2212_s7 + $0x120] sm:$0xff]  ;;  %v287_v19 = vld [vmem:[%s2212_s7 + $0x130] sm:$0xff] }
  0x20   : > { %v289_v20 = vld [vmem:[%s2212_s7 + $0x140] sm:$0xff]  ;;  %286 = vst [vmem:[%s2217_s8 + $0x90] sm:$0xff] %v285_v18  ;;  %288 = vst [vmem:[%s2217_s8 + $0x98] sm:$0xff] %v287_v19  ;;  %v291_v21 = vld [vmem:[%s2212_s7 + $0x150] sm:$0xff] }
  0x21   : > { %290 = vst [vmem:[%s2217_s8 + $0xa0] sm:$0xff] %v289_v20  ;;  %v293_v22 = vld [vmem:[%s2212_s7 + $0x160] sm:$0xff]  ;;  %v295_v23 = vld [vmem:[%s2212_s7 + $0x170] sm:$0xff]  ;;  %292 = vst [vmem:[%s2217_s8 + $0xa8] sm:$0xff] %v291_v21 }
  0x22   : > { %294 = vst [vmem:[%s2217_s8 + $0xb0] sm:$0xff] %v293_v22  ;;  %296 = vst [vmem:[%s2217_s8 + $0xb8] sm:$0xff] %v295_v23  ;;  %v297_v24 = vld [vmem:[%s2212_s7 + $0x180] sm:$0xff]  ;;  %v299_v25 = vld [vmem:[%s2212_s7 + $0x190] sm:$0xff] }
  0x23   : > { %v301_v26 = vld [vmem:[%s2212_s7 + $0x1a0] sm:$0xff]  ;;  %298 = vst [vmem:[%s2217_s8 + $0xc0] sm:$0xff] %v297_v24  ;;  %300 = vst [vmem:[%s2217_s8 + $0xc8] sm:$0xff] %v299_v25  ;;  %v303_v27 = vld [vmem:[%s2212_s7 + $0x1b0] sm:$0xff] }
  0x24   : > { %302 = vst [vmem:[%s2217_s8 + $0xd0] sm:$0xff] %v301_v26  ;;  %v305_v28 = vld [vmem:[%s2212_s7 + $0x1c0] sm:$0xff]  ;;  %v307_v29 = vld [vmem:[%s2212_s7 + $0x1d0] sm:$0xff]  ;;  %304 = vst [vmem:[%s2217_s8 + $0xd8] sm:$0xff] %v303_v27 }
  0x25   : > { %306 = vst [vmem:[%s2217_s8 + $0xe0] sm:$0xff] %v305_v28  ;;  %308 = vst [vmem:[%s2217_s8 + $0xe8] sm:$0xff] %v307_v29  ;;  %v309_v30 = vld [vmem:[%s2212_s7 + $0x1e0] sm:$0xff]  ;;  %v311_v31 = vld [vmem:[%s2212_s7 + $0x1f0] sm:$0xff] }
  0x26   : > { %310 = vst [vmem:[%s2217_s8 + $0xf0] sm:$0xff] %v309_v30  ;;  %312 = vst [vmem:[%s2217_s8 + $0xf8] sm:$0xff] %v311_v31 }
  0x27 PF: > { %p1637_p7 = scmp.ge.s32.totalorder %s2129_s18, 1  ;;  %p335_p8 = scmp.lt.s32.totalorder %s2129_s18, 5 }
  0x29   : > { %p336_p9 = pnand %p1637_p7, %p335_p8 }
  0x2a   : > { %s342_s9 = sand.u32 (!%p336_p9), 1, %s2105_s12   ;;  %s1639_s10 = sshll.u32 (!%p336_p9), %s2113_s14, 5 }
  0x2b   : > { %339 = sbr.rel (%p336_p9) target bundleno = 749 (0x2ed), region = 66  ;;  %s1638_s11 = sshll.u32 (!%p336_p9), %s342_s9, 8 }
  0x2c   : > { %p378_p10 = scmp.lt.s32.totalorder (!%p336_p9), %s1639_s10, 63  ;;  %s1641_s21 = sshll.u32 (!%p336_p9), %s2117_s15, 5 }
  0x2d   : > { %p384_p11 = scmp.lt.s32.totalorder (!%p336_p9), %s1641_s21, 63  ;;  %s2300_s15 = scalar_lea.vmem (!%p336_p9), [#allocation3], %s1638_s11 }
  0x2e   : > { %p1645_p12 = scmp.ne.s32.totalorder (!%p336_p9), %s2113_s14, 0 }
  0x30   : > { %s2870_s10 = smov (!%p378_p10, %s1639_s10), 63  ;;  %s2872_s21 = smov (!%p384_p11, %s1641_s21), 63 }
  0x31   : > { %s1640_s22 = sshll.u32 %s2870_s10, 2  ;;  %s1642_s27 = sshll.u32 %s2872_s21, 3 }
  0x32   : > { %s2288_s26 = scalar_lea.vmem %s2854_s1, %s1640_s22  ;;  %s2293_s30 = scalar_lea.vmem %s2855_s2, %s1642_s27 }
  0x33   : > { %s2298_s5 = scalar_lea.vmem %s2856_s3, %s1642_s27  ;;  %399 = sbr.rel (%p1645_p12) target bundleno = 73 (0x49), region = 74 }
  0x38   : > { %vm400_vm0 = vcmask 130048   ;;  %v2131_v32 = vmov 0.0  }
  0x39   : > { %401 = vst.msk [vmem:[#allocation2] sm:$0xff] %vm400_vm0, %v2131_v32  ;;  %402 = vst.msk [vmem:[#allocation2 + $0x8] sm:$0xff] %vm400_vm0, %v2131_v32 }
  0x3a   : > { %403 = vst.msk [vmem:[#allocation2 + $0x10] sm:$0xff] %vm400_vm0, %v2131_v32  ;;  %404 = vst.msk [vmem:[#allocation2 + $0x18] sm:$0xff] %vm400_vm0, %v2131_v32 }
  0x3b   : > { %405 = vst.msk [vmem:[#allocation2 + $0x20] sm:$0xff] %vm400_vm0, %v2131_v32  ;;  %406 = vst.msk [vmem:[#allocation2 + $0x28] sm:$0xff] %vm400_vm0, %v2131_v32 }
  0x3c   : > { %407 = vst.msk [vmem:[#allocation2 + $0x30] sm:$0xff] %vm400_vm0, %v2131_v32  ;;  %408 = vst.msk [vmem:[#allocation2 + $0x38] sm:$0xff] %vm400_vm0, %v2131_v32 }
  0x3d   : > { %409 = vst.msk [vmem:[#allocation2 + $0x40] sm:$0xff] %vm400_vm0, %v2131_v32  ;;  %410 = vst.msk [vmem:[#allocation2 + $0x48] sm:$0xff] %vm400_vm0, %v2131_v32 }
  0x3e   : > { %411 = vst.msk [vmem:[#allocation2 + $0x50] sm:$0xff] %vm400_vm0, %v2131_v32  ;;  %412 = vst.msk [vmem:[#allocation2 + $0x58] sm:$0xff] %vm400_vm0, %v2131_v32 }
  0x3f   : > { %413 = vst.msk [vmem:[#allocation2 + $0x60] sm:$0xff] %vm400_vm0, %v2131_v32  ;;  %414 = vst.msk [vmem:[#allocation2 + $0x68] sm:$0xff] %vm400_vm0, %v2131_v32 }
  0x40   : > { %415 = vst.msk [vmem:[#allocation2 + $0x70] sm:$0xff] %vm400_vm0, %v2131_v32  ;;  %416 = vst.msk [vmem:[#allocation2 + $0x78] sm:$0xff] %vm400_vm0, %v2131_v32 }
  0x41   : > { %417 = vst.msk [vmem:[#allocation2 + $0x80] sm:$0xff] %vm400_vm0, %v2131_v32  ;;  %418 = vst.msk [vmem:[#allocation2 + $0x88] sm:$0xff] %vm400_vm0, %v2131_v32 }
  0x42   : > { %419 = vst.msk [vmem:[#allocation2 + $0x90] sm:$0xff] %vm400_vm0, %v2131_v32  ;;  %420 = vst.msk [vmem:[#allocation2 + $0x98] sm:$0xff] %vm400_vm0, %v2131_v32 }
  0x43   : > { %421 = vst.msk [vmem:[#allocation2 + $0xa0] sm:$0xff] %vm400_vm0, %v2131_v32  ;;  %422 = vst.msk [vmem:[#allocation2 + $0xa8] sm:$0xff] %vm400_vm0, %v2131_v32 }
  0x44   : > { %423 = vst.msk [vmem:[#allocation2 + $0xb0] sm:$0xff] %vm400_vm0, %v2131_v32  ;;  %424 = vst.msk [vmem:[#allocation2 + $0xb8] sm:$0xff] %vm400_vm0, %v2131_v32 }
  0x45   : > { %425 = vst.msk [vmem:[#allocation2 + $0xc0] sm:$0xff] %vm400_vm0, %v2131_v32  ;;  %426 = vst.msk [vmem:[#allocation2 + $0xc8] sm:$0xff] %vm400_vm0, %v2131_v32 }
  0x46   : > { %427 = vst.msk [vmem:[#allocation2 + $0xd0] sm:$0xff] %vm400_vm0, %v2131_v32  ;;  %428 = vst.msk [vmem:[#allocation2 + $0xd8] sm:$0xff] %vm400_vm0, %v2131_v32 }
  0x47   : > { %429 = vst.msk [vmem:[#allocation2 + $0xe0] sm:$0xff] %vm400_vm0, %v2131_v32  ;;  %430 = vst.msk [vmem:[#allocation2 + $0xe8] sm:$0xff] %vm400_vm0, %v2131_v32 }
  0x48   : > { %431 = vst.msk [vmem:[#allocation2 + $0xf0] sm:$0xff] %vm400_vm0, %v2131_v32  ;;  %432 = vst.msk [vmem:[#allocation2 + $0xf8] sm:$0xff] %vm400_vm0, %v2131_v32 }
  0x49 PF: > { %v1883_v33 = vld [vmem:[%s2288_s26 + $0x78] sm:$0xff]   ;;  %v1885_v35 = vld [vmem:[%s2288_s26 + $0x70] sm:$0xff]   ;;  %v1887_v37 = vld [vmem:[%s2288_s26 + $0x68] sm:$0xff]   ;;  %vm978_vm1 = vcmask 130048   ;;  %p1694_p13 = scmp.ne.s32.totalorder %s2113_s14, 1 }
  0x4a   : > { %v1884_v34 = vld [vmem:[%s2288_s26 + $0x38] sm:$0xff]   ;;  %1698 = vmatprep.subr.bf16.mxu0 %v1883_v33  ;;  %1810 = vmatprep.subr.bf16.mxu1 %v1883_v33  ;;  %v1886_v36 = vld [vmem:[%s2288_s26 + $0x30] sm:$0xff]   ;;  %v1888_v38 = vld [vmem:[%s2288_s26 + $0x28] sm:$0xff]  }
  0x4b   : > { %1699 = vmatpush3.bf16.msra.mxu0 %v1884_v34  ;;  %1818 = vmatpush3.bf16.msra.mxu1 %v1884_v34  ;;  %v1889_v39 = vld [vmem:[%s2288_s26 + $0x60] sm:$0xff]   ;;  %v1891_v41 = vld [vmem:[%s2288_s26 + $0x58] sm:$0xff]   ;;  %v1893_v43 = vld [vmem:[%s2288_s26 + $0x50] sm:$0xff]  }
  0x4c   : > { %1700 = vmatprep.subr.bf16.mxu0 %v1885_v35  ;;  %1811 = vmatprep.subr.bf16.mxu1 %v1885_v35  ;;  %v1890_v40 = vld [vmem:[%s2288_s26 + $0x20] sm:$0xff]   ;;  %v1892_v42 = vld [vmem:[%s2288_s26 + $0x18] sm:$0xff]   ;;  %v1894_v46 = vld [vmem:[%s2288_s26 + $0x10] sm:$0xff]  }
  0x4d   : > { %v1901_v44 = vld [vmem:[%s2300_s15 + $0x4] ss:$8 sps:$4 sm:$0xff]   ;;  %v1899_v51 = vld [vmem:[%s2300_s15] ss:$8 sps:$4 sm:$0xff]   ;;  %v1905_v53 = vld [vmem:[%s2300_s15 + $0x14] ss:$8 sps:$4 sm:$0xff]  }
  0x4e   : > { %v1904_v45 = vld [vmem:[%s2300_s15 + $0x84] ss:$8 sps:$4 sm:$0xff]   ;;  %817 = vmatprep.mubr.bf16.mxu0 %v1901_v44  ;;  %v1902_v52 = vld [vmem:[%s2300_s15 + $0x80] ss:$8 sps:$4 sm:$0xff]   ;;  %v1907_v54 = vld [vmem:[%s2300_s15 + $0x94] ss:$8 sps:$4 sm:$0xff]  }
  0x4f   : > { %1701 = vmatpush3.bf16.msra.mxu0 %v1886_v36  ;;  %1819 = vmatpush3.bf16.msra.mxu1 %v1886_v36  ;;  %v1895_v47 = vld [vmem:[%s2288_s26 + $0x48] sm:$0xff]   ;;  %v1897_v49 = vld [vmem:[%s2288_s26 + $0x40] sm:$0xff]   ;;  %v1909_v55 = vld [vmem:[%s2300_s15 + $0x10] ss:$8 sps:$4 sm:$0xff]  }
  0x50   : > { %1702 = vmatprep.subr.bf16.mxu0 %v1887_v37  ;;  %1812 = vmatprep.subr.bf16.mxu1 %v1887_v37  ;;  %v1896_v48 = vld [vmem:[%s2288_s26 + $0x8] sm:$0xff]   ;;  %v1898_v50 = vld [vmem:[%s2288_s26] sm:$0xff]   ;;  %v1910_v56 = vld [vmem:[%s2300_s15 + $0x90] ss:$8 sps:$4 sm:$0xff]  }
  0x51   : > { %881 = vmatprep.mubr.bf16.mxu1 %v1904_v45  ;;  %v1911_v57 = vld [vmem:[%s2300_s15 + $0x24] ss:$8 sps:$4 sm:$0xff]   ;;  %v1915_v59 = vld [vmem:[%s2300_s15 + $0x20] ss:$8 sps:$4 sm:$0xff]   ;;  %v1917_v61 = vld [vmem:[%s2300_s15 + $0x34] ss:$8 sps:$4 sm:$0xff]  }
  0x52   : > { %v1913_v58 = vld [vmem:[%s2300_s15 + $0xa4] ss:$8 sps:$4 sm:$0xff]   ;;  %v1916_v60 = vld [vmem:[%s2300_s15 + $0xa0] ss:$8 sps:$4 sm:$0xff]   ;;  %v1919_v62 = vld [vmem:[%s2300_s15 + $0xb4] ss:$8 sps:$4 sm:$0xff]  }
  0x53   : > { %1703 = vmatpush3.bf16.msra.mxu0 %v1888_v38  ;;  %1820 = vmatpush3.bf16.msra.mxu1 %v1888_v38  ;;  %v1921_v63 = vld [vmem:[%s2300_s15 + $0x30] ss:$8 sps:$4 sm:$0xff]   ;;  %v1923_v1 = vld [vmem:[%s2300_s15 + $0x44] ss:$8 sps:$4 sm:$0xff]   ;;  %v1927_v3 = vld [vmem:[%s2300_s15 + $0x40] ss:$8 sps:$4 sm:$0xff]  }
  0x54   : > { %1704 = vmatprep.subr.bf16.mxu0 %v1889_v39  ;;  %1813 = vmatprep.subr.bf16.mxu1 %v1889_v39  ;;  %v1922_v0 = vld [vmem:[%s2300_s15 + $0xb0] ss:$8 sps:$4 sm:$0xff]   ;;  %v1925_v2 = vld [vmem:[%s2300_s15 + $0xc4] ss:$8 sps:$4 sm:$0xff]   ;;  %v1928_v4 = vld [vmem:[%s2300_s15 + $0xc0] ss:$8 sps:$4 sm:$0xff]  }
  0x55   : > { %v1929_v5 = vld [vmem:[%s2300_s15 + $0x54] ss:$8 sps:$4 sm:$0xff]   ;;  %v1933_v7 = vld [vmem:[%s2300_s15 + $0x50] ss:$8 sps:$4 sm:$0xff]   ;;  %v1935_v9 = vld [vmem:[%s2300_s15 + $0x64] ss:$8 sps:$4 sm:$0xff]  }
  0x56   : > { %v1931_v6 = vld [vmem:[%s2300_s15 + $0xd4] ss:$8 sps:$4 sm:$0xff]   ;;  %v1934_v8 = vld [vmem:[%s2300_s15 + $0xd0] ss:$8 sps:$4 sm:$0xff]   ;;  %v1937_v10 = vld [vmem:[%s2300_s15 + $0xe4] ss:$8 sps:$4 sm:$0xff]  }
  0x57   : > { %1705 = vmatpush3.bf16.msra.mxu0 %v1890_v40  ;;  %1821 = vmatpush3.bf16.msra.mxu1 %v1890_v40  ;;  %v1939_v11 = vld [vmem:[%s2300_s15 + $0x60] ss:$8 sps:$4 sm:$0xff]   ;;  %v1941_v13 = vld [vmem:[%s2300_s15 + $0x74] ss:$8 sps:$4 sm:$0xff]   ;;  %v1945_v15 = vld [vmem:[%s2300_s15 + $0x70] ss:$8 sps:$4 sm:$0xff]  }
  0x58   : > { %1706 = vmatprep.subr.bf16.mxu0 %v1891_v41  ;;  %1814 = vmatprep.subr.bf16.mxu1 %v1891_v41  ;;  %v1940_v12 = vld [vmem:[%s2300_s15 + $0xe0] ss:$8 sps:$4 sm:$0xff]   ;;  %v1943_v14 = vld [vmem:[%s2300_s15 + $0xf4] ss:$8 sps:$4 sm:$0xff]   ;;  %v1946_v16 = vld [vmem:[%s2300_s15 + $0xf0] ss:$8 sps:$4 sm:$0xff]  }
  0x59   : > { %v433_v19 = vld [vmem:[#allocation2] sm:$0xff]  ;;  %v434_v29 = vld [vmem:[#allocation2 + $0x8] sm:$0xff]  ;;  %v435_v39 = vld [vmem:[#allocation2 + $0x10] sm:$0xff] }
  0x5a   : > { %v449_v21 = vld [vmem:[#allocation2 + $0x80] sm:$0xff]  ;;  %v450_v31 = vld [vmem:[#allocation2 + $0x88] sm:$0xff]  ;;  %v451_v41 = vld [vmem:[#allocation2 + $0x90] sm:$0xff] }
  0x5b   : > { %1707 = vmatpush3.bf16.msra.mxu0 %v1892_v42  ;;  %1822 = vmatpush3.bf16.msra.mxu1 %v1892_v42 }
  0x5c   : > { %1708 = vmatprep.subr.bf16.mxu0 %v1893_v43  ;;  %1815 = vmatprep.subr.bf16.mxu1 %v1893_v43 }
  0x5f   : > { %1709 = vmatpush3.bf16.msra.mxu0 %v1894_v46  ;;  %1823 = vmatpush3.bf16.msra.mxu1 %v1894_v46 }
  0x60   : > { %1710 = vmatprep.subr.bf16.mxu0 %v1895_v47  ;;  %1816 = vmatprep.subr.bf16.mxu1 %v1895_v47 }
  0x63   : > { %1711 = vmatpush3.bf16.msra.mxu0 %v1896_v48  ;;  %1824 = vmatpush3.bf16.msra.mxu1 %v1896_v48 }
  0x64   : > { %1712 = vmatprep.subr.bf16.mxu0 %v1897_v49  ;;  %1817 = vmatprep.subr.bf16.mxu1 %v1897_v49  ;;  %v436_v49 = vld [vmem:[#allocation2 + $0x18] sm:$0xff] }
  0x67   : > { %1713 = vmatpush3.bf16.msra.mxu0 %v1898_v50  ;;  %1825 = vmatpush3.bf16.msra.mxu1 %v1898_v50 }
  0x6a   : > { %818 = vmatmul.mubr.bf16.vlgmr.msra.gmra.mxu0 %v1899_v51  ;;  %882 = vmatmul.mubr.bf16.vlgmr.msra.gmra.mxu1 %v1902_v52  ;;  %v452_v51 = vld [vmem:[#allocation2 + $0x98] sm:$0xff] }
  0x6b   : > { %825 = vmatprep.mubr.bf16.mxu0 %v1905_v53  ;;  %889 = vmatprep.mubr.bf16.mxu1 %v1907_v54 }
  0x72   : > { %826 = vmatmul.mubr.bf16.gmra.mxu0 %v1909_v55  ;;  %890 = vmatmul.mubr.bf16.gmra.mxu1 %v1910_v56 }
  0x73   : > { %833 = vmatprep.mubr.bf16.mxu0 %v1911_v57  ;;  %897 = vmatprep.mubr.bf16.mxu1 %v1913_v58 }
  0x7a   : > { %834 = vmatmul.mubr.bf16.gmra.mxu0 %v1915_v59  ;;  %898 = vmatmul.mubr.bf16.gmra.mxu1 %v1916_v60  ;;  %v437_v59 = vld [vmem:[#allocation2 + $0x20] sm:$0xff] }
  0x7b   : > { %841 = vmatprep.mubr.bf16.mxu0 %v1917_v61  ;;  %905 = vmatprep.mubr.bf16.mxu1 %v1919_v62  ;;  %v453_v61 = vld [vmem:[#allocation2 + $0xa0] sm:$0xff] }
  0x82   : > { %842 = vmatmul.mubr.bf16.gmra.mxu0 %v1921_v63  ;;  %906 = vmatmul.mubr.bf16.gmra.mxu1 %v1922_v0 }
  0x83   : > { %849 = vmatprep.mubr.bf16.mxu0 %v1923_v1  ;;  %913 = vmatprep.mubr.bf16.mxu1 %v1925_v2 }
  0x8a   : > { %850 = vmatmul.mubr.bf16.gmra.mxu0 %v1927_v3  ;;  %914 = vmatmul.mubr.bf16.gmra.mxu1 %v1928_v4 }
  0x8b   : > { %857 = vmatprep.mubr.bf16.mxu0 %v1929_v5  ;;  %921 = vmatprep.mubr.bf16.mxu1 %v1931_v6  ;;  %v438_v5 = vld [vmem:[#allocation2 + $0x28] sm:$0xff] }
  0x92   : > { %858 = vmatmul.mubr.bf16.gmra.mxu0 %v1933_v7  ;;  %922 = vmatmul.mubr.bf16.gmra.mxu1 %v1934_v8  ;;  %v454_v7 = vld [vmem:[#allocation2 + $0xa8] sm:$0xff] }
  0x93   : > { %865 = vmatprep.mubr.bf16.mxu0 %v1935_v9  ;;  %929 = vmatprep.mubr.bf16.mxu1 %v1937_v10 }
  0x9a   : > { %866 = vmatmul.mubr.bf16.gmra.mxu0 %v1939_v11  ;;  %930 = vmatmul.mubr.bf16.gmra.mxu1 %v1940_v12 }
  0x9b   : > { %873 = vmatprep.mubr.bf16.mxu0 %v1941_v13  ;;  %937 = vmatprep.mubr.bf16.mxu1 %v1943_v14 }
  0xa2   : > { %874 = vmatmul.mubr.bf16.gmra.mxu0 %v1945_v15  ;;  %938 = vmatmul.mubr.bf16.gmra.mxu1 %v1946_v16  ;;  %v439_v15 = vld [vmem:[#allocation2 + $0x30] sm:$0xff] }
 0x12a   : > { %v1714_v17 = vpop.f32.mrf.mxu0  ;;  %v1762_v18 = vpop.f32.mrf.mxu1 }
 0x12c   : > { %v1715_v20 = vpop.f32.mrf.mxu0  ;;  %v1763_v22 = vpop.f32.mrf.mxu1 }
 0x12d   : > { %v1716_v23 = vadd.f32 %v1715_v20, %v1714_v17  ;;  %v1764_v24 = vadd.f32 %v1763_v22, %v1762_v18  ;;  %v455_v17 = vld [vmem:[#allocation2 + $0xb0] sm:$0xff] }
 0x12e   : > { %v1717_v25 = vpop.f32.mrf.mxu0  ;;  %v1765_v26 = vpop.f32.mrf.mxu1 }
 0x12f   : > { %v946_v27 = vadd.f32 %v1716_v23, %v433_v19  ;;  %v962_v28 = vadd.f32 %v1764_v24, %v449_v21 }
 0x130   : > { %v1718_v30 = vpop.f32.mrf.mxu0  ;;  %v1766_v32 = vpop.f32.mrf.mxu1 }
 0x131   : > { %979 = vst.msk [vmem:[#allocation2] sm:$0xff] %vm978_vm1, %v946_v27  ;;  %995 = vst.msk [vmem:[#allocation2 + $0x80] sm:$0xff] %vm978_vm1, %v962_v28  ;;  %v1719_v33 = vadd.f32 %v1718_v30, %v1717_v25  ;;  %v1767_v34 = vadd.f32 %v1766_v32, %v1765_v26  ;;  %v440_v25 = vld [vmem:[#allocation2 + $0x38] sm:$0xff] }
 0x132   : > { %v1720_v35 = vpop.f32.mrf.mxu0  ;;  %v1768_v36 = vpop.f32.mrf.mxu1  ;;  %v456_v27 = vld [vmem:[#allocation2 + $0xb8] sm:$0xff] }
 0x133   : > { %v947_v37 = vadd.f32 %v1719_v33, %v434_v29  ;;  %v963_v38 = vadd.f32 %v1767_v34, %v450_v31 }
 0x134   : > { %v1721_v40 = vpop.f32.mrf.mxu0  ;;  %v1769_v42 = vpop.f32.mrf.mxu1 }
 0x135   : > { %980 = vst.msk [vmem:[#allocation2 + $0x8] sm:$0xff] %vm978_vm1, %v947_v37  ;;  %996 = vst.msk [vmem:[#allocation2 + $0x88] sm:$0xff] %vm978_vm1, %v963_v38  ;;  %v1722_v43 = vadd.f32 %v1721_v40, %v1720_v35  ;;  %v1770_v44 = vadd.f32 %v1769_v42, %v1768_v36  ;;  %v441_v35 = vld [vmem:[#allocation2 + $0x40] sm:$0xff] }
 0x136   : > { %v1723_v45 = vpop.f32.mrf.mxu0  ;;  %v1771_v46 = vpop.f32.mrf.mxu1  ;;  %v457_v37 = vld [vmem:[#allocation2 + $0xc0] sm:$0xff] }
 0x137   : > { %v948_v47 = vadd.f32 %v1722_v43, %v435_v39  ;;  %v964_v48 = vadd.f32 %v1770_v44, %v451_v41 }
 0x138   : > { %v1724_v50 = vpop.f32.mrf.mxu0  ;;  %v1772_v52 = vpop.f32.mrf.mxu1 }
 0x139   : > { %981 = vst.msk [vmem:[#allocation2 + $0x10] sm:$0xff] %vm978_vm1, %v948_v47  ;;  %997 = vst.msk [vmem:[#allocation2 + $0x90] sm:$0xff] %vm978_vm1, %v964_v48  ;;  %v1725_v53 = vadd.f32 %v1724_v50, %v1723_v45  ;;  %v1773_v54 = vadd.f32 %v1772_v52, %v1771_v46  ;;  %v442_v45 = vld [vmem:[#allocation2 + $0x48] sm:$0xff] }
 0x13a   : > { %v1726_v55 = vpop.f32.mrf.mxu0  ;;  %v1774_v56 = vpop.f32.mrf.mxu1  ;;  %v458_v47 = vld [vmem:[#allocation2 + $0xc8] sm:$0xff] }
 0x13b   : > { %v949_v57 = vadd.f32 %v1725_v53, %v436_v49  ;;  %v965_v58 = vadd.f32 %v1773_v54, %v452_v51 }
 0x13c   : > { %v1727_v60 = vpop.f32.mrf.mxu0  ;;  %v1775_v62 = vpop.f32.mrf.mxu1 }
 0x13d   : > { %982 = vst.msk [vmem:[#allocation2 + $0x18] sm:$0xff] %vm978_vm1, %v949_v57  ;;  %998 = vst.msk [vmem:[#allocation2 + $0x98] sm:$0xff] %vm978_vm1, %v965_v58  ;;  %v1728_v63 = vadd.f32 %v1727_v60, %v1726_v55  ;;  %v1776_v0 = vadd.f32 %v1775_v62, %v1774_v56  ;;  %v443_v55 = vld [vmem:[#allocation2 + $0x50] sm:$0xff] }
 0x13e   : > { %v1729_v1 = vpop.f32.mrf.mxu0  ;;  %v1777_v2 = vpop.f32.mrf.mxu1  ;;  %v459_v57 = vld [vmem:[#allocation2 + $0xd0] sm:$0xff] }
 0x13f   : > { %v950_v3 = vadd.f32 %v1728_v63, %v437_v59  ;;  %v966_v4 = vadd.f32 %v1776_v0, %v453_v61 }
 0x140   : > { %v1730_v6 = vpop.f32.mrf.mxu0  ;;  %v1778_v8 = vpop.f32.mrf.mxu1 }
 0x141   : > { %983 = vst.msk [vmem:[#allocation2 + $0x20] sm:$0xff] %vm978_vm1, %v950_v3  ;;  %999 = vst.msk [vmem:[#allocation2 + $0xa0] sm:$0xff] %vm978_vm1, %v966_v4  ;;  %v1731_v9 = vadd.f32 %v1730_v6, %v1729_v1  ;;  %v1779_v10 = vadd.f32 %v1778_v8, %v1777_v2  ;;  %v444_v1 = vld [vmem:[#allocation2 + $0x58] sm:$0xff] }
 0x142   : > { %v1732_v11 = vpop.f32.mrf.mxu0  ;;  %v1780_v12 = vpop.f32.mrf.mxu1  ;;  %v460_v3 = vld [vmem:[#allocation2 + $0xd8] sm:$0xff] }
 0x143   : > { %v951_v13 = vadd.f32 %v1731_v9, %v438_v5  ;;  %v967_v14 = vadd.f32 %v1779_v10, %v454_v7 }
 0x144   : > { %v1733_v16 = vpop.f32.mrf.mxu0  ;;  %v1781_v18 = vpop.f32.mrf.mxu1 }
 0x145   : > { %984 = vst.msk [vmem:[#allocation2 + $0x28] sm:$0xff] %vm978_vm1, %v951_v13  ;;  %1000 = vst.msk [vmem:[#allocation2 + $0xa8] sm:$0xff] %vm978_vm1, %v967_v14  ;;  %v1734_v19 = vadd.f32 %v1733_v16, %v1732_v11  ;;  %v1782_v20 = vadd.f32 %v1781_v18, %v1780_v12  ;;  %v445_v11 = vld [vmem:[#allocation2 + $0x60] sm:$0xff] }
 0x146   : > { %v1735_v21 = vpop.f32.mrf.mxu0  ;;  %v1783_v22 = vpop.f32.mrf.mxu1  ;;  %v461_v13 = vld [vmem:[#allocation2 + $0xe0] sm:$0xff] }
 0x147   : > { %v952_v23 = vadd.f32 %v1734_v19, %v439_v15  ;;  %v968_v24 = vadd.f32 %v1782_v20, %v455_v17 }
 0x148   : > { %v1736_v26 = vpop.f32.mrf.mxu0  ;;  %v1784_v28 = vpop.f32.mrf.mxu1 }
 0x149   : > { %985 = vst.msk [vmem:[#allocation2 + $0x30] sm:$0xff] %vm978_vm1, %v952_v23  ;;  %1001 = vst.msk [vmem:[#allocation2 + $0xb0] sm:$0xff] %vm978_vm1, %v968_v24  ;;  %v1737_v29 = vadd.f32 %v1736_v26, %v1735_v21  ;;  %v1785_v30 = vadd.f32 %v1784_v28, %v1783_v22  ;;  %v446_v21 = vld [vmem:[#allocation2 + $0x68] sm:$0xff] }
 0x14a   : > { %v1738_v31 = vpop.f32.mrf.mxu0  ;;  %v1786_v32 = vpop.f32.mrf.mxu1  ;;  %v462_v23 = vld [vmem:[#allocation2 + $0xe8] sm:$0xff] }
 0x14b   : > { %v953_v33 = vadd.f32 %v1737_v29, %v440_v25  ;;  %v969_v34 = vadd.f32 %v1785_v30, %v456_v27 }
 0x14c   : > { %v1739_v36 = vpop.f32.mrf.mxu0  ;;  %v1787_v38 = vpop.f32.mrf.mxu1 }
 0x14d   : > { %986 = vst.msk [vmem:[#allocation2 + $0x38] sm:$0xff] %vm978_vm1, %v953_v33  ;;  %1002 = vst.msk [vmem:[#allocation2 + $0xb8] sm:$0xff] %vm978_vm1, %v969_v34  ;;  %v1740_v39 = vadd.f32 %v1739_v36, %v1738_v31  ;;  %v1788_v40 = vadd.f32 %v1787_v38, %v1786_v32  ;;  %v447_v31 = vld [vmem:[#allocation2 + $0x70] sm:$0xff] }
 0x14e   : > { %v1741_v41 = vpop.f32.mrf.mxu0  ;;  %v1789_v42 = vpop.f32.mrf.mxu1  ;;  %v463_v33 = vld [vmem:[#allocation2 + $0xf0] sm:$0xff] }
 0x14f   : > { %v954_v43 = vadd.f32 %v1740_v39, %v441_v35  ;;  %v970_v44 = vadd.f32 %v1788_v40, %v457_v37 }
 0x150   : > { %v1742_v46 = vpop.f32.mrf.mxu0  ;;  %v1790_v48 = vpop.f32.mrf.mxu1 }
 0x151   : > { %987 = vst.msk [vmem:[#allocation2 + $0x40] sm:$0xff] %vm978_vm1, %v954_v43  ;;  %1003 = vst.msk [vmem:[#allocation2 + $0xc0] sm:$0xff] %vm978_vm1, %v970_v44  ;;  %v1743_v49 = vadd.f32 %v1742_v46, %v1741_v41  ;;  %v1791_v50 = vadd.f32 %v1790_v48, %v1789_v42  ;;  %v448_v41 = vld [vmem:[#allocation2 + $0x78] sm:$0xff] }
 0x152   : > { %v1744_v51 = vpop.f32.mrf.mxu0  ;;  %v1792_v52 = vpop.f32.mrf.mxu1  ;;  %v464_v43 = vld [vmem:[#allocation2 + $0xf8] sm:$0xff] }
 0x153   : > { %v955_v53 = vadd.f32 %v1743_v49, %v442_v45  ;;  %v971_v54 = vadd.f32 %v1791_v50, %v458_v47 }
 0x154   : > { %v1745_v56 = vpop.f32.mrf.mxu0  ;;  %v1793_v58 = vpop.f32.mrf.mxu1 }
 0x155   : > { %988 = vst.msk [vmem:[#allocation2 + $0x48] sm:$0xff] %vm978_vm1, %v955_v53  ;;  %1004 = vst.msk [vmem:[#allocation2 + $0xc8] sm:$0xff] %vm978_vm1, %v971_v54  ;;  %v1746_v59 = vadd.f32 %v1745_v56, %v1744_v51  ;;  %v1794_v60 = vadd.f32 %v1793_v58, %v1792_v52 }
 0x156   : > { %v1747_v61 = vpop.f32.mrf.mxu0  ;;  %v1795_v62 = vpop.f32.mrf.mxu1 }
 0x157   : > { %v956_v63 = vadd.f32 %v1746_v59, %v443_v55  ;;  %v972_v0 = vadd.f32 %v1794_v60, %v459_v57 }
 0x158   : > { %v1748_v2 = vpop.f32.mrf.mxu0  ;;  %v1796_v4 = vpop.f32.mrf.mxu1 }
 0x159   : > { %989 = vst.msk [vmem:[#allocation2 + $0x50] sm:$0xff] %vm978_vm1, %v956_v63  ;;  %1005 = vst.msk [vmem:[#allocation2 + $0xd0] sm:$0xff] %vm978_vm1, %v972_v0  ;;  %v1749_v5 = vadd.f32 %v1748_v2, %v1747_v61  ;;  %v1797_v6 = vadd.f32 %v1796_v4, %v1795_v62 }
 0x15a   : > { %v1750_v7 = vpop.f32.mrf.mxu0  ;;  %v1798_v8 = vpop.f32.mrf.mxu1 }
 0x15b   : > { %v957_v9 = vadd.f32 %v1749_v5, %v444_v1  ;;  %v973_v10 = vadd.f32 %v1797_v6, %v460_v3 }
 0x15c   : > { %v1751_v12 = vpop.f32.mrf.mxu0  ;;  %v1799_v14 = vpop.f32.mrf.mxu1 }
 0x15d   : > { %990 = vst.msk [vmem:[#allocation2 + $0x58] sm:$0xff] %vm978_vm1, %v957_v9  ;;  %1006 = vst.msk [vmem:[#allocation2 + $0xd8] sm:$0xff] %vm978_vm1, %v973_v10  ;;  %v1752_v15 = vadd.f32 %v1751_v12, %v1750_v7  ;;  %v1800_v16 = vadd.f32 %v1799_v14, %v1798_v8 }
 0x15e   : > { %v1753_v17 = vpop.f32.mrf.mxu0  ;;  %v1801_v18 = vpop.f32.mrf.mxu1 }
 0x15f   : > { %v958_v19 = vadd.f32 %v1752_v15, %v445_v11  ;;  %v974_v20 = vadd.f32 %v1800_v16, %v461_v13 }
 0x160   : > { %v1754_v22 = vpop.f32.mrf.mxu0  ;;  %v1802_v24 = vpop.f32.mrf.mxu1 }
 0x161   : > { %991 = vst.msk [vmem:[#allocation2 + $0x60] sm:$0xff] %vm978_vm1, %v958_v19  ;;  %1007 = vst.msk [vmem:[#allocation2 + $0xe0] sm:$0xff] %vm978_vm1, %v974_v20  ;;  %v1755_v25 = vadd.f32 %v1754_v22, %v1753_v17  ;;  %v1803_v26 = vadd.f32 %v1802_v24, %v1801_v18 }
 0x162   : > { %v1756_v27 = vpop.f32.mrf.mxu0  ;;  %v1804_v28 = vpop.f32.mrf.mxu1 }
 0x163   : > { %v959_v29 = vadd.f32 %v1755_v25, %v446_v21  ;;  %v975_v30 = vadd.f32 %v1803_v26, %v462_v23 }
 0x164   : > { %v1757_v32 = vpop.f32.mrf.mxu0  ;;  %v1805_v34 = vpop.f32.mrf.mxu1 }
 0x165   : > { %992 = vst.msk [vmem:[#allocation2 + $0x68] sm:$0xff] %vm978_vm1, %v959_v29  ;;  %1008 = vst.msk [vmem:[#allocation2 + $0xe8] sm:$0xff] %vm978_vm1, %v975_v30  ;;  %v1758_v35 = vadd.f32 %v1757_v32, %v1756_v27  ;;  %v1806_v36 = vadd.f32 %v1805_v34, %v1804_v28 }
 0x166   : > { %v1759_v37 = vpop.f32.mrf.mxu0  ;;  %v1807_v38 = vpop.f32.mrf.mxu1 }
 0x167   : > { %v960_v39 = vadd.f32 %v1758_v35, %v447_v31  ;;  %v976_v40 = vadd.f32 %v1806_v36, %v463_v33 }
 0x168   : > { %v1760_v42 = vpop.f32.mrf.mxu0  ;;  %v1808_v44 = vpop.f32.mrf.mxu1 }
 0x169   : > { %993 = vst.msk [vmem:[#allocation2 + $0x70] sm:$0xff] %vm978_vm1, %v960_v39  ;;  %1009 = vst.msk [vmem:[#allocation2 + $0xf0] sm:$0xff] %vm978_vm1, %v976_v40  ;;  %v1761_v45 = vadd.f32 %v1760_v42, %v1759_v37  ;;  %v1809_v46 = vadd.f32 %v1808_v44, %v1807_v38  ;;  %1014 = sbr.rel (%p1694_p13) target bundleno = 749 (0x2ed), region = 78 }
 0x16b   : > { %v961_v47 = vadd.f32 %v1761_v45, %v448_v41  ;;  %v977_v48 = vadd.f32 %v1809_v46, %v464_v43 }
 0x16d   : > { %994 = vst.msk [vmem:[#allocation2 + $0x78] sm:$0xff] %vm978_vm1, %v961_v47  ;;  %1010 = vst.msk [vmem:[#allocation2 + $0xf8] sm:$0xff] %vm978_vm1, %v977_v48 }
 0x16e   : > { %v1015_v49 = vld [vmem:[#allocation2] sm:$0xff]  ;;  %v1017_v51 = vld [vmem:[#allocation2 + $0x10] sm:$0xff]  ;;  %v1016_v54 = vld [vmem:[#allocation2 + $0x8] sm:$0xff] }
 0x16f   : > { %v1047_v50 = vld [vmem:[%s2293_s30] sm:$0xff]  ;;  %v1049_v53 = vld [vmem:[%s2293_s30 + $0x10] sm:$0xff]  ;;  %v1048_v55 = vld [vmem:[%s2293_s30 + $0x8] sm:$0xff] }
 0x170   : > { %v2417_v52 = vadd.f32 %v1047_v50, %v1015_v49  ;;  %v2421_v56 = vadd.f32 %v1049_v53, %v1017_v51  ;;  %v2423_v57 = vadd.f32 %v1048_v55, %v1016_v54  ;;  %v1018_v58 = vld [vmem:[#allocation2 + $0x18] sm:$0xff]  ;;  %v1019_v60 = vld [vmem:[#allocation2 + $0x20] sm:$0xff]  ;;  %v1020_v0 = vld [vmem:[#allocation2 + $0x28] sm:$0xff] }
 0x171   : > { %v1050_v59 = vld [vmem:[%s2293_s30 + $0x18] sm:$0xff]  ;;  %v1051_v63 = vld [vmem:[%s2293_s30 + $0x20] sm:$0xff]  ;;  %v1052_v1 = vld [vmem:[%s2293_s30 + $0x28] sm:$0xff] }
 0x172   : > { %v1111_v61 = vsel %vm978_vm1, %v2417_v52, -inf  ;;  %v2428_v62 = vadd.f32 %v1050_v59, %v1018_v58  ;;  %v1117_v2 = vsel %vm978_vm1, %v2421_v56, -inf  ;;  %v1114_v3 = vsel %vm978_vm1, %v2423_v57, -inf  ;;  %v1021_v7 = vld [vmem:[#allocation2 + $0x30] sm:$0xff]  ;;  %v1022_v9 = vld [vmem:[#allocation2 + $0x38] sm:$0xff]  ;;  %v1023_v15 = vld [vmem:[#allocation2 + $0x40] sm:$0xff] }
 0x173   : > { %1112 = vmax.xlane.f32.xlu0 %v1111_v61  ;;  %1118 = vmax.xlane.f32.xlu1 %v1117_v2  ;;  %v2436_v4 = vadd.f32 %v1051_v63, %v1019_v60  ;;  %v2440_v6 = vadd.f32 %v1052_v1, %v1020_v0  ;;  %v1053_v8 = vld [vmem:[%s2293_s30 + $0x30] sm:$0xff]  ;;  %v1054_v10 = vld [vmem:[%s2293_s30 + $0x38] sm:$0xff]  ;;  %v1055_v16 = vld [vmem:[%s2293_s30 + $0x40] sm:$0xff] }
 0x174   : > { %v1120_v5 = vsel %vm978_vm1, %v2428_v62, -inf  ;;  %v2446_v12 = vadd.f32 %v1053_v8, %v1021_v7  ;;  %v2450_v14 = vadd.f32 %v1054_v10, %v1022_v9  ;;  %v1024_v17 = vld [vmem:[#allocation2 + $0x48] sm:$0xff]  ;;  %v2456_v20 = vadd.f32 %v1055_v16, %v1023_v15  ;;  %v1025_v23 = vld [vmem:[#allocation2 + $0x50] sm:$0xff]  ;;  %v1026_v25 = vld [vmem:[#allocation2 + $0x58] sm:$0xff] }
 0x175   : > { %v1123_v11 = vsel %vm978_vm1, %v2436_v4, -inf  ;;  %v1126_v13 = vsel %vm978_vm1, %v2440_v6, -inf  ;;  %v1056_v18 = vld [vmem:[%s2293_s30 + $0x48] sm:$0xff]  ;;  %v1057_v24 = vld [vmem:[%s2293_s30 + $0x50] sm:$0xff]  ;;  %v1058_v26 = vld [vmem:[%s2293_s30 + $0x58] sm:$0xff] }
 0x176   : > { %v1129_v19 = vsel %vm978_vm1, %v2446_v12, -inf  ;;  %v1132_v21 = vsel %vm978_vm1, %v2450_v14, -inf  ;;  %v2460_v22 = vadd.f32 %v1056_v18, %v1024_v17  ;;  %v1135_v27 = vsel %vm978_vm1, %v2456_v20, -inf  ;;  %v1027_v31 = vld [vmem:[#allocation2 + $0x60] sm:$0xff]  ;;  %v1028_v33 = vld [vmem:[#allocation2 + $0x68] sm:$0xff]  ;;  %v1029_v39 = vld [vmem:[#allocation2 + $0x70] sm:$0xff] }
 0x177   : > { %1115 = vmax.xlane.f32.xlu0 %v1114_v3  ;;  %1121 = vmax.xlane.f32.xlu1 %v1120_v5  ;;  %v2466_v28 = vadd.f32 %v1057_v24, %v1025_v23  ;;  %v2470_v30 = vadd.f32 %v1058_v26, %v1026_v25  ;;  %v1059_v32 = vld [vmem:[%s2293_s30 + $0x60] sm:$0xff]  ;;  %v1060_v34 = vld [vmem:[%s2293_s30 + $0x68] sm:$0xff]  ;;  %v1061_v40 = vld [vmem:[%s2293_s30 + $0x70] sm:$0xff] }
 0x178   : > { %v1138_v29 = vsel %vm978_vm1, %v2460_v22, -inf  ;;  %v2476_v36 = vadd.f32 %v1059_v32, %v1027_v31  ;;  %v2480_v38 = vadd.f32 %v1060_v34, %v1028_v33  ;;  %v1030_v41 = vld [vmem:[#allocation2 + $0x78] sm:$0xff]  ;;  %v2486_v44 = vadd.f32 %v1061_v40, %v1029_v39  ;;  %v1031_v47 = vld [vmem:[#allocation2 + $0x80] sm:$0xff]  ;;  %v1032_v49 = vld [vmem:[#allocation2 + $0x88] sm:$0xff] }
 0x179   : > { %v1141_v35 = vsel %vm978_vm1, %v2466_v28, -inf  ;;  %v1144_v37 = vsel %vm978_vm1, %v2470_v30, -inf  ;;  %v1062_v42 = vld [vmem:[%s2293_s30 + $0x78] sm:$0xff]  ;;  %v1063_v48 = vld [vmem:[%s2293_s30 + $0x80] sm:$0xff]  ;;  %v1064_v50 = vld [vmem:[%s2293_s30 + $0x88] sm:$0xff] }
 0x17a   : > { %v1147_v43 = vsel %vm978_vm1, %v2476_v36, -inf  ;;  %v1150_v45 = vsel %vm978_vm1, %v2480_v38, -inf  ;;  %v2490_v46 = vadd.f32 %v1062_v42, %v1030_v41  ;;  %v1153_v51 = vsel %vm978_vm1, %v2486_v44, -inf  ;;  %v1033_v58 = vld [vmem:[#allocation2 + $0x90] sm:$0xff]  ;;  %v1034_v60 = vld [vmem:[#allocation2 + $0x98] sm:$0xff]  ;;  %v1035_v3 = vld [vmem:[#allocation2 + $0xa0] sm:$0xff] }
 0x17b   : > { %1124 = vmax.xlane.f32.xlu0 %v1123_v11  ;;  %1127 = vmax.xlane.f32.xlu1 %v1126_v13  ;;  %v2496_v53 = vadd.f32 %v1063_v48, %v1031_v47  ;;  %v2500_v55 = vadd.f32 %v1064_v50, %v1032_v49  ;;  %v1065_v59 = vld [vmem:[%s2293_s30 + $0x90] sm:$0xff]  ;;  %v1066_v61 = vld [vmem:[%s2293_s30 + $0x98] sm:$0xff]  ;;  %v1067_v5 = vld [vmem:[%s2293_s30 + $0xa0] sm:$0xff] }
 0x17c   : > { %v1156_v54 = vsel %vm978_vm1, %v2490_v46, -inf  ;;  %v2506_v0 = vadd.f32 %v1065_v59, %v1033_v58  ;;  %v2510_v2 = vadd.f32 %v1066_v61, %v1034_v60  ;;  %v1036_v7 = vld [vmem:[#allocation2 + $0xa8] sm:$0xff]  ;;  %v2516_v10 = vadd.f32 %v1067_v5, %v1035_v3  ;;  %v1037_v15 = vld [vmem:[#allocation2 + $0xb0] sm:$0xff]  ;;  %v1038_v17 = vld [vmem:[#allocation2 + $0xb8] sm:$0xff] }
 0x17d   : > { %v1159_v63 = vsel %vm978_vm1, %v2496_v53, -inf  ;;  %v1162_v1 = vsel %vm978_vm1, %v2500_v55, -inf  ;;  %v1068_v8 = vld [vmem:[%s2293_s30 + $0xa8] sm:$0xff]  ;;  %v1069_v16 = vld [vmem:[%s2293_s30 + $0xb0] sm:$0xff]  ;;  %v1070_v18 = vld [vmem:[%s2293_s30 + $0xb8] sm:$0xff] }
 0x17e   : > { %v1165_v9 = vsel %vm978_vm1, %v2506_v0, -inf  ;;  %v1168_v11 = vsel %vm978_vm1, %v2510_v2, -inf  ;;  %v2520_v13 = vadd.f32 %v1068_v8, %v1036_v7  ;;  %v2530_v24 = vadd.f32 %v1070_v18, %v1038_v17  ;;  %v1039_v25 = vld [vmem:[#allocation2 + $0xc0] sm:$0xff]  ;;  %v1042_v39 = vld [vmem:[#allocation2 + $0xd8] sm:$0xff]  ;;  %v1044_v49 = vld [vmem:[#allocation2 + $0xe8] sm:$0xff] }
 0x17f   : > { %1130 = vmax.xlane.f32.xlu0 %v1129_v19  ;;  %1133 = vmax.xlane.f32.xlu1 %v1132_v21  ;;  %v1171_v19 = vsel %vm978_vm1, %v2516_v10, -inf  ;;  %v2526_v21 = vadd.f32 %v1069_v16, %v1037_v15  ;;  %v1071_v26 = vld [vmem:[%s2293_s30 + $0xc0] sm:$0xff]  ;;  %v1074_v40 = vld [vmem:[%s2293_s30 + $0xd8] sm:$0xff]  ;;  %v1076_v50 = vld [vmem:[%s2293_s30 + $0xe8] sm:$0xff] }
 0x180   : > { %v1174_v23 = vsel %vm978_vm1, %v2520_v13, -inf  ;;  %v2536_v32 = vadd.f32 %v1071_v26, %v1039_v25  ;;  %v1180_v33 = vsel %vm978_vm1, %v2530_v24, -inf  ;;  %v1043_v47 = vld [vmem:[#allocation2 + $0xe0] sm:$0xff]  ;;  %v2560_v59 = vadd.f32 %v1076_v50, %v1044_v49  ;;  %v1045_v60 = vld [vmem:[#allocation2 + $0xf0] sm:$0xff] }
 0x181   : > { %v1177_v31 = vsel %vm978_vm1, %v2526_v21, -inf  ;;  %v1075_v48 = vld [vmem:[%s2293_s30 + $0xe0] sm:$0xff]  ;;  %v1077_v61 = vld [vmem:[%s2293_s30 + $0xf0] sm:$0xff] }
 0x182   : > { %v1183_v41 = vsel %vm978_vm1, %v2536_v32, -inf  ;;  %v2566_v5 = vadd.f32 %v1077_v61, %v1045_v60  ;;  %v1198_v7 = vsel %vm978_vm1, %v2560_v59, -inf }
 0x183   : > { %1136 = vmax.xlane.f32.xlu0 %v1135_v27  ;;  %1139 = vmax.xlane.f32.xlu1 %v1138_v29  ;;  %v1040_v27 = vld [vmem:[#allocation2 + $0xc8] sm:$0xff] }
 0x184   : > { %v1072_v29 = vld [vmem:[%s2293_s30 + $0xc8] sm:$0xff] }
 0x185   : > { %v2540_v34 = vadd.f32 %v1072_v29, %v1040_v27 }
 0x187   : > { %1142 = vmax.xlane.f32.xlu0 %v1141_v35  ;;  %1145 = vmax.xlane.f32.xlu1 %v1144_v37  ;;  %v1041_v35 = vld [vmem:[#allocation2 + $0xd0] sm:$0xff] }
 0x188   : > { %v1073_v37 = vld [vmem:[%s2293_s30 + $0xd0] sm:$0xff] }
 0x189   : > { %v2546_v42 = vadd.f32 %v1073_v37, %v1041_v35 }
 0x18b   : > { %1148 = vmax.xlane.f32.xlu0 %v1147_v43  ;;  %1151 = vmax.xlane.f32.xlu1 %v1150_v45  ;;  %v1186_v43 = vsel %vm978_vm1, %v2540_v34, -inf  ;;  %v2550_v45 = vadd.f32 %v1074_v40, %v1042_v39 }
 0x18d   : > { %v1192_v58 = vsel %vm978_vm1, %v2550_v45, -inf }
 0x18f   : > { %1154 = vmax.xlane.f32.xlu0 %v1153_v51  ;;  %1157 = vmax.xlane.f32.xlu1 %v1156_v54  ;;  %v1189_v51 = vsel %vm978_vm1, %v2546_v42, -inf  ;;  %v2556_v54 = vadd.f32 %v1075_v48, %v1043_v47 }
 0x191   : > { %v1195_v3 = vsel %vm978_vm1, %v2556_v54, -inf }
 0x193   : > { %1160 = vmax.xlane.f32.xlu0 %v1159_v63  ;;  %1163 = vmax.xlane.f32.xlu1 %v1162_v1  ;;  %v1046_v63 = vld [vmem:[#allocation2 + $0xf8] sm:$0xff] }
 0x194   : > { %v1078_v1 = vld [vmem:[%s2293_s30 + $0xf8] sm:$0xff] }
 0x195   : > { %v2570_v8 = vadd.f32 %v1078_v1, %v1046_v63 }
 0x197   : > { %1166 = vmax.xlane.f32.xlu0 %v1165_v9  ;;  %1169 = vmax.xlane.f32.xlu1 %v1168_v11  ;;  %v1201_v9 = vsel %vm978_vm1, %v2566_v5, -inf  ;;  %v1204_v11 = vsel %vm978_vm1, %v2570_v8, -inf }
 0x19b   : > { %1172 = vmax.xlane.f32.xlu0 %v1171_v19  ;;  %1175 = vmax.xlane.f32.xlu1 %v1174_v23 }
 0x19f   : > { %1178 = vmax.xlane.f32.xlu0 %v1177_v31  ;;  %1181 = vmax.xlane.f32.xlu1 %v1180_v33 }
 0x1a3   : > { %1184 = vmax.xlane.f32.xlu0 %v1183_v41  ;;  %1187 = vmax.xlane.f32.xlu1 %v1186_v43 }
 0x1a7   : > { %1190 = vmax.xlane.f32.xlu0 %v1189_v51  ;;  %1193 = vmax.xlane.f32.xlu1 %v1192_v58 }
 0x1ab   : > { %1196 = vmax.xlane.f32.xlu0 %v1195_v3  ;;  %1199 = vmax.xlane.f32.xlu1 %v1198_v7 }
 0x1af   : > { %1202 = vmax.xlane.f32.xlu0 %v1201_v9  ;;  %1205 = vmax.xlane.f32.xlu1 %v1204_v11 }
 0x1fc   : > { %v1113_v15 = vpop.xlane.xlu0 %1112  ;;  %v1119_v17 = vpop.xlane.xlu1 %1118 }
 0x1fd   : > { %v2577_v16 = vsub.f32 %v2417_v52, %v1113_v15  ;;  %v2580_v18 = vsub.f32 %v2421_v56, %v1119_v17 }
 0x1ff   : > { %v1239_v19 = vmul.f32 1.442695, %v2577_v16  ;;  %v1243_v23 = vmul.f32 1.442695, %v2580_v18 }
 0x200   : > { %v1116_v25 = vpop.xlane.xlu0 %1115  ;;  %v1122_v27 = vpop.xlane.xlu1 %1121 }
 0x201   : > { %1947 = vpow2.f32 %v1239_v19  ;;  %v2585_v26 = vsub.f32 %v2423_v57, %v1116_v25  ;;  %v2588_v29 = vsub.f32 %v2428_v62, %v1122_v27 }
 0x202   : > { %1949 = vpow2.f32 %v1243_v23 }
 0x203   : > { %v1241_v52 = vmul.f32 1.442695, %v2585_v26  ;;  %v1245_v31 = vmul.f32 1.442695, %v2588_v29 }
 0x204   : > { %v1125_v56 = vpop.xlane.xlu0 %1124  ;;  %v1128_v35 = vpop.xlane.xlu1 %1127 }
 0x205   : > { %1951 = vpow2.f32 %v1241_v52  ;;  %v2593_v33 = vsub.f32 %v2436_v4, %v1125_v56  ;;  %v2596_v37 = vsub.f32 %v2440_v6, %v1128_v35 }
 0x206   : > { %1953 = vpow2.f32 %v1245_v31 }
 0x207   : > { %v1247_v57 = vmul.f32 1.442695, %v2593_v33  ;;  %v1249_v39 = vmul.f32 1.442695, %v2596_v37 }
 0x208   : > { %v1131_v62 = vpop.xlane.xlu0 %1130  ;;  %v1134_v41 = vpop.xlane.xlu1 %1133 }
 0x209   : > { %1955 = vpow2.f32 %v1247_v57  ;;  %v2601_v40 = vsub.f32 %v2446_v12, %v1131_v62  ;;  %v2604_v43 = vsub.f32 %v2450_v14, %v1134_v41 }
 0x20a   : > { %1957 = vpow2.f32 %v1249_v39 }
 0x20b   : > { %v1251_v4 = vmul.f32 1.442695, %v2601_v40  ;;  %v1253_v47 = vmul.f32 1.442695, %v2604_v43 }
 0x20c   : > { %v1137_v6 = vpop.xlane.xlu0 %1136  ;;  %v1140_v49 = vpop.xlane.xlu1 %1139 }
 0x20d   : > { %1959 = vpow2.f32 %v1251_v4  ;;  %v2609_v48 = vsub.f32 %v2456_v20, %v1137_v6  ;;  %v2612_v12 = vsub.f32 %v2460_v22, %v1140_v49 }
 0x20e   : > { %v1948_v50 = vpop.eup %1947  ;;  %1961 = vpow2.f32 %v1253_v47 }
 0x20f   : > { %v1950_v51 = vpop.eup %1949  ;;  %v1255_v58 = vmul.f32 1.442695, %v2609_v48  ;;  %v1303_v14 = vsel %vm978_vm1, %v1948_v50, 0.0  ;;  %v1257_v60 = vmul.f32 1.442695, %v2612_v12 }
 0x210   : > { %1304 = vadd.xlane.f32.xlu0 %v1303_v14  ;;  %v1143_v61 = vpop.xlane.xlu0 %1142  ;;  %v1146_v20 = vpop.xlane.xlu1 %1145  ;;  %v1309_v1 = vsel %vm978_vm1, %v1950_v51, 0.0 }
 0x211   : > { %1963 = vpow2.f32 %v1255_v58  ;;  %v2618_v63 = vsub.f32 %v2466_v28, %v1143_v61  ;;  %v2622_v22 = vsub.f32 %v2470_v30, %v1146_v20 }
 0x212   : > { %v1952_v3 = vpop.eup %1951  ;;  %1965 = vpow2.f32 %v1257_v60 }
 0x213   : > { %v1954_v7 = vpop.eup %1953  ;;  %v1259_v9 = vmul.f32 1.442695, %v2618_v63  ;;  %v1306_v11 = vsel %vm978_vm1, %v1952_v3, 0.0  ;;  %v1261_v15 = vmul.f32 1.442695, %v2622_v22 }
 0x214   : > { %1310 = vadd.xlane.f32.xlu0 %v1309_v1  ;;  %1307 = vadd.xlane.f32.xlu1 %v1306_v11  ;;  %v1149_v17 = vpop.xlane.xlu0 %1148  ;;  %v1152_v19 = vpop.xlane.xlu1 %1151  ;;  %v1312_v23 = vsel %vm978_vm1, %v1954_v7, 0.0 }
 0x215   : > { %1967 = vpow2.f32 %v1259_v9  ;;  %v2628_v28 = vsub.f32 %v2476_v36, %v1149_v17  ;;  %v2632_v30 = vsub.f32 %v2480_v38, %v1152_v19 }
 0x216   : > { %v1956_v25 = vpop.eup %1955  ;;  %1969 = vpow2.f32 %v1261_v15 }
 0x217   : > { %v1958_v27 = vpop.eup %1957  ;;  %v1263_v52 = vmul.f32 1.442695, %v2628_v28  ;;  %v1315_v31 = vsel %vm978_vm1, %v1956_v25, 0.0  ;;  %v1265_v56 = vmul.f32 1.442695, %v2632_v30 }
 0x218   : > { %1313 = vadd.xlane.f32.xlu1 %v1312_v23  ;;  %1316 = vadd.xlane.f32.xlu0 %v1315_v31  ;;  %v1155_v35 = vpop.xlane.xlu0 %1154  ;;  %v1158_v57 = vpop.xlane.xlu1 %1157  ;;  %v1318_v39 = vsel %vm978_vm1, %v1958_v27, 0.0 }
 0x219   : > { %1971 = vpow2.f32 %v1263_v52  ;;  %v2638_v36 = vsub.f32 %v2486_v44, %v1155_v35  ;;  %v2642_v38 = vsub.f32 %v2490_v46, %v1158_v57 }
 0x21a   : > { %v1960_v62 = vpop.eup %1959  ;;  %1973 = vpow2.f32 %v1265_v56 }
 0x21b   : > { %v1962_v41 = vpop.eup %1961  ;;  %v1267_v4 = vmul.f32 1.442695, %v2638_v36  ;;  %v1321_v47 = vsel %vm978_vm1, %v1960_v62, 0.0  ;;  %v1269_v6 = vmul.f32 1.442695, %v2642_v38 }
 0x21c   : > { %1319 = vadd.xlane.f32.xlu1 %v1318_v39  ;;  %1322 = vadd.xlane.f32.xlu0 %v1321_v47  ;;  %v1161_v49 = vpop.xlane.xlu0 %1160  ;;  %v1164_v50 = vpop.xlane.xlu1 %1163  ;;  %v1324_v51 = vsel %vm978_vm1, %v1962_v41, 0.0 }
 0x21d   : > { %1975 = vpow2.f32 %v1267_v4  ;;  %v2648_v44 = vsub.f32 %v2496_v53, %v1161_v49  ;;  %v2652_v46 = vsub.f32 %v2500_v55, %v1164_v50 }
 0x21e   : > { %v1964_v58 = vpop.eup %1963  ;;  %1977 = vpow2.f32 %v1269_v6 }
 0x21f   : > { %v1966_v14 = vpop.eup %1965  ;;  %v1271_v60 = vmul.f32 1.442695, %v2648_v44  ;;  %v1327_v61 = vsel %vm978_vm1, %v1964_v58, 0.0  ;;  %v1273_v20 = vmul.f32 1.442695, %v2652_v46 }
 0x220   : > { %1325 = vadd.xlane.f32.xlu1 %v1324_v51  ;;  %1328 = vadd.xlane.f32.xlu0 %v1327_v61  ;;  %v1167_v1 = vpop.xlane.xlu0 %1166  ;;  %v1170_v3 = vpop.xlane.xlu1 %1169  ;;  %v1330_v7 = vsel %vm978_vm1, %v1966_v14, 0.0 }
 0x221   : > { %1979 = vpow2.f32 %v1271_v60  ;;  %v2658_v53 = vsub.f32 %v2506_v0, %v1167_v1  ;;  %v2662_v55 = vsub.f32 %v2510_v2, %v1170_v3 }
 0x222   : > { %v1968_v9 = vpop.eup %1967  ;;  %1981 = vpow2.f32 %v1273_v20 }
 0x223   : > { %v1970_v11 = vpop.eup %1969  ;;  %v1275_v15 = vmul.f32 1.442695, %v2658_v53  ;;  %v1333_v17 = vsel %vm978_vm1, %v1968_v9, 0.0  ;;  %v1277_v19 = vmul.f32 1.442695, %v2662_v55 }
 0x224   : > { %1331 = vadd.xlane.f32.xlu1 %v1330_v7  ;;  %1334 = vadd.xlane.f32.xlu0 %v1333_v17  ;;  %v1173_v23 = vpop.xlane.xlu0 %1172  ;;  %v1176_v25 = vpop.xlane.xlu1 %1175  ;;  %v1336_v27 = vsel %vm978_vm1, %v1970_v11, 0.0 }
 0x225   : > { %1983 = vpow2.f32 %v1275_v15  ;;  %v2668_v0 = vsub.f32 %v2516_v10, %v1173_v23  ;;  %v2672_v2 = vsub.f32 %v2520_v13, %v1176_v25 }
 0x226   : > { %v1972_v52 = vpop.eup %1971  ;;  %1985 = vpow2.f32 %v1277_v19 }
 0x227   : > { %v1974_v31 = vpop.eup %1973  ;;  %v1279_v56 = vmul.f32 1.442695, %v2668_v0  ;;  %v1339_v35 = vsel %vm978_vm1, %v1972_v52, 0.0  ;;  %v1281_v57 = vmul.f32 1.442695, %v2672_v2 }
 0x228   : > { %1337 = vadd.xlane.f32.xlu1 %v1336_v27  ;;  %1340 = vadd.xlane.f32.xlu0 %v1339_v35  ;;  %v1179_v39 = vpop.xlane.xlu0 %1178  ;;  %v1182_v62 = vpop.xlane.xlu1 %1181  ;;  %v1342_v41 = vsel %vm978_vm1, %v1974_v31, 0.0 }
 0x229   : > { %1987 = vpow2.f32 %v1279_v56  ;;  %v2678_v10 = vsub.f32 %v2526_v21, %v1179_v39  ;;  %v2682_v13 = vsub.f32 %v2530_v24, %v1182_v62 }
 0x22a   : > { %v1976_v4 = vpop.eup %1975  ;;  %1989 = vpow2.f32 %v1281_v57 }
 0x22b   : > { %v1978_v47 = vpop.eup %1977  ;;  %v1283_v6 = vmul.f32 1.442695, %v2678_v10  ;;  %v1345_v49 = vsel %vm978_vm1, %v1976_v4, 0.0  ;;  %v1285_v50 = vmul.f32 1.442695, %v2682_v13 }
 0x22c   : > { %1343 = vadd.xlane.f32.xlu1 %v1342_v41  ;;  %1346 = vadd.xlane.f32.xlu0 %v1345_v49  ;;  %v1185_v51 = vpop.xlane.xlu0 %1184  ;;  %v1188_v58 = vpop.xlane.xlu1 %1187  ;;  %v1348_v14 = vsel %vm978_vm1, %v1978_v47, 0.0 }
 0x22d   : > { %1991 = vpow2.f32 %v1283_v6  ;;  %v2688_v21 = vsub.f32 %v2536_v32, %v1185_v51  ;;  %v2692_v24 = vsub.f32 %v2540_v34, %v1188_v58 }
 0x22e   : > { %v1980_v60 = vpop.eup %1979  ;;  %1993 = vpow2.f32 %v1285_v50 }
 0x22f   : > { %v1982_v61 = vpop.eup %1981  ;;  %v1287_v20 = vmul.f32 1.442695, %v2688_v21  ;;  %v1351_v1 = vsel %vm978_vm1, %v1980_v60, 0.0  ;;  %v1289_v3 = vmul.f32 1.442695, %v2692_v24 }
 0x230   : > { %1349 = vadd.xlane.f32.xlu1 %v1348_v14  ;;  %1352 = vadd.xlane.f32.xlu0 %v1351_v1  ;;  %v1191_v7 = vpop.xlane.xlu0 %1190  ;;  %v1194_v9 = vpop.xlane.xlu1 %1193  ;;  %v1354_v11 = vsel %vm978_vm1, %v1982_v61, 0.0 }
 0x231   : > { %1995 = vpow2.f32 %v1287_v20  ;;  %v2698_v32 = vsub.f32 %v2546_v42, %v1191_v7  ;;  %v2702_v34 = vsub.f32 %v2550_v45, %v1194_v9 }
 0x232   : > { %v1984_v15 = vpop.eup %1983  ;;  %1997 = vpow2.f32 %v1289_v3 }
 0x233   : > { %v1986_v17 = vpop.eup %1985  ;;  %v1291_v19 = vmul.f32 1.442695, %v2698_v32  ;;  %v1357_v23 = vsel %vm978_vm1, %v1984_v15, 0.0  ;;  %v1293_v25 = vmul.f32 1.442695, %v2702_v34 }
 0x234   : > { %1355 = vadd.xlane.f32.xlu1 %v1354_v11  ;;  %1358 = vadd.xlane.f32.xlu0 %v1357_v23  ;;  %v1197_v27 = vpop.xlane.xlu0 %1196  ;;  %v1200_v52 = vpop.xlane.xlu1 %1199  ;;  %v1360_v31 = vsel %vm978_vm1, %v1986_v17, 0.0 }
 0x235   : > { %1999 = vpow2.f32 %v1291_v19  ;;  %v2708_v42 = vsub.f32 %v2556_v54, %v1197_v27  ;;  %v2712_v45 = vsub.f32 %v2560_v59, %v1200_v52 }
 0x236   : > { %v1988_v56 = vpop.eup %1987  ;;  %2001 = vpow2.f32 %v1293_v25 }
 0x237   : > { %v1990_v35 = vpop.eup %1989  ;;  %v1295_v57 = vmul.f32 1.442695, %v2708_v42  ;;  %v1363_v39 = vsel %vm978_vm1, %v1988_v56, 0.0  ;;  %v1297_v62 = vmul.f32 1.442695, %v2712_v45 }
 0x238   : > { %1361 = vadd.xlane.f32.xlu1 %v1360_v31  ;;  %1364 = vadd.xlane.f32.xlu0 %v1363_v39  ;;  %v1203_v41 = vpop.xlane.xlu0 %1202  ;;  %v1206_v4 = vpop.xlane.xlu1 %1205  ;;  %v1366_v47 = vsel %vm978_vm1, %v1990_v35, 0.0 }
 0x239   : > { %2003 = vpow2.f32 %v1295_v57  ;;  %v2718_v54 = vsub.f32 %v2566_v5, %v1203_v41  ;;  %v2722_v59 = vsub.f32 %v2570_v8, %v1206_v4 }
 0x23a   : > { %v1992_v6 = vpop.eup %1991  ;;  %2005 = vpow2.f32 %v1297_v62 }
 0x23b   : > { %v1994_v49 = vpop.eup %1993  ;;  %v1299_v50 = vmul.f32 1.442695, %v2718_v54  ;;  %v1369_v51 = vsel %vm978_vm1, %v1992_v6, 0.0  ;;  %v1301_v58 = vmul.f32 1.442695, %v2722_v59 }
 0x23c   : > { %1367 = vadd.xlane.f32.xlu1 %v1366_v47  ;;  %1370 = vadd.xlane.f32.xlu0 %v1369_v51  ;;  %v1372_v5 = vsel %vm978_vm1, %v1994_v49, 0.0 }
 0x23d   : > { %2007 = vpow2.f32 %v1299_v50 }
 0x23e   : > { %v1996_v14 = vpop.eup %1995  ;;  %2009 = vpow2.f32 %v1301_v58 }
 0x23f   : > { %v1998_v60 = vpop.eup %1997  ;;  %v1375_v61 = vsel %vm978_vm1, %v1996_v14, 0.0 }
 0x240   : > { %1373 = vadd.xlane.f32.xlu1 %v1372_v5  ;;  %1376 = vadd.xlane.f32.xlu0 %v1375_v61  ;;  %v1378_v8 = vsel %vm978_vm1, %v1998_v60, 0.0 }
 0x242   : > { %v2000_v20 = vpop.eup %1999 }
 0x243   : > { %v2002_v1 = vpop.eup %2001  ;;  %v1381_v3 = vsel %vm978_vm1, %v2000_v20, 0.0 }
 0x244   : > { %1379 = vadd.xlane.f32.xlu1 %v1378_v8  ;;  %1382 = vadd.xlane.f32.xlu0 %v1381_v3  ;;  %v1384_v7 = vsel %vm978_vm1, %v2002_v1, 0.0 }
 0x246   : > { %v2004_v9 = vpop.eup %2003 }
 0x247   : > { %v2006_v11 = vpop.eup %2005  ;;  %v1387_v15 = vsel %vm978_vm1, %v2004_v9, 0.0 }
 0x248   : > { %1385 = vadd.xlane.f32.xlu1 %v1384_v7  ;;  %1388 = vadd.xlane.f32.xlu0 %v1387_v15  ;;  %v1390_v17 = vsel %vm978_vm1, %v2006_v11, 0.0 }
 0x24a   : > { %v2008_v19 = vpop.eup %2007 }
 0x24b   : > { %v2010_v23 = vpop.eup %2009  ;;  %v1393_v25 = vsel %vm978_vm1, %v2008_v19, 0.0 }
 0x24c   : > { %1391 = vadd.xlane.f32.xlu1 %v1390_v17  ;;  %1394 = vadd.xlane.f32.xlu0 %v1393_v25  ;;  %v1396_v27 = vsel %vm978_vm1, %v2010_v23, 0.0 }
 0x250   : > { %1397 = vadd.xlane.f32.xlu1 %v1396_v27 }
 0x299   : > { %v1305_v52 = vpop.xlane.xlu0 %1304 }
 0x29a   : > { %2011 = vlog2.f32 %v1305_v52 }
 0x29d   : > { %v1308_v31 = vpop.xlane.xlu1 %1307  ;;  %v1311_v56 = vpop.xlane.xlu0 %1310 }
 0x29e   : > { %2013 = vlog2.f32 %v1308_v31 }
 0x29f   : > { %2015 = vlog2.f32 %v1311_v56 }
 0x2a1   : > { %v1314_v35 = vpop.xlane.xlu1 %1313  ;;  %v1317_v57 = vpop.xlane.xlu0 %1316 }
 0x2a2   : > { %2017 = vlog2.f32 %v1314_v35 }
 0x2a3   : > { %2019 = vlog2.f32 %v1317_v57 }
 0x2a5   : > { %v1320_v39 = vpop.xlane.xlu1 %1319  ;;  %v1323_v62 = vpop.xlane.xlu0 %1322 }
 0x2a6   : > { %2021 = vlog2.f32 %v1320_v39 }
 0x2a7   : > { %v2012_v41 = vpop.eup %2011  ;;  %2023 = vlog2.f32 %v1323_v62 }
 0x2a8   : > { %v1400_v4 = vmul.f32 0.6931472, %v2012_v41 }
 0x2a9   : > { %v1326_v47 = vpop.xlane.xlu1 %1325  ;;  %v1329_v6 = vpop.xlane.xlu0 %1328 }
 0x2aa   : > { %v1463_v49 = vsub.f32 %v2577_v16, %v1400_v4  ;;  %2025 = vlog2.f32 %v1326_v47 }
 0x2ab   : > { %v2014_v50 = vpop.eup %2013  ;;  %2027 = vlog2.f32 %v1329_v6 }
 0x2ac   : > { %v2016_v51 = vpop.eup %2015  ;;  %1495 = vst.msk [vmem:[%s2298_s5] sm:$0xff] %vm978_vm1, %v1463_v49  ;;  %v1402_v58 = vmul.f32 0.6931472, %v2014_v50 }
 0x2ad   : > { %v1404_v5 = vmul.f32 0.6931472, %v2016_v51  ;;  %v1332_v14 = vpop.xlane.xlu1 %1331  ;;  %v1335_v60 = vpop.xlane.xlu0 %1334 }
 0x2ae   : > { %v1464_v61 = vsub.f32 %v2585_v26, %v1402_v58  ;;  %2029 = vlog2.f32 %v1332_v14 }
 0x2af   : > { %v2018_v8 = vpop.eup %2017  ;;  %v1465_v20 = vsub.f32 %v2580_v18, %v1404_v5  ;;  %2031 = vlog2.f32 %v1335_v60 }
 0x2b0   : > { %v2020_v16 = vpop.eup %2019  ;;  %1496 = vst.msk [vmem:[%s2298_s5 + $0x8] sm:$0xff] %vm978_vm1, %v1464_v61  ;;  %v1406_v1 = vmul.f32 0.6931472, %v2018_v8 }
 0x2b1   : > { %1497 = vst.msk [vmem:[%s2298_s5 + $0x10] sm:$0xff] %vm978_vm1, %v1465_v20  ;;  %v1408_v3 = vmul.f32 0.6931472, %v2020_v16  ;;  %v1338_v7 = vpop.xlane.xlu1 %1337  ;;  %v1341_v9 = vpop.xlane.xlu0 %1340 }
 0x2b2   : > { %v1466_v11 = vsub.f32 %v2588_v29, %v1406_v1  ;;  %2033 = vlog2.f32 %v1338_v7 }
 0x2b3   : > { %v2022_v26 = vpop.eup %2021  ;;  %v1467_v15 = vsub.f32 %v2593_v33, %v1408_v3  ;;  %2035 = vlog2.f32 %v1341_v9 }
 0x2b4   : > { %v2024_v18 = vpop.eup %2023  ;;  %1498 = vst.msk [vmem:[%s2298_s5 + $0x18] sm:$0xff] %vm978_vm1, %v1466_v11  ;;  %v1410_v17 = vmul.f32 0.6931472, %v2022_v26 }
 0x2b5   : > { %1499 = vst.msk [vmem:[%s2298_s5 + $0x20] sm:$0xff] %vm978_vm1, %v1467_v15  ;;  %v1412_v19 = vmul.f32 0.6931472, %v2024_v18  ;;  %v1344_v23 = vpop.xlane.xlu1 %1343  ;;  %v1347_v25 = vpop.xlane.xlu0 %1346 }
 0x2b6   : > { %v1468_v27 = vsub.f32 %v2596_v37, %v1410_v17  ;;  %2037 = vlog2.f32 %v1344_v23 }
 0x2b7   : > { %v2026_v29 = vpop.eup %2025  ;;  %v1469_v52 = vsub.f32 %v2601_v40, %v1412_v19  ;;  %2039 = vlog2.f32 %v1347_v25 }
 0x2b8   : > { %v2028_v33 = vpop.eup %2027  ;;  %1500 = vst.msk [vmem:[%s2298_s5 + $0x28] sm:$0xff] %vm978_vm1, %v1468_v27  ;;  %v1414_v31 = vmul.f32 0.6931472, %v2026_v29 }
 0x2b9   : > { %1501 = vst.msk [vmem:[%s2298_s5 + $0x30] sm:$0xff] %vm978_vm1, %v1469_v52  ;;  %v1416_v56 = vmul.f32 0.6931472, %v2028_v33  ;;  %v1350_v35 = vpop.xlane.xlu1 %1349  ;;  %v1353_v57 = vpop.xlane.xlu0 %1352 }
 0x2ba   : > { %v1470_v39 = vsub.f32 %v2604_v43, %v1414_v31  ;;  %2041 = vlog2.f32 %v1350_v35 }
 0x2bb   : > { %v2030_v37 = vpop.eup %2029  ;;  %v1471_v62 = vsub.f32 %v2609_v48, %v1416_v56  ;;  %2043 = vlog2.f32 %v1353_v57 }
 0x2bc   : > { %v2032_v40 = vpop.eup %2031  ;;  %1502 = vst.msk [vmem:[%s2298_s5 + $0x38] sm:$0xff] %vm978_vm1, %v1470_v39  ;;  %v1418_v41 = vmul.f32 0.6931472, %v2030_v37 }
 0x2bd   : > { %1503 = vst.msk [vmem:[%s2298_s5 + $0x40] sm:$0xff] %vm978_vm1, %v1471_v62  ;;  %v1420_v4 = vmul.f32 0.6931472, %v2032_v40  ;;  %v1356_v47 = vpop.xlane.xlu1 %1355  ;;  %v1359_v6 = vpop.xlane.xlu0 %1358 }
 0x2be   : > { %v1472_v49 = vsub.f32 %v2612_v12, %v1418_v41  ;;  %2045 = vlog2.f32 %v1356_v47 }
 0x2bf   : > { %v2034_v43 = vpop.eup %2033  ;;  %v1473_v50 = vsub.f32 %v2618_v63, %v1420_v4  ;;  %2047 = vlog2.f32 %v1359_v6 }
 0x2c0   : > { %v2036_v48 = vpop.eup %2035  ;;  %1504 = vst.msk [vmem:[%s2298_s5 + $0x48] sm:$0xff] %vm978_vm1, %v1472_v49  ;;  %v1422_v51 = vmul.f32 0.6931472, %v2034_v43 }
 0x2c1   : > { %1505 = vst.msk [vmem:[%s2298_s5 + $0x50] sm:$0xff] %vm978_vm1, %v1473_v50  ;;  %v1424_v58 = vmul.f32 0.6931472, %v2036_v48  ;;  %v1362_v5 = vpop.xlane.xlu1 %1361  ;;  %v1365_v14 = vpop.xlane.xlu0 %1364 }
 0x2c2   : > { %v1474_v60 = vsub.f32 %v2622_v22, %v1422_v51  ;;  %2049 = vlog2.f32 %v1362_v5 }
 0x2c3   : > { %v2038_v12 = vpop.eup %2037  ;;  %v1475_v61 = vsub.f32 %v2628_v28, %v1424_v58  ;;  %2051 = vlog2.f32 %v1365_v14 }
 0x2c4   : > { %v2040_v63 = vpop.eup %2039  ;;  %1506 = vst.msk [vmem:[%s2298_s5 + $0x58] sm:$0xff] %vm978_vm1, %v1474_v60  ;;  %v1426_v8 = vmul.f32 0.6931472, %v2038_v12 }
 0x2c5   : > { %1507 = vst.msk [vmem:[%s2298_s5 + $0x60] sm:$0xff] %vm978_vm1, %v1475_v61  ;;  %v1428_v20 = vmul.f32 0.6931472, %v2040_v63  ;;  %v1368_v16 = vpop.xlane.xlu1 %1367  ;;  %v1371_v1 = vpop.xlane.xlu0 %1370 }
 0x2c6   : > { %v1476_v3 = vsub.f32 %v2632_v30, %v1426_v8  ;;  %2053 = vlog2.f32 %v1368_v16 }
 0x2c7   : > { %v2042_v22 = vpop.eup %2041  ;;  %v1477_v7 = vsub.f32 %v2638_v36, %v1428_v20  ;;  %2055 = vlog2.f32 %v1371_v1 }
 0x2c8   : > { %v2044_v28 = vpop.eup %2043  ;;  %1508 = vst.msk [vmem:[%s2298_s5 + $0x68] sm:$0xff] %vm978_vm1, %v1476_v3  ;;  %v1430_v9 = vmul.f32 0.6931472, %v2042_v22 }
 0x2c9   : > { %1509 = vst.msk [vmem:[%s2298_s5 + $0x70] sm:$0xff] %vm978_vm1, %v1477_v7  ;;  %v1432_v11 = vmul.f32 0.6931472, %v2044_v28  ;;  %v1374_v26 = vpop.xlane.xlu1 %1373  ;;  %v1377_v15 = vpop.xlane.xlu0 %1376 }
 0x2ca   : > { %v1478_v18 = vsub.f32 %v2642_v38, %v1430_v9  ;;  %2057 = vlog2.f32 %v1374_v26 }
 0x2cb   : > { %v2046_v30 = vpop.eup %2045  ;;  %v1479_v17 = vsub.f32 %v2648_v44, %v1432_v11  ;;  %2059 = vlog2.f32 %v1377_v15 }
 0x2cc   : > { %v2048_v36 = vpop.eup %2047  ;;  %1510 = vst.msk [vmem:[%s2298_s5 + $0x78] sm:$0xff] %vm978_vm1, %v1478_v18  ;;  %v1434_v19 = vmul.f32 0.6931472, %v2046_v30 }
 0x2cd   : > { %1511 = vst.msk [vmem:[%s2298_s5 + $0x80] sm:$0xff] %vm978_vm1, %v1479_v17  ;;  %v1436_v23 = vmul.f32 0.6931472, %v2048_v36  ;;  %v1380_v25 = vpop.xlane.xlu1 %1379  ;;  %v1383_v27 = vpop.xlane.xlu0 %1382 }
 0x2ce   : > { %v1480_v29 = vsub.f32 %v2652_v46, %v1434_v19  ;;  %2061 = vlog2.f32 %v1380_v25 }
 0x2cf   : > { %v2050_v38 = vpop.eup %2049  ;;  %v1481_v52 = vsub.f32 %v2658_v53, %v1436_v23  ;;  %2063 = vlog2.f32 %v1383_v27 }
 0x2d0   : > { %v2052_v44 = vpop.eup %2051  ;;  %1512 = vst.msk [vmem:[%s2298_s5 + $0x88] sm:$0xff] %vm978_vm1, %v1480_v29  ;;  %v1438_v33 = vmul.f32 0.6931472, %v2050_v38 }
 0x2d1   : > { %1513 = vst.msk [vmem:[%s2298_s5 + $0x90] sm:$0xff] %vm978_vm1, %v1481_v52  ;;  %v1440_v31 = vmul.f32 0.6931472, %v2052_v44  ;;  %v1386_v56 = vpop.xlane.xlu1 %1385  ;;  %v1389_v35 = vpop.xlane.xlu0 %1388 }
 0x2d2   : > { %v1482_v57 = vsub.f32 %v2662_v55, %v1438_v33  ;;  %2065 = vlog2.f32 %v1386_v56 }
 0x2d3   : > { %v2054_v46 = vpop.eup %2053  ;;  %v1483_v39 = vsub.f32 %v2668_v0, %v1440_v31  ;;  %2067 = vlog2.f32 %v1389_v35 }
 0x2d4   : > { %v2056_v53 = vpop.eup %2055  ;;  %1514 = vst.msk [vmem:[%s2298_s5 + $0x98] sm:$0xff] %vm978_vm1, %v1482_v57  ;;  %v1442_v37 = vmul.f32 0.6931472, %v2054_v46 }
 0x2d5   : > { %1515 = vst.msk [vmem:[%s2298_s5 + $0xa0] sm:$0xff] %vm978_vm1, %v1483_v39  ;;  %v1444_v62 = vmul.f32 0.6931472, %v2056_v53  ;;  %v1392_v40 = vpop.xlane.xlu1 %1391  ;;  %v1395_v41 = vpop.xlane.xlu0 %1394 }
 0x2d6   : > { %v1484_v4 = vsub.f32 %v2672_v2, %v1442_v37  ;;  %2069 = vlog2.f32 %v1392_v40 }
 0x2d7   : > { %v2058_v55 = vpop.eup %2057  ;;  %v1485_v47 = vsub.f32 %v2678_v10, %v1444_v62  ;;  %2071 = vlog2.f32 %v1395_v41 }
 0x2d8   : > { %v2060_v0 = vpop.eup %2059  ;;  %1516 = vst.msk [vmem:[%s2298_s5 + $0xa8] sm:$0xff] %vm978_vm1, %v1484_v4  ;;  %v1446_v6 = vmul.f32 0.6931472, %v2058_v55 }
 0x2d9   : > { %1517 = vst.msk [vmem:[%s2298_s5 + $0xb0] sm:$0xff] %vm978_vm1, %v1485_v47  ;;  %v1448_v49 = vmul.f32 0.6931472, %v2060_v0  ;;  %v1398_v43 = vpop.xlane.xlu1 %1397 }
 0x2da   : > { %v1486_v50 = vsub.f32 %v2682_v13, %v1446_v6  ;;  %2073 = vlog2.f32 %v1398_v43 }
 0x2db   : > { %v2062_v2 = vpop.eup %2061  ;;  %v1487_v48 = vsub.f32 %v2688_v21, %v1448_v49 }
 0x2dc   : > { %v2064_v51 = vpop.eup %2063  ;;  %1518 = vst.msk [vmem:[%s2298_s5 + $0xb8] sm:$0xff] %vm978_vm1, %v1486_v50  ;;  %v1450_v10 = vmul.f32 0.6931472, %v2062_v2 }
 0x2dd   : > { %1519 = vst.msk [vmem:[%s2298_s5 + $0xc0] sm:$0xff] %vm978_vm1, %v1487_v48  ;;  %v1452_v58 = vmul.f32 0.6931472, %v2064_v51 }
 0x2de   : > { %v1488_v5 = vsub.f32 %v2692_v24, %v1450_v10 }
 0x2df   : > { %v2066_v14 = vpop.eup %2065  ;;  %v1489_v60 = vsub.f32 %v2698_v32, %v1452_v58 }
 0x2e0   : > { %v2068_v12 = vpop.eup %2067  ;;  %1520 = vst.msk [vmem:[%s2298_s5 + $0xc8] sm:$0xff] %vm978_vm1, %v1488_v5  ;;  %v1454_v13 = vmul.f32 0.6931472, %v2066_v14 }
 0x2e1   : > { %1521 = vst.msk [vmem:[%s2298_s5 + $0xd0] sm:$0xff] %vm978_vm1, %v1489_v60  ;;  %v1456_v21 = vmul.f32 0.6931472, %v2068_v12 }
 0x2e2   : > { %v1490_v61 = vsub.f32 %v2702_v34, %v1454_v13 }
 0x2e3   : > { %v2070_v63 = vpop.eup %2069  ;;  %v1491_v8 = vsub.f32 %v2708_v42, %v1456_v21 }
 0x2e4   : > { %v2072_v20 = vpop.eup %2071  ;;  %1522 = vst.msk [vmem:[%s2298_s5 + $0xd8] sm:$0xff] %vm978_vm1, %v1490_v61  ;;  %v1458_v24 = vmul.f32 0.6931472, %v2070_v63 }
 0x2e5   : > { %1523 = vst.msk [vmem:[%s2298_s5 + $0xe0] sm:$0xff] %vm978_vm1, %v1491_v8  ;;  %v1460_v32 = vmul.f32 0.6931472, %v2072_v20 }
 0x2e6   : > { %v1492_v16 = vsub.f32 %v2712_v45, %v1458_v24 }
 0x2e7   : > { %v2074_v1 = vpop.eup %2073  ;;  %v1493_v3 = vsub.f32 %v2718_v54, %v1460_v32 }
 0x2e8   : > { %1524 = vst.msk [vmem:[%s2298_s5 + $0xe8] sm:$0xff] %vm978_vm1, %v1492_v16  ;;  %v1462_v22 = vmul.f32 0.6931472, %v2074_v1 }
 0x2e9   : > { %1525 = vst.msk [vmem:[%s2298_s5 + $0xf0] sm:$0xff] %vm978_vm1, %v1493_v3 }
 0x2ea   : > { %v1494_v34 = vsub.f32 %v2722_v59, %v1462_v22 }
 0x2ec   : > { %1526 = vst.msk [vmem:[%s2298_s5 + $0xf8] sm:$0xff] %vm978_vm1, %v1494_v34 }
 0x2ed PF: > { %s13_s18 = sadd.s32 1, %s2129_s18   ;;  %s2857_s12 = smov %s2109_s13 }
 0x2ee   : > { %p10_p0 = scmp.ge.s32.totalorder %s13_s18, 6   ;;  %s2858_s13 = smov %s2203_s25 }
 0x2ef   : > { %s2859_s14 = smov %s2121_s16  ;;  %s2860_s15 = smov %s2125_s17 }
 0x2f0   : > { %s2861_s16 = smov %s2864_s19  ;;  %s2862_s17 = smov %s2868_s20 }
 0x2f1   :  { %12 = sbr.rel (!%p10_p0) target bundleno = 4 (0x4), region = 119 }

// kernel: sage_forward.3
= control target key start
LH: loop header
LB: loop body
LE: loop exit
PB: predicated region body
PF: predicated region fallthrough
CT: control target
= control target key end

     0   :  { %s2661_s18 = smov 0   ;;  %s2663_s19 = smov 0   ;;  %s3120_s0 = inlined_call_operand.vmem [shape: bf16[512,512], index: 0, kind: input, shape index: {}]   ;;  %s3121_s1 = inlined_call_operand.vmem [shape: bf16[512,64], index: 1, kind: input, shape index: {}]   ;;  %s3122_s2 = inlined_call_operand.vmem [shape: bf16[64,64], index: 2, kind: input, shape index: {}]   ;;  %s3123_s3 = inlined_call_operand.vmem [shape: bf16[64,64], index: 3, kind: input, shape index: {}]   ;;  %s3124_s4 = inlined_call_operand.vmem [shape: f32[1,64], index: 4, kind: input, shape index: {}]   ;;  %s3125_s5 = inlined_call_operand.vmem [shape: bf16[512,64], index: 5, kind: output, shape index: {}]  }
   0x1   :  { %s2665_s20 = smov 0   ;;  %s2667_s21 = smov 0  }
   0x2   :  { %s2669_s22 = smov 0   ;;  %s2671_s23 = smov 0  }
   0x3   :  { %s2673_s24 = smov 0  }
   0x4 LB: > { %s24_s25 = sadd.s32 1, %s2620_s22  ;;  %s27_s26 = sadd.s32 1, %s2624_s23  ;;  %s2628_s24 = sphi %s2673_s24, %s15_s24   ;;  %s2624_s23 = sphi %s2671_s23, %s3131_s23   ;;  %s2620_s22 = sphi %s2669_s22, %s3130_s22   ;;  %s2616_s21 = sphi %s2667_s21, %s3129_s21   ;;  %s2612_s20 = sphi %s2665_s20, %s3128_s20   ;;  %s2608_s19 = sphi %s2663_s19, %s3127_s19   ;;  %s2604_s18 = sphi %s2661_s18, %s3126_s18  }
   0x5   : > { %p25_p0 = scmp.ge.s32.totalorder %s24_s25, 2  ;;  %p43_p1 = scmp.ne.s32.totalorder %s2608_s19, %s2604_s18 }
   0x6   : > { %p44_p2 = scmp.eq.s32.totalorder %s2628_s24, 0  ;;  %s36_s30 = sadd.s32 1, %s2608_s19 }
   0x7   : > { %s3133_s25 = smov (%p25_p0, %s24_s25), 0  ;;  %s3135_s26 = smov (!%p25_p0, %s27_s26), %s2624_s23 }
   0x8   : > { %p45_p3 = por %p44_p2, %p43_p1  ;;  %p29_p4 = scmp.ge.s32.totalorder %s3135_s26, 2 }
   0x9   : > { %s32_s27 = ssub.s32 %s2620_s22, %s3133_s25  ;;  %p1993_p6 = scmp.ge.s32.totalorder %s2628_s24, 4 }
   0xa   : > { %s3137_s26 = smov (%p29_p4, %s3135_s26), 0 }
   0xb   : > { %s31_s28 = ssub.s32 %s2624_s23, %s3137_s26  ;;  %191 = sbr.rel (%p1993_p6) target bundleno = 39 (0x27), region = 32 }
   0xc   : > { %s33_s29 = sor.u32 %s32_s27, %s31_s28 }
   0xd   : > { %p34_p5 = scmp.eq.s32.totalorder %s33_s29, 0 }
   0xf   : > { %s2712_s6 = scalar_select %p34_p5, %s2608_s19, %s36_s30  }
  0x10   : > { %194 = sbr.rel (!%p45_p3) target bundleno = 39 (0x27), region = 36  ;;  %s196_s7 = sand.u32 (%p45_p3), 1, %s2608_s19  }
  0x11   : > { %s1996_s8 = sshll.u32 (%p45_p3), %s2620_s22, 1  ;;  %s1994_s9 = sshll.u32 (%p45_p3), %s196_s7, 8 }
  0x12   : > { %s2148_s10 = sshll.u32 (%p45_p3), %s2624_s23, 7  ;;  %s2726_s16 = scalar_lea.vmem (%p45_p3), [#allocation3], %s1994_s9 }
  0x13   : > { %s202_s11 = sadd.s32 (%p45_p3), %s2148_s10, %s1996_s8 }
  0x14   : > { %s1998_s12 = sshll.u32 (%p45_p3), %s202_s11, 2 }
  0x15   : > { %s2721_s15 = scalar_lea.vmem %s3120_s0, %s1998_s12 }
  0x16   : > { %v295_v0 = vld [vmem:[%s2721_s15] sm:$0xff]  ;;  %v297_v1 = vld [vmem:[%s2721_s15 + $0x10] sm:$0xff] }
  0x17   : > { %v299_v2 = vld [vmem:[%s2721_s15 + $0x20] sm:$0xff]  ;;  %296 = vst [vmem:[%s2726_s16] sm:$0xff] %v295_v0  ;;  %298 = vst [vmem:[%s2726_s16 + $0x8] sm:$0xff] %v297_v1  ;;  %v301_v3 = vld [vmem:[%s2721_s15 + $0x30] sm:$0xff] }
  0x18   : > { %300 = vst [vmem:[%s2726_s16 + $0x10] sm:$0xff] %v299_v2  ;;  %v303_v4 = vld [vmem:[%s2721_s15 + $0x40] sm:$0xff]  ;;  %v305_v5 = vld [vmem:[%s2721_s15 + $0x50] sm:$0xff]  ;;  %302 = vst [vmem:[%s2726_s16 + $0x18] sm:$0xff] %v301_v3 }
  0x19   : > { %304 = vst [vmem:[%s2726_s16 + $0x20] sm:$0xff] %v303_v4  ;;  %306 = vst [vmem:[%s2726_s16 + $0x28] sm:$0xff] %v305_v5  ;;  %v307_v6 = vld [vmem:[%s2721_s15 + $0x60] sm:$0xff]  ;;  %v309_v7 = vld [vmem:[%s2721_s15 + $0x70] sm:$0xff] }
  0x1a   : > { %v311_v8 = vld [vmem:[%s2721_s15 + $0x80] sm:$0xff]  ;;  %308 = vst [vmem:[%s2726_s16 + $0x30] sm:$0xff] %v307_v6  ;;  %310 = vst [vmem:[%s2726_s16 + $0x38] sm:$0xff] %v309_v7  ;;  %v313_v9 = vld [vmem:[%s2721_s15 + $0x90] sm:$0xff] }
  0x1b   : > { %312 = vst [vmem:[%s2726_s16 + $0x40] sm:$0xff] %v311_v8  ;;  %v315_v10 = vld [vmem:[%s2721_s15 + $0xa0] sm:$0xff]  ;;  %v317_v11 = vld [vmem:[%s2721_s15 + $0xb0] sm:$0xff]  ;;  %314 = vst [vmem:[%s2726_s16 + $0x48] sm:$0xff] %v313_v9 }
  0x1c   : > { %316 = vst [vmem:[%s2726_s16 + $0x50] sm:$0xff] %v315_v10  ;;  %318 = vst [vmem:[%s2726_s16 + $0x58] sm:$0xff] %v317_v11  ;;  %v319_v12 = vld [vmem:[%s2721_s15 + $0xc0] sm:$0xff]  ;;  %v321_v13 = vld [vmem:[%s2721_s15 + $0xd0] sm:$0xff] }
  0x1d   : > { %v323_v14 = vld [vmem:[%s2721_s15 + $0xe0] sm:$0xff]  ;;  %320 = vst [vmem:[%s2726_s16 + $0x60] sm:$0xff] %v319_v12  ;;  %322 = vst [vmem:[%s2726_s16 + $0x68] sm:$0xff] %v321_v13  ;;  %v325_v15 = vld [vmem:[%s2721_s15 + $0xf0] sm:$0xff] }
  0x1e   : > { %324 = vst [vmem:[%s2726_s16 + $0x70] sm:$0xff] %v323_v14  ;;  %v327_v16 = vld [vmem:[%s2721_s15 + $0x100] sm:$0xff]  ;;  %v329_v17 = vld [vmem:[%s2721_s15 + $0x110] sm:$0xff]  ;;  %326 = vst [vmem:[%s2726_s16 + $0x78] sm:$0xff] %v325_v15 }
  0x1f   : > { %328 = vst [vmem:[%s2726_s16 + $0x80] sm:$0xff] %v327_v16  ;;  %330 = vst [vmem:[%s2726_s16 + $0x88] sm:$0xff] %v329_v17  ;;  %v331_v18 = vld [vmem:[%s2721_s15 + $0x120] sm:$0xff]  ;;  %v333_v19 = vld [vmem:[%s2721_s15 + $0x130] sm:$0xff] }
  0x20   : > { %v335_v20 = vld [vmem:[%s2721_s15 + $0x140] sm:$0xff]  ;;  %332 = vst [vmem:[%s2726_s16 + $0x90] sm:$0xff] %v331_v18  ;;  %334 = vst [vmem:[%s2726_s16 + $0x98] sm:$0xff] %v333_v19  ;;  %v337_v21 = vld [vmem:[%s2721_s15 + $0x150] sm:$0xff] }
  0x21   : > { %336 = vst [vmem:[%s2726_s16 + $0xa0] sm:$0xff] %v335_v20  ;;  %v339_v22 = vld [vmem:[%s2721_s15 + $0x160] sm:$0xff]  ;;  %v341_v23 = vld [vmem:[%s2721_s15 + $0x170] sm:$0xff]  ;;  %338 = vst [vmem:[%s2726_s16 + $0xa8] sm:$0xff] %v337_v21 }
  0x22   : > { %340 = vst [vmem:[%s2726_s16 + $0xb0] sm:$0xff] %v339_v22  ;;  %342 = vst [vmem:[%s2726_s16 + $0xb8] sm:$0xff] %v341_v23  ;;  %v343_v24 = vld [vmem:[%s2721_s15 + $0x180] sm:$0xff]  ;;  %v345_v25 = vld [vmem:[%s2721_s15 + $0x190] sm:$0xff] }
  0x23   : > { %v347_v26 = vld [vmem:[%s2721_s15 + $0x1a0] sm:$0xff]  ;;  %344 = vst [vmem:[%s2726_s16 + $0xc0] sm:$0xff] %v343_v24  ;;  %346 = vst [vmem:[%s2726_s16 + $0xc8] sm:$0xff] %v345_v25  ;;  %v349_v27 = vld [vmem:[%s2721_s15 + $0x1b0] sm:$0xff] }
  0x24   : > { %348 = vst [vmem:[%s2726_s16 + $0xd0] sm:$0xff] %v347_v26  ;;  %v351_v28 = vld [vmem:[%s2721_s15 + $0x1c0] sm:$0xff]  ;;  %v353_v29 = vld [vmem:[%s2721_s15 + $0x1d0] sm:$0xff]  ;;  %350 = vst [vmem:[%s2726_s16 + $0xd8] sm:$0xff] %v349_v27 }
  0x25   : > { %352 = vst [vmem:[%s2726_s16 + $0xe0] sm:$0xff] %v351_v28  ;;  %354 = vst [vmem:[%s2726_s16 + $0xe8] sm:$0xff] %v353_v29  ;;  %v355_v30 = vld [vmem:[%s2721_s15 + $0x1e0] sm:$0xff]  ;;  %v357_v31 = vld [vmem:[%s2721_s15 + $0x1f0] sm:$0xff] }
  0x26   : > { %356 = vst [vmem:[%s2726_s16 + $0xf0] sm:$0xff] %v355_v30  ;;  %358 = vst [vmem:[%s2726_s16 + $0xf8] sm:$0xff] %v357_v31 }
  0x27 PF: > { %p1999_p7 = scmp.ge.s32.totalorder %s2628_s24, 1  ;;  %p363_p8 = scmp.lt.s32.totalorder %s2628_s24, 5 }
  0x29   : > { %p364_p9 = pnand %p1999_p7, %p363_p8 }
  0x2a   : > { %s370_s17 = sand.u32 (!%p364_p9), 1, %s2604_s18   ;;  %s2001_s27 = sshll.u32 (!%p364_p9), %s2616_s21, 5 }
  0x2b   : > { %367 = sbr.rel (%p364_p9) target bundleno = 649 (0x289), region = 74  ;;  %s2000_s28 = sshll.u32 (!%p364_p9), %s370_s17, 8 }
  0x2c   : > { %p400_p10 = scmp.lt.s32.totalorder (!%p364_p9), %s2001_s27, 63  ;;  %s2798_s9 = scalar_lea.vmem (!%p364_p9), [#allocation3], %s2000_s28 }
  0x2d   : > { %p2003_p11 = scmp.ne.s32.totalorder (!%p364_p9), %s2612_s20, 0 }
  0x30   : > { %s3139_s27 = smov (!%p400_p10, %s2001_s27), 63  ;;  %409 = sbr.rel (%p2003_p11) target bundleno = 70 (0x46), region = 82 }
  0x31   : > { %s2002_s29 = sshll.u32 %s3139_s27, 2 }
  0x32   : > { %s2796_s8 = scalar_lea.vmem %s3125_s5, %s2002_s29 }
  0x35   : > { %vm410_vm0 = vcmask 523264   ;;  %v2630_v32 = vmov 0.0  }
  0x36   : > { %411 = vst.msk [vmem:[#allocation2] sm:$0xff] %vm410_vm0, %v2630_v32  ;;  %412 = vst.msk [vmem:[#allocation2 + $0x8] sm:$0xff] %vm410_vm0, %v2630_v32 }
  0x37   : > { %413 = vst.msk [vmem:[#allocation2 + $0x10] sm:$0xff] %vm410_vm0, %v2630_v32  ;;  %414 = vst.msk [vmem:[#allocation2 + $0x18] sm:$0xff] %vm410_vm0, %v2630_v32 }
  0x38   : > { %415 = vst.msk [vmem:[#allocation2 + $0x20] sm:$0xff] %vm410_vm0, %v2630_v32  ;;  %416 = vst.msk [vmem:[#allocation2 + $0x28] sm:$0xff] %vm410_vm0, %v2630_v32 }
  0x39   : > { %417 = vst.msk [vmem:[#allocation2 + $0x30] sm:$0xff] %vm410_vm0, %v2630_v32  ;;  %418 = vst.msk [vmem:[#allocation2 + $0x38] sm:$0xff] %vm410_vm0, %v2630_v32 }
  0x3a   : > { %419 = vst.msk [vmem:[#allocation2 + $0x40] sm:$0xff] %vm410_vm0, %v2630_v32  ;;  %420 = vst.msk [vmem:[#allocation2 + $0x48] sm:$0xff] %vm410_vm0, %v2630_v32 }
  0x3b   : > { %421 = vst.msk [vmem:[#allocation2 + $0x50] sm:$0xff] %vm410_vm0, %v2630_v32  ;;  %422 = vst.msk [vmem:[#allocation2 + $0x58] sm:$0xff] %vm410_vm0, %v2630_v32 }
  0x3c   : > { %423 = vst.msk [vmem:[#allocation2 + $0x60] sm:$0xff] %vm410_vm0, %v2630_v32  ;;  %424 = vst.msk [vmem:[#allocation2 + $0x68] sm:$0xff] %vm410_vm0, %v2630_v32 }
  0x3d   : > { %425 = vst.msk [vmem:[#allocation2 + $0x70] sm:$0xff] %vm410_vm0, %v2630_v32  ;;  %426 = vst.msk [vmem:[#allocation2 + $0x78] sm:$0xff] %vm410_vm0, %v2630_v32 }
  0x3e   : > { %427 = vst.msk [vmem:[#allocation2 + $0x80] sm:$0xff] %vm410_vm0, %v2630_v32  ;;  %428 = vst.msk [vmem:[#allocation2 + $0x88] sm:$0xff] %vm410_vm0, %v2630_v32 }
  0x3f   : > { %429 = vst.msk [vmem:[#allocation2 + $0x90] sm:$0xff] %vm410_vm0, %v2630_v32  ;;  %430 = vst.msk [vmem:[#allocation2 + $0x98] sm:$0xff] %vm410_vm0, %v2630_v32 }
  0x40   : > { %431 = vst.msk [vmem:[#allocation2 + $0xa0] sm:$0xff] %vm410_vm0, %v2630_v32  ;;  %432 = vst.msk [vmem:[#allocation2 + $0xa8] sm:$0xff] %vm410_vm0, %v2630_v32 }
  0x41   : > { %433 = vst.msk [vmem:[#allocation2 + $0xb0] sm:$0xff] %vm410_vm0, %v2630_v32  ;;  %434 = vst.msk [vmem:[#allocation2 + $0xb8] sm:$0xff] %vm410_vm0, %v2630_v32 }
  0x42   : > { %435 = vst.msk [vmem:[#allocation2 + $0xc0] sm:$0xff] %vm410_vm0, %v2630_v32  ;;  %436 = vst.msk [vmem:[#allocation2 + $0xc8] sm:$0xff] %vm410_vm0, %v2630_v32 }
  0x43   : > { %437 = vst.msk [vmem:[#allocation2 + $0xd0] sm:$0xff] %vm410_vm0, %v2630_v32  ;;  %438 = vst.msk [vmem:[#allocation2 + $0xd8] sm:$0xff] %vm410_vm0, %v2630_v32 }
  0x44   : > { %439 = vst.msk [vmem:[#allocation2 + $0xe0] sm:$0xff] %vm410_vm0, %v2630_v32  ;;  %440 = vst.msk [vmem:[#allocation2 + $0xe8] sm:$0xff] %vm410_vm0, %v2630_v32 }
  0x45   : > { %441 = vst.msk [vmem:[#allocation2 + $0xf0] sm:$0xff] %vm410_vm0, %v2630_v32  ;;  %442 = vst.msk [vmem:[#allocation2 + $0xf8] sm:$0xff] %vm410_vm0, %v2630_v32 }
  0x46 PF: > { %s2004_s18 = sshll.u32 %s2612_s20, 8  ;;  %v2504_v33 = vld [vmem:[%s2798_s9 + $0x4] ss:$8 sps:$4 sm:$0xff]   ;;  %v2502_v51 = vld [vmem:[%s2798_s9] ss:$8 sps:$4 sm:$0xff]   ;;  %vm993_vm1 = vcmask 523264  }
  0x47   : > { %s444_s10 = sshra.s32 %s2004_s18, 3  ;;  %v2507_v34 = vld [vmem:[%s2798_s9 + $0x84] ss:$8 sps:$4 sm:$0xff]   ;;  %832 = vmatprep.mubr.bf16.mxu0 %v2504_v33  ;;  %v2505_v52 = vld [vmem:[%s2798_s9 + $0x80] ss:$8 sps:$4 sm:$0xff]   ;;  %p2054_p12 = scmp.ne.s32.totalorder %s2612_s20, 1 }
  0x48   : > { %s2005_s11 = sshll.u32 %s444_s10, 2  ;;  %896 = vmatprep.mubr.bf16.mxu1 %v2507_v34  ;;  %v2508_v53 = vld [vmem:[%s2798_s9 + $0x14] ss:$8 sps:$4 sm:$0xff]   ;;  %v2512_v55 = vld [vmem:[%s2798_s9 + $0x10] ss:$8 sps:$4 sm:$0xff]   ;;  %v480_v19 = vld [vmem:[#allocation2] sm:$0xff] }
  0x49   : > { %s2839_s14 = scalar_lea.vmem %s3121_s1, %s2005_s11  ;;  %v2510_v54 = vld [vmem:[%s2798_s9 + $0x94] ss:$8 sps:$4 sm:$0xff]   ;;  %v2513_v56 = vld [vmem:[%s2798_s9 + $0x90] ss:$8 sps:$4 sm:$0xff]   ;;  %v2514_v57 = vld [vmem:[%s2798_s9 + $0x24] ss:$8 sps:$4 sm:$0xff]  }
  0x4a   : > { %v2486_v35 = vld [vmem:[%s2839_s14 + $0x78] sm:$0xff]   ;;  %v2488_v37 = vld [vmem:[%s2839_s14 + $0x70] sm:$0xff]   ;;  %v2490_v39 = vld [vmem:[%s2839_s14 + $0x68] sm:$0xff]   ;;  %s2055_s17 = sshll.u32 (!%p2054_p12), %s2616_s21, 8 }
  0x4b   : > { %v2487_v36 = vld [vmem:[%s2839_s14 + $0x38] sm:$0xff]   ;;  %2181 = vmatprep.subr.bf16.mxu0 %v2486_v35  ;;  %2413 = vmatprep.subr.bf16.mxu1 %v2486_v35  ;;  %v2489_v38 = vld [vmem:[%s2839_s14 + $0x30] sm:$0xff]   ;;  %v2491_v40 = vld [vmem:[%s2839_s14 + $0x28] sm:$0xff]   ;;  %s1031_s29 = sshra.s32 (!%p2054_p12), %s2055_s17, 3 }
  0x4c   : > { %2182 = vmatpush3.bf16.msra.mxu0 %v2487_v36  ;;  %2421 = vmatpush3.bf16.msra.mxu1 %v2487_v36  ;;  %v2492_v41 = vld [vmem:[%s2839_s14 + $0x60] sm:$0xff]   ;;  %v2494_v43 = vld [vmem:[%s2839_s14 + $0x58] sm:$0xff]   ;;  %v2496_v45 = vld [vmem:[%s2839_s14 + $0x50] sm:$0xff]  }
  0x4d   : > { %2183 = vmatprep.subr.bf16.mxu0 %v2488_v37  ;;  %2414 = vmatprep.subr.bf16.mxu1 %v2488_v37  ;;  %v2493_v42 = vld [vmem:[%s2839_s14 + $0x20] sm:$0xff]   ;;  %v2495_v44 = vld [vmem:[%s2839_s14 + $0x18] sm:$0xff]   ;;  %v2497_v46 = vld [vmem:[%s2839_s14 + $0x10] sm:$0xff]  }
  0x4e   : > { %v2498_v47 = vld [vmem:[%s2839_s14 + $0x48] sm:$0xff]   ;;  %v2500_v49 = vld [vmem:[%s2839_s14 + $0x40] sm:$0xff]   ;;  %v2520_v61 = vld [vmem:[%s2798_s9 + $0x34] ss:$8 sps:$4 sm:$0xff]  }
  0x4f   : > { %v2499_v48 = vld [vmem:[%s2839_s14 + $0x8] sm:$0xff]   ;;  %v2501_v50 = vld [vmem:[%s2839_s14] sm:$0xff]   ;;  %v2522_v62 = vld [vmem:[%s2798_s9 + $0xb4] ss:$8 sps:$4 sm:$0xff]  }
  0x50   : > { %2184 = vmatpush3.bf16.msra.mxu0 %v2489_v38  ;;  %2422 = vmatpush3.bf16.msra.mxu1 %v2489_v38  ;;  %v2516_v58 = vld [vmem:[%s2798_s9 + $0xa4] ss:$8 sps:$4 sm:$0xff]   ;;  %v2518_v59 = vld [vmem:[%s2798_s9 + $0x20] ss:$8 sps:$4 sm:$0xff]   ;;  %v2524_v63 = vld [vmem:[%s2798_s9 + $0x30] ss:$8 sps:$4 sm:$0xff]  }
  0x51   : > { %2185 = vmatprep.subr.bf16.mxu0 %v2490_v39  ;;  %2415 = vmatprep.subr.bf16.mxu1 %v2490_v39  ;;  %v2519_v60 = vld [vmem:[%s2798_s9 + $0xa0] ss:$8 sps:$4 sm:$0xff]   ;;  %v2525_v0 = vld [vmem:[%s2798_s9 + $0xb0] ss:$8 sps:$4 sm:$0xff]   ;;  %v2526_v1 = vld [vmem:[%s2798_s9 + $0x44] ss:$8 sps:$4 sm:$0xff]  }
  0x52   : > { %v2528_v2 = vld [vmem:[%s2798_s9 + $0xc4] ss:$8 sps:$4 sm:$0xff]   ;;  %v2530_v3 = vld [vmem:[%s2798_s9 + $0x40] ss:$8 sps:$4 sm:$0xff]   ;;  %v2532_v5 = vld [vmem:[%s2798_s9 + $0x54] ss:$8 sps:$4 sm:$0xff]  }
  0x53   : > { %v2531_v4 = vld [vmem:[%s2798_s9 + $0xc0] ss:$8 sps:$4 sm:$0xff]   ;;  %v2534_v6 = vld [vmem:[%s2798_s9 + $0xd4] ss:$8 sps:$4 sm:$0xff]   ;;  %v2536_v7 = vld [vmem:[%s2798_s9 + $0x50] ss:$8 sps:$4 sm:$0xff]  }
  0x54   : > { %2186 = vmatpush3.bf16.msra.mxu0 %v2491_v40  ;;  %2423 = vmatpush3.bf16.msra.mxu1 %v2491_v40  ;;  %v2537_v8 = vld [vmem:[%s2798_s9 + $0xd0] ss:$8 sps:$4 sm:$0xff]   ;;  %v2538_v9 = vld [vmem:[%s2798_s9 + $0x64] ss:$8 sps:$4 sm:$0xff]   ;;  %v2542_v11 = vld [vmem:[%s2798_s9 + $0x60] ss:$8 sps:$4 sm:$0xff]  }
  0x55   : > { %2187 = vmatprep.subr.bf16.mxu0 %v2492_v41  ;;  %2416 = vmatprep.subr.bf16.mxu1 %v2492_v41  ;;  %v2540_v10 = vld [vmem:[%s2798_s9 + $0xe4] ss:$8 sps:$4 sm:$0xff]   ;;  %v2543_v12 = vld [vmem:[%s2798_s9 + $0xe0] ss:$8 sps:$4 sm:$0xff]   ;;  %v2544_v13 = vld [vmem:[%s2798_s9 + $0x74] ss:$8 sps:$4 sm:$0xff]  }
  0x56   : > { %v2546_v14 = vld [vmem:[%s2798_s9 + $0xf4] ss:$8 sps:$4 sm:$0xff]   ;;  %v2548_v15 = vld [vmem:[%s2798_s9 + $0x70] ss:$8 sps:$4 sm:$0xff]   ;;  %v496_v21 = vld [vmem:[#allocation2 + $0x80] sm:$0xff] }
  0x57   : > { %v2549_v16 = vld [vmem:[%s2798_s9 + $0xf0] ss:$8 sps:$4 sm:$0xff]   ;;  %v481_v29 = vld [vmem:[#allocation2 + $0x8] sm:$0xff]  ;;  %s2056_s9 = sshll.u32 (!%p2054_p12), %s1031_s29, 2 }
  0x58   : > { %2188 = vmatpush3.bf16.msra.mxu0 %v2493_v42  ;;  %2424 = vmatpush3.bf16.msra.mxu1 %v2493_v42  ;;  %v497_v31 = vld [vmem:[#allocation2 + $0x88] sm:$0xff]  ;;  %v482_v39 = vld [vmem:[#allocation2 + $0x10] sm:$0xff]  ;;  %s2942_s15 = scalar_lea.vmem (!%p2054_p12), %s3121_s1, %s2056_s9 }
  0x59   : > { %2189 = vmatprep.subr.bf16.mxu0 %v2494_v43  ;;  %2417 = vmatprep.subr.bf16.mxu1 %v2494_v43  ;;  %v498_v41 = vld [vmem:[#allocation2 + $0x90] sm:$0xff] }
  0x5c   : > { %2190 = vmatpush3.bf16.msra.mxu0 %v2495_v44  ;;  %2425 = vmatpush3.bf16.msra.mxu1 %v2495_v44 }
  0x5d   : > { %2191 = vmatprep.subr.bf16.mxu0 %v2496_v45  ;;  %2418 = vmatprep.subr.bf16.mxu1 %v2496_v45 }
  0x60   : > { %2192 = vmatpush3.bf16.msra.mxu0 %v2497_v46  ;;  %2426 = vmatpush3.bf16.msra.mxu1 %v2497_v46 }
  0x61   : > { %2193 = vmatprep.subr.bf16.mxu0 %v2498_v47  ;;  %2419 = vmatprep.subr.bf16.mxu1 %v2498_v47 }
  0x64   : > { %2194 = vmatpush3.bf16.msra.mxu0 %v2499_v48  ;;  %2427 = vmatpush3.bf16.msra.mxu1 %v2499_v48 }
  0x65   : > { %2195 = vmatprep.subr.bf16.mxu0 %v2500_v49  ;;  %2420 = vmatprep.subr.bf16.mxu1 %v2500_v49  ;;  %v483_v49 = vld [vmem:[#allocation2 + $0x18] sm:$0xff] }
  0x68   : > { %2196 = vmatpush3.bf16.msra.mxu0 %v2501_v50  ;;  %2428 = vmatpush3.bf16.msra.mxu1 %v2501_v50 }
  0x6b   : > { %833 = vmatmul.mubr.bf16.vlgmr.msra.gmra.mxu0 %v2502_v51  ;;  %897 = vmatmul.mubr.bf16.vlgmr.msra.gmra.mxu1 %v2505_v52  ;;  %v499_v51 = vld [vmem:[#allocation2 + $0x98] sm:$0xff] }
  0x6c   : > { %840 = vmatprep.mubr.bf16.mxu0 %v2508_v53  ;;  %904 = vmatprep.mubr.bf16.mxu1 %v2510_v54 }
  0x73   : > { %841 = vmatmul.mubr.bf16.gmra.mxu0 %v2512_v55  ;;  %905 = vmatmul.mubr.bf16.gmra.mxu1 %v2513_v56 }
  0x74   : > { %848 = vmatprep.mubr.bf16.mxu0 %v2514_v57  ;;  %912 = vmatprep.mubr.bf16.mxu1 %v2516_v58 }
  0x7b   : > { %849 = vmatmul.mubr.bf16.gmra.mxu0 %v2518_v59  ;;  %913 = vmatmul.mubr.bf16.gmra.mxu1 %v2519_v60  ;;  %v484_v59 = vld [vmem:[#allocation2 + $0x20] sm:$0xff] }
  0x7c   : > { %856 = vmatprep.mubr.bf16.mxu0 %v2520_v61  ;;  %920 = vmatprep.mubr.bf16.mxu1 %v2522_v62  ;;  %v500_v61 = vld [vmem:[#allocation2 + $0xa0] sm:$0xff] }
  0x83   : > { %857 = vmatmul.mubr.bf16.gmra.mxu0 %v2524_v63  ;;  %921 = vmatmul.mubr.bf16.gmra.mxu1 %v2525_v0 }
  0x84   : > { %864 = vmatprep.mubr.bf16.mxu0 %v2526_v1  ;;  %928 = vmatprep.mubr.bf16.mxu1 %v2528_v2 }
  0x8b   : > { %865 = vmatmul.mubr.bf16.gmra.mxu0 %v2530_v3  ;;  %929 = vmatmul.mubr.bf16.gmra.mxu1 %v2531_v4 }
  0x8c   : > { %872 = vmatprep.mubr.bf16.mxu0 %v2532_v5  ;;  %936 = vmatprep.mubr.bf16.mxu1 %v2534_v6  ;;  %v485_v5 = vld [vmem:[#allocation2 + $0x28] sm:$0xff] }
  0x93   : > { %873 = vmatmul.mubr.bf16.gmra.mxu0 %v2536_v7  ;;  %937 = vmatmul.mubr.bf16.gmra.mxu1 %v2537_v8  ;;  %v501_v7 = vld [vmem:[#allocation2 + $0xa8] sm:$0xff] }
  0x94   : > { %880 = vmatprep.mubr.bf16.mxu0 %v2538_v9  ;;  %944 = vmatprep.mubr.bf16.mxu1 %v2540_v10 }
  0x9b   : > { %881 = vmatmul.mubr.bf16.gmra.mxu0 %v2542_v11  ;;  %945 = vmatmul.mubr.bf16.gmra.mxu1 %v2543_v12 }
  0x9c   : > { %888 = vmatprep.mubr.bf16.mxu0 %v2544_v13  ;;  %952 = vmatprep.mubr.bf16.mxu1 %v2546_v14 }
  0xa3   : > { %889 = vmatmul.mubr.bf16.gmra.mxu0 %v2548_v15  ;;  %953 = vmatmul.mubr.bf16.gmra.mxu1 %v2549_v16  ;;  %v486_v15 = vld [vmem:[#allocation2 + $0x30] sm:$0xff] }
 0x12b   : > { %v2197_v17 = vpop.f32.mrf.mxu0  ;;  %v2245_v18 = vpop.f32.mrf.mxu1 }
 0x12d   : > { %v2198_v20 = vpop.f32.mrf.mxu0  ;;  %v2246_v22 = vpop.f32.mrf.mxu1 }
 0x12e   : > { %v2199_v23 = vadd.f32 %v2198_v20, %v2197_v17  ;;  %v2247_v24 = vadd.f32 %v2246_v22, %v2245_v18  ;;  %v502_v17 = vld [vmem:[#allocation2 + $0xb0] sm:$0xff] }
 0x12f   : > { %v2200_v25 = vpop.f32.mrf.mxu0  ;;  %v2248_v26 = vpop.f32.mrf.mxu1 }
 0x130   : > { %v961_v27 = vadd.f32 %v2199_v23, %v480_v19  ;;  %v977_v28 = vadd.f32 %v2247_v24, %v496_v21 }
 0x131   : > { %v2201_v30 = vpop.f32.mrf.mxu0  ;;  %v2249_v32 = vpop.f32.mrf.mxu1 }
 0x132   : > { %994 = vst.msk [vmem:[#allocation2] sm:$0xff] %vm993_vm1, %v961_v27  ;;  %1010 = vst.msk [vmem:[#allocation2 + $0x80] sm:$0xff] %vm993_vm1, %v977_v28  ;;  %v2202_v33 = vadd.f32 %v2201_v30, %v2200_v25  ;;  %v2250_v34 = vadd.f32 %v2249_v32, %v2248_v26  ;;  %v487_v25 = vld [vmem:[#allocation2 + $0x38] sm:$0xff] }
 0x133   : > { %v2203_v35 = vpop.f32.mrf.mxu0  ;;  %v2251_v36 = vpop.f32.mrf.mxu1  ;;  %v503_v27 = vld [vmem:[#allocation2 + $0xb8] sm:$0xff] }
 0x134   : > { %v962_v37 = vadd.f32 %v2202_v33, %v481_v29  ;;  %v978_v38 = vadd.f32 %v2250_v34, %v497_v31 }
 0x135   : > { %v2204_v40 = vpop.f32.mrf.mxu0  ;;  %v2252_v42 = vpop.f32.mrf.mxu1 }
 0x136   : > { %995 = vst.msk [vmem:[#allocation2 + $0x8] sm:$0xff] %vm993_vm1, %v962_v37  ;;  %1011 = vst.msk [vmem:[#allocation2 + $0x88] sm:$0xff] %vm993_vm1, %v978_v38  ;;  %v2205_v43 = vadd.f32 %v2204_v40, %v2203_v35  ;;  %v2253_v44 = vadd.f32 %v2252_v42, %v2251_v36  ;;  %v488_v35 = vld [vmem:[#allocation2 + $0x40] sm:$0xff] }
 0x137   : > { %v2206_v45 = vpop.f32.mrf.mxu0  ;;  %v2254_v46 = vpop.f32.mrf.mxu1  ;;  %v504_v37 = vld [vmem:[#allocation2 + $0xc0] sm:$0xff] }
 0x138   : > { %v963_v47 = vadd.f32 %v2205_v43, %v482_v39  ;;  %v979_v48 = vadd.f32 %v2253_v44, %v498_v41 }
 0x139   : > { %v2207_v50 = vpop.f32.mrf.mxu0  ;;  %v2255_v52 = vpop.f32.mrf.mxu1 }
 0x13a   : > { %996 = vst.msk [vmem:[#allocation2 + $0x10] sm:$0xff] %vm993_vm1, %v963_v47  ;;  %1012 = vst.msk [vmem:[#allocation2 + $0x90] sm:$0xff] %vm993_vm1, %v979_v48  ;;  %v2208_v53 = vadd.f32 %v2207_v50, %v2206_v45  ;;  %v2256_v54 = vadd.f32 %v2255_v52, %v2254_v46  ;;  %v489_v45 = vld [vmem:[#allocation2 + $0x48] sm:$0xff] }
 0x13b   : > { %v2209_v55 = vpop.f32.mrf.mxu0  ;;  %v2257_v56 = vpop.f32.mrf.mxu1  ;;  %v505_v47 = vld [vmem:[#allocation2 + $0xc8] sm:$0xff] }
 0x13c   : > { %v964_v57 = vadd.f32 %v2208_v53, %v483_v49  ;;  %v980_v58 = vadd.f32 %v2256_v54, %v499_v51 }
 0x13d   : > { %v2210_v60 = vpop.f32.mrf.mxu0  ;;  %v2258_v62 = vpop.f32.mrf.mxu1 }
 0x13e   : > { %997 = vst.msk [vmem:[#allocation2 + $0x18] sm:$0xff] %vm993_vm1, %v964_v57  ;;  %1013 = vst.msk [vmem:[#allocation2 + $0x98] sm:$0xff] %vm993_vm1, %v980_v58  ;;  %v2211_v63 = vadd.f32 %v2210_v60, %v2209_v55  ;;  %v2259_v0 = vadd.f32 %v2258_v62, %v2257_v56  ;;  %v490_v55 = vld [vmem:[#allocation2 + $0x50] sm:$0xff] }
 0x13f   : > { %v2212_v1 = vpop.f32.mrf.mxu0  ;;  %v2260_v2 = vpop.f32.mrf.mxu1  ;;  %v506_v57 = vld [vmem:[#allocation2 + $0xd0] sm:$0xff] }
 0x140   : > { %v965_v3 = vadd.f32 %v2211_v63, %v484_v59  ;;  %v981_v4 = vadd.f32 %v2259_v0, %v500_v61 }
 0x141   : > { %v2213_v6 = vpop.f32.mrf.mxu0  ;;  %v2261_v8 = vpop.f32.mrf.mxu1 }
 0x142   : > { %998 = vst.msk [vmem:[#allocation2 + $0x20] sm:$0xff] %vm993_vm1, %v965_v3  ;;  %1014 = vst.msk [vmem:[#allocation2 + $0xa0] sm:$0xff] %vm993_vm1, %v981_v4  ;;  %v2214_v9 = vadd.f32 %v2213_v6, %v2212_v1  ;;  %v2262_v10 = vadd.f32 %v2261_v8, %v2260_v2  ;;  %v491_v1 = vld [vmem:[#allocation2 + $0x58] sm:$0xff] }
 0x143   : > { %v2215_v11 = vpop.f32.mrf.mxu0  ;;  %v2263_v12 = vpop.f32.mrf.mxu1  ;;  %v507_v3 = vld [vmem:[#allocation2 + $0xd8] sm:$0xff] }
 0x144   : > { %v966_v13 = vadd.f32 %v2214_v9, %v485_v5  ;;  %v982_v14 = vadd.f32 %v2262_v10, %v501_v7 }
 0x145   : > { %v2216_v16 = vpop.f32.mrf.mxu0  ;;  %v2264_v18 = vpop.f32.mrf.mxu1 }
 0x146   : > { %999 = vst.msk [vmem:[#allocation2 + $0x28] sm:$0xff] %vm993_vm1, %v966_v13  ;;  %1015 = vst.msk [vmem:[#allocation2 + $0xa8] sm:$0xff] %vm993_vm1, %v982_v14  ;;  %v2217_v19 = vadd.f32 %v2216_v16, %v2215_v11  ;;  %v2265_v20 = vadd.f32 %v2264_v18, %v2263_v12  ;;  %v492_v11 = vld [vmem:[#allocation2 + $0x60] sm:$0xff] }
 0x147   : > { %v2218_v21 = vpop.f32.mrf.mxu0  ;;  %v2266_v22 = vpop.f32.mrf.mxu1  ;;  %v508_v13 = vld [vmem:[#allocation2 + $0xe0] sm:$0xff] }
 0x148   : > { %v967_v23 = vadd.f32 %v2217_v19, %v486_v15  ;;  %v983_v24 = vadd.f32 %v2265_v20, %v502_v17 }
 0x149   : > { %v2219_v26 = vpop.f32.mrf.mxu0  ;;  %v2267_v28 = vpop.f32.mrf.mxu1 }
 0x14a   : > { %1000 = vst.msk [vmem:[#allocation2 + $0x30] sm:$0xff] %vm993_vm1, %v967_v23  ;;  %1016 = vst.msk [vmem:[#allocation2 + $0xb0] sm:$0xff] %vm993_vm1, %v983_v24  ;;  %v2220_v29 = vadd.f32 %v2219_v26, %v2218_v21  ;;  %v2268_v30 = vadd.f32 %v2267_v28, %v2266_v22  ;;  %v493_v21 = vld [vmem:[#allocation2 + $0x68] sm:$0xff] }
 0x14b   : > { %v2221_v31 = vpop.f32.mrf.mxu0  ;;  %v2269_v32 = vpop.f32.mrf.mxu1  ;;  %v509_v23 = vld [vmem:[#allocation2 + $0xe8] sm:$0xff] }
 0x14c   : > { %v968_v33 = vadd.f32 %v2220_v29, %v487_v25  ;;  %v984_v34 = vadd.f32 %v2268_v30, %v503_v27 }
 0x14d   : > { %v2222_v36 = vpop.f32.mrf.mxu0  ;;  %v2270_v38 = vpop.f32.mrf.mxu1 }
 0x14e   : > { %1001 = vst.msk [vmem:[#allocation2 + $0x38] sm:$0xff] %vm993_vm1, %v968_v33  ;;  %1017 = vst.msk [vmem:[#allocation2 + $0xb8] sm:$0xff] %vm993_vm1, %v984_v34  ;;  %v2223_v39 = vadd.f32 %v2222_v36, %v2221_v31  ;;  %v2271_v40 = vadd.f32 %v2270_v38, %v2269_v32  ;;  %v494_v31 = vld [vmem:[#allocation2 + $0x70] sm:$0xff] }
 0x14f   : > { %v2224_v41 = vpop.f32.mrf.mxu0  ;;  %v2272_v42 = vpop.f32.mrf.mxu1  ;;  %v510_v33 = vld [vmem:[#allocation2 + $0xf0] sm:$0xff] }
 0x150   : > { %v969_v43 = vadd.f32 %v2223_v39, %v488_v35  ;;  %v985_v44 = vadd.f32 %v2271_v40, %v504_v37 }
 0x151   : > { %v2225_v46 = vpop.f32.mrf.mxu0  ;;  %v2273_v48 = vpop.f32.mrf.mxu1 }
 0x152   : > { %1002 = vst.msk [vmem:[#allocation2 + $0x40] sm:$0xff] %vm993_vm1, %v969_v43  ;;  %1018 = vst.msk [vmem:[#allocation2 + $0xc0] sm:$0xff] %vm993_vm1, %v985_v44  ;;  %v2226_v49 = vadd.f32 %v2225_v46, %v2224_v41  ;;  %v2274_v50 = vadd.f32 %v2273_v48, %v2272_v42  ;;  %v495_v41 = vld [vmem:[#allocation2 + $0x78] sm:$0xff] }
 0x153   : > { %v2227_v51 = vpop.f32.mrf.mxu0  ;;  %v2275_v52 = vpop.f32.mrf.mxu1  ;;  %v511_v43 = vld [vmem:[#allocation2 + $0xf8] sm:$0xff] }
 0x154   : > { %v970_v53 = vadd.f32 %v2226_v49, %v489_v45  ;;  %v986_v54 = vadd.f32 %v2274_v50, %v505_v47 }
 0x155   : > { %v2228_v56 = vpop.f32.mrf.mxu0  ;;  %v2276_v58 = vpop.f32.mrf.mxu1 }
 0x156   : > { %1003 = vst.msk [vmem:[#allocation2 + $0x48] sm:$0xff] %vm993_vm1, %v970_v53  ;;  %1019 = vst.msk [vmem:[#allocation2 + $0xc8] sm:$0xff] %vm993_vm1, %v986_v54  ;;  %v2229_v59 = vadd.f32 %v2228_v56, %v2227_v51  ;;  %v2277_v60 = vadd.f32 %v2276_v58, %v2275_v52 }
 0x157   : > { %v2230_v61 = vpop.f32.mrf.mxu0  ;;  %v2278_v62 = vpop.f32.mrf.mxu1 }
 0x158   : > { %v971_v63 = vadd.f32 %v2229_v59, %v490_v55  ;;  %v987_v0 = vadd.f32 %v2277_v60, %v506_v57 }
 0x159   : > { %v2231_v2 = vpop.f32.mrf.mxu0  ;;  %v2279_v4 = vpop.f32.mrf.mxu1 }
 0x15a   : > { %1004 = vst.msk [vmem:[#allocation2 + $0x50] sm:$0xff] %vm993_vm1, %v971_v63  ;;  %1020 = vst.msk [vmem:[#allocation2 + $0xd0] sm:$0xff] %vm993_vm1, %v987_v0  ;;  %v2232_v5 = vadd.f32 %v2231_v2, %v2230_v61  ;;  %v2280_v6 = vadd.f32 %v2279_v4, %v2278_v62 }
 0x15b   : > { %v2233_v7 = vpop.f32.mrf.mxu0  ;;  %v2281_v8 = vpop.f32.mrf.mxu1 }
 0x15c   : > { %v972_v9 = vadd.f32 %v2232_v5, %v491_v1  ;;  %v988_v10 = vadd.f32 %v2280_v6, %v507_v3 }
 0x15d   : > { %v2234_v12 = vpop.f32.mrf.mxu0  ;;  %v2282_v14 = vpop.f32.mrf.mxu1 }
 0x15e   : > { %1005 = vst.msk [vmem:[#allocation2 + $0x58] sm:$0xff] %vm993_vm1, %v972_v9  ;;  %1021 = vst.msk [vmem:[#allocation2 + $0xd8] sm:$0xff] %vm993_vm1, %v988_v10  ;;  %v2235_v15 = vadd.f32 %v2234_v12, %v2233_v7  ;;  %v2283_v16 = vadd.f32 %v2282_v14, %v2281_v8 }
 0x15f   : > { %v2236_v17 = vpop.f32.mrf.mxu0  ;;  %v2284_v18 = vpop.f32.mrf.mxu1 }
 0x160   : > { %v973_v19 = vadd.f32 %v2235_v15, %v492_v11  ;;  %v989_v20 = vadd.f32 %v2283_v16, %v508_v13 }
 0x161   : > { %v2237_v22 = vpop.f32.mrf.mxu0  ;;  %v2285_v24 = vpop.f32.mrf.mxu1 }
 0x162   : > { %1006 = vst.msk [vmem:[#allocation2 + $0x60] sm:$0xff] %vm993_vm1, %v973_v19  ;;  %1022 = vst.msk [vmem:[#allocation2 + $0xe0] sm:$0xff] %vm993_vm1, %v989_v20  ;;  %v2238_v25 = vadd.f32 %v2237_v22, %v2236_v17  ;;  %v2286_v26 = vadd.f32 %v2285_v24, %v2284_v18 }
 0x163   : > { %v2239_v27 = vpop.f32.mrf.mxu0  ;;  %v2287_v28 = vpop.f32.mrf.mxu1 }
 0x164   : > { %v974_v29 = vadd.f32 %v2238_v25, %v493_v21  ;;  %v990_v30 = vadd.f32 %v2286_v26, %v509_v23 }
 0x165   : > { %v2240_v32 = vpop.f32.mrf.mxu0  ;;  %v2288_v34 = vpop.f32.mrf.mxu1 }
 0x166   : > { %1007 = vst.msk [vmem:[#allocation2 + $0x68] sm:$0xff] %vm993_vm1, %v974_v29  ;;  %1023 = vst.msk [vmem:[#allocation2 + $0xe8] sm:$0xff] %vm993_vm1, %v990_v30  ;;  %v2241_v35 = vadd.f32 %v2240_v32, %v2239_v27  ;;  %v2289_v36 = vadd.f32 %v2288_v34, %v2287_v28 }
 0x167   : > { %v2242_v37 = vpop.f32.mrf.mxu0  ;;  %v2290_v38 = vpop.f32.mrf.mxu1 }
 0x168   : > { %v975_v39 = vadd.f32 %v2241_v35, %v494_v31  ;;  %v991_v40 = vadd.f32 %v2289_v36, %v510_v33 }
 0x169   : > { %v2243_v42 = vpop.f32.mrf.mxu0  ;;  %v2291_v44 = vpop.f32.mrf.mxu1 }
 0x16a   : > { %1008 = vst.msk [vmem:[#allocation2 + $0x70] sm:$0xff] %vm993_vm1, %v975_v39  ;;  %1024 = vst.msk [vmem:[#allocation2 + $0xf0] sm:$0xff] %vm993_vm1, %v991_v40  ;;  %v2244_v45 = vadd.f32 %v2243_v42, %v2242_v37  ;;  %v2292_v46 = vadd.f32 %v2291_v44, %v2290_v38  ;;  %1029 = sbr.rel (%p2054_p12) target bundleno = 649 (0x289), region = 86 }
 0x16c   : > { %v976_v47 = vadd.f32 %v2244_v45, %v495_v41  ;;  %v992_v48 = vadd.f32 %v2292_v46, %v511_v43 }
 0x16e   : > { %1009 = vst.msk [vmem:[#allocation2 + $0x78] sm:$0xff] %vm993_vm1, %v976_v47  ;;  %1025 = vst.msk [vmem:[#allocation2 + $0xf8] sm:$0xff] %vm993_vm1, %v992_v48 }
 0x16f   : > { %v2550_v49 = vld [vmem:[%s3123_s3 + $0x18] sm:$0xff]   ;;  %v2552_v51 = vld [vmem:[%s3123_s3 + $0x10] sm:$0xff]   ;;  %v2554_v53 = vld [vmem:[%s3123_s3 + $0x8] sm:$0xff]   ;;  %vm1876_vm2 = vcmask 519168  }
 0x170   : > { %v2551_v50 = vld [vmem:[%s3122_s2 + $0x18] sm:$0xff]   ;;  %2333 = vmatprep.subr.bf16.mxu0 %v2550_v49  ;;  %v2553_v52 = vld [vmem:[%s3122_s2 + $0x10] sm:$0xff]   ;;  %v2555_v54 = vld [vmem:[%s3122_s2 + $0x8] sm:$0xff]  }
 0x171   : > { %2373 = vmatprep.subr.bf16.mxu1 %v2551_v50  ;;  %2334 = vmatpush3.bf16.msra.mxu0 %v2550_v49  ;;  %v2556_v55 = vld [vmem:[%s3123_s3] sm:$0xff]   ;;  %v1068_v59 = vld [vmem:[#allocation2 + $0x8] sm:$0xff]  ;;  %v1069_v61 = vld [vmem:[#allocation2 + $0x10] sm:$0xff] }
 0x172   : > { %2374 = vmatpush3.bf16.msra.mxu1 %v2551_v50  ;;  %2335 = vmatprep.subr.bf16.mxu0 %v2552_v51  ;;  %v2557_v56 = vld [vmem:[%s3122_s2] sm:$0xff]   ;;  %v1070_v62 = vld [vmem:[#allocation2 + $0x18] sm:$0xff]  ;;  %v1072_v0 = vld [vmem:[#allocation2 + $0x28] sm:$0xff] }
 0x173   : > { %2375 = vmatprep.subr.bf16.mxu1 %v2553_v52  ;;  %v2558_v57 = vld [vmem:[%s2942_s15] sm:$0xff]   ;;  %v2559_v1 = vld [vmem:[%s2942_s15 + $0x8] sm:$0xff]   ;;  %v1100_v2 = vpack.c.bf16 %v1070_v62, %v1069_v61  ;;  %v2560_v3 = vld [vmem:[%s2942_s15 + $0x10] sm:$0xff]  }
 0x174   : > { %v1067_v58 = vld [vmem:[#allocation2] sm:$0xff]  ;;  %2341 = vmatprep.mubr.msk.bf16.mxu0 %vm993_vm1, %v2558_v57  ;;  %v1073_v5 = vld [vmem:[#allocation2 + $0x30] sm:$0xff]  ;;  %v1074_v6 = vld [vmem:[#allocation2 + $0x38] sm:$0xff] }
 0x175   : > { %2336 = vmatpush3.bf16.msra.mxu0 %v2552_v51  ;;  %v1099_v60 = vpack.c.bf16 %v1068_v59, %v1067_v58  ;;  %v1071_v63 = vld [vmem:[#allocation2 + $0x20] sm:$0xff]  ;;  %v1076_v8 = vld [vmem:[#allocation2 + $0x48] sm:$0xff]  ;;  %v2561_v9 = vld [vmem:[%s2942_s15 + $0x18] sm:$0xff]   ;;  %v1102_v10 = vpack.c.bf16 %v1074_v6, %v1073_v5 }
 0x176   : > { %2376 = vmatpush3.bf16.msra.mxu1 %v2553_v52  ;;  %2337 = vmatprep.subr.bf16.mxu0 %v2554_v53  ;;  %v1101_v4 = vpack.c.bf16 %v1072_v0, %v1071_v63  ;;  %v1075_v7 = vld [vmem:[#allocation2 + $0x40] sm:$0xff]  ;;  %v1077_v13 = vld [vmem:[#allocation2 + $0x50] sm:$0xff]  ;;  %v1078_v14 = vld [vmem:[#allocation2 + $0x58] sm:$0xff] }
 0x177   : > { %2377 = vmatprep.subr.bf16.mxu1 %v2555_v54  ;;  %2381 = vmatprep.mubr.msk.bf16.mxu1 %vm993_vm1, %v1099_v60  ;;  %v2562_v11 = vld [vmem:[%s2942_s15 + $0x20] sm:$0xff]   ;;  %v1103_v12 = vpack.c.bf16 %v1076_v8, %v1075_v7  ;;  %v1080_v16 = vld [vmem:[#allocation2 + $0x68] sm:$0xff]  ;;  %v1104_v18 = vpack.c.bf16 %v1078_v14, %v1077_v13  ;;  %v2564_v19 = vld [vmem:[%s2942_s15 + $0x30] sm:$0xff]  }
 0x178   : > { %v1079_v15 = vld [vmem:[#allocation2 + $0x60] sm:$0xff]  ;;  %v2563_v17 = vld [vmem:[%s2942_s15 + $0x28] sm:$0xff]   ;;  %v1081_v21 = vld [vmem:[#allocation2 + $0x70] sm:$0xff] }
 0x179   : > { %2338 = vmatpush3.bf16.msra.mxu0 %v2554_v53  ;;  %v1105_v20 = vpack.c.bf16 %v1080_v16, %v1079_v15  ;;  %v1082_v22 = vld [vmem:[#allocation2 + $0x78] sm:$0xff]  ;;  %v1083_v23 = vld [vmem:[#allocation2 + $0x80] sm:$0xff]  ;;  %v1084_v24 = vld [vmem:[#allocation2 + $0x88] sm:$0xff] }
 0x17a   : > { %2378 = vmatpush3.bf16.msra.mxu1 %v2555_v54  ;;  %2339 = vmatprep.subr.bf16.mxu0 %v2556_v55  ;;  %v2565_v25 = vld [vmem:[%s2942_s15 + $0x38] sm:$0xff]   ;;  %v1106_v26 = vpack.c.bf16 %v1082_v22, %v1081_v21  ;;  %v2566_v27 = vld [vmem:[%s2942_s15 + $0x40] sm:$0xff]   ;;  %v1107_v28 = vpack.c.bf16 %v1084_v24, %v1083_v23  ;;  %v1085_v29 = vld [vmem:[#allocation2 + $0x90] sm:$0xff] }
 0x17b   : > { %2379 = vmatprep.subr.bf16.mxu1 %v2557_v56  ;;  %v1086_v30 = vld [vmem:[#allocation2 + $0x98] sm:$0xff]  ;;  %v1087_v31 = vld [vmem:[#allocation2 + $0xa0] sm:$0xff]  ;;  %v1088_v32 = vld [vmem:[#allocation2 + $0xa8] sm:$0xff] }
 0x17c   : > { %v2567_v33 = vld [vmem:[%s2942_s15 + $0x48] sm:$0xff]   ;;  %v1108_v34 = vpack.c.bf16 %v1086_v30, %v1085_v29  ;;  %v2568_v35 = vld [vmem:[%s2942_s15 + $0x50] sm:$0xff]   ;;  %v1109_v36 = vpack.c.bf16 %v1088_v32, %v1087_v31  ;;  %v1090_v38 = vld [vmem:[#allocation2 + $0xb8] sm:$0xff] }
 0x17d   : > { %2340 = vmatpush3.bf16.msra.mxu0 %v2556_v55  ;;  %v1089_v37 = vld [vmem:[#allocation2 + $0xb0] sm:$0xff]  ;;  %v1091_v39 = vld [vmem:[#allocation2 + $0xc0] sm:$0xff]  ;;  %v1092_v40 = vld [vmem:[#allocation2 + $0xc8] sm:$0xff] }
 0x17e   : > { %2380 = vmatpush3.bf16.msra.mxu1 %v2557_v56  ;;  %v2569_v41 = vld [vmem:[%s2942_s15 + $0x58] sm:$0xff]   ;;  %v1110_v42 = vpack.c.bf16 %v1090_v38, %v1089_v37  ;;  %v2570_v43 = vld [vmem:[%s2942_s15 + $0x60] sm:$0xff]   ;;  %v1111_v44 = vpack.c.bf16 %v1092_v40, %v1091_v39  ;;  %v1093_v45 = vld [vmem:[#allocation2 + $0xd0] sm:$0xff] }
 0x17f   : > { %v1094_v46 = vld [vmem:[#allocation2 + $0xd8] sm:$0xff]  ;;  %v1095_v47 = vld [vmem:[#allocation2 + $0xe0] sm:$0xff]  ;;  %v1096_v48 = vld [vmem:[#allocation2 + $0xe8] sm:$0xff] }
 0x180   : > { %2342 = vmatmul.mubr.msk.bf16.vlgmr.msra.gmra.mxu0 %vm993_vm1, %v2559_v1  ;;  %v2571_v49 = vld [vmem:[%s2942_s15 + $0x68] sm:$0xff]   ;;  %v1112_v50 = vpack.c.bf16 %v1094_v46, %v1093_v45  ;;  %v2572_v51 = vld [vmem:[%s2942_s15 + $0x70] sm:$0xff]   ;;  %v1113_v52 = vpack.c.bf16 %v1096_v48, %v1095_v47  ;;  %v1098_v54 = vld [vmem:[#allocation2 + $0xf8] sm:$0xff] }
 0x181   : > { %2382 = vmatmul.mubr.msk.bf16.vlgmr.msra.gmra.mxu1 %vm993_vm1, %v1100_v2  ;;  %2345 = vmatprep.mubr.msk.bf16.mxu0 %vm993_vm1, %v2560_v3  ;;  %v1097_v53 = vld [vmem:[#allocation2 + $0xf0] sm:$0xff]  ;;  %v2573_v55 = vld [vmem:[%s2942_s15 + $0x78] sm:$0xff]   ;;  %v3001_v59 = vld [vmem:[%s3124_s4] ss:$0 sm:$0xff] }
 0x182   : > { %2385 = vmatprep.mubr.msk.bf16.mxu1 %vm993_vm1, %v1101_v4  ;;  %v1114_v56 = vpack.c.bf16 %v1098_v54, %v1097_v53 }
 0x188   : > { %2346 = vmatmul.mubr.msk.bf16.gmra.mxu0 %vm993_vm1, %v2561_v9 }
 0x189   : > { %2386 = vmatmul.mubr.msk.bf16.gmra.mxu1 %vm993_vm1, %v1102_v10  ;;  %2349 = vmatprep.mubr.msk.bf16.mxu0 %vm993_vm1, %v2562_v11 }
 0x18a   : > { %2389 = vmatprep.mubr.msk.bf16.mxu1 %vm993_vm1, %v1103_v12 }
 0x190   : > { %2350 = vmatmul.mubr.msk.bf16.gmra.mxu0 %vm993_vm1, %v2563_v17 }
 0x191   : > { %2390 = vmatmul.mubr.msk.bf16.gmra.mxu1 %vm993_vm1, %v1104_v18  ;;  %2353 = vmatprep.mubr.msk.bf16.mxu0 %vm993_vm1, %v2564_v19 }
 0x192   : > { %2393 = vmatprep.mubr.msk.bf16.mxu1 %vm993_vm1, %v1105_v20 }
 0x198   : > { %2354 = vmatmul.mubr.msk.bf16.gmra.mxu0 %vm993_vm1, %v2565_v25 }
 0x199   : > { %2394 = vmatmul.mubr.msk.bf16.gmra.mxu1 %vm993_vm1, %v1106_v26  ;;  %2357 = vmatprep.mubr.msk.bf16.mxu0 %vm993_vm1, %v2566_v27 }
 0x19a   : > { %2397 = vmatprep.mubr.msk.bf16.mxu1 %vm993_vm1, %v1107_v28 }
 0x1a0   : > { %2358 = vmatmul.mubr.msk.bf16.gmra.mxu0 %vm993_vm1, %v2567_v33 }
 0x1a1   : > { %2398 = vmatmul.mubr.msk.bf16.gmra.mxu1 %vm993_vm1, %v1108_v34  ;;  %2361 = vmatprep.mubr.msk.bf16.mxu0 %vm993_vm1, %v2568_v35 }
 0x1a2   : > { %2401 = vmatprep.mubr.msk.bf16.mxu1 %vm993_vm1, %v1109_v36 }
 0x1a8   : > { %2362 = vmatmul.mubr.msk.bf16.gmra.mxu0 %vm993_vm1, %v2569_v41 }
 0x1a9   : > { %2402 = vmatmul.mubr.msk.bf16.gmra.mxu1 %vm993_vm1, %v1110_v42  ;;  %2365 = vmatprep.mubr.msk.bf16.mxu0 %vm993_vm1, %v2570_v43 }
 0x1aa   : > { %2405 = vmatprep.mubr.msk.bf16.mxu1 %vm993_vm1, %v1111_v44 }
 0x1b0   : > { %2366 = vmatmul.mubr.msk.bf16.gmra.mxu0 %vm993_vm1, %v2571_v49 }
 0x1b1   : > { %2406 = vmatmul.mubr.msk.bf16.gmra.mxu1 %vm993_vm1, %v1112_v50  ;;  %2369 = vmatprep.mubr.msk.bf16.mxu0 %vm993_vm1, %v2572_v51 }
 0x1b2   : > { %2409 = vmatprep.mubr.msk.bf16.mxu1 %vm993_vm1, %v1113_v52 }
 0x1b8   : > { %2370 = vmatmul.mubr.msk.bf16.gmra.mxu0 %vm993_vm1, %v2573_v55 }
 0x1b9   : > { %2410 = vmatmul.mubr.msk.bf16.gmra.mxu1 %vm993_vm1, %v1114_v56 }
 0x240   : > { %v2343_v57 = vpop.f32.mrf.mxu0 }
 0x241   : > { %v2383_v58 = vpop.f32.mrf.mxu1 }
 0x242   : > { %v1559_v60 = vadd.f32 %v2383_v58, %v2343_v57  ;;  %v1317_v61 = vpop.f32.mrf.mxu0 }
 0x243   : > { %v1550_v62 = vpop.f32.mrf.mxu1 }
 0x244   : > { %v1686_v63 = vadd.f32 %v3001_v59, %v1559_v60  ;;  %v1551_v0 = vadd.f32 %v1550_v62, %v1317_v61  ;;  %v2344_v1 = vpop.f32.mrf.mxu0 }
 0x245   : > { %v2384_v2 = vpop.f32.mrf.mxu1 }
 0x246   : > { %v1718_v3 = vmax.f32 %v1686_v63, 0.0  ;;  %v1684_v4 = vadd.f32 %v3001_v59, %v1551_v0  ;;  %v1562_v5 = vadd.f32 %v2384_v2, %v2344_v1  ;;  %v1320_v6 = vpop.f32.mrf.mxu0 }
 0x247   : > { %v1553_v7 = vpop.f32.mrf.mxu1 }
 0x248   : > { %v2151_v8 = vpack.c.bf16 %v1718_v3, %v1718_v3  ;;  %v1716_v9 = vmax.f32 %v1684_v4, 0.0  ;;  %v1687_v10 = vadd.f32 %v3001_v59, %v1562_v5  ;;  %v1554_v11 = vadd.f32 %v1553_v7, %v1320_v6  ;;  %v2347_v12 = vpop.f32.mrf.mxu0 }
 0x249   : > { %v2387_v13 = vpop.f32.mrf.mxu1 }
 0x24a   : > { %1879 = vst.msk [vmem:[%s2796_s8 + $0x8] sm:$0xf] %vm1876_vm2, %v2151_v8  ;;  %v2149_v14 = vpack.c.bf16 %v1716_v9, %v1716_v9  ;;  %v1719_v15 = vmax.f32 %v1687_v10, 0.0  ;;  %v1685_v16 = vadd.f32 %v3001_v59, %v1554_v11  ;;  %v1575_v17 = vadd.f32 %v2387_v13, %v2347_v12  ;;  %v1333_v18 = vpop.f32.mrf.mxu0 }
 0x24b   : > { %v1566_v19 = vpop.f32.mrf.mxu1 }
 0x24c   : > { %1877 = vst.msk [vmem:[%s2796_s8] sm:$0xf] %vm1876_vm2, %v2149_v14  ;;  %v2152_v20 = vpack.c.bf16 %v1719_v15, %v1719_v15  ;;  %v1717_v21 = vmax.f32 %v1685_v16, 0.0  ;;  %v1690_v22 = vadd.f32 %v3001_v59, %v1575_v17  ;;  %v1567_v23 = vadd.f32 %v1566_v19, %v1333_v18  ;;  %v2348_v24 = vpop.f32.mrf.mxu0 }
 0x24d   : > { %v2388_v25 = vpop.f32.mrf.mxu1 }
 0x24e   : > { %1880 = vst.msk [vmem:[%s2796_s8 + $0xc] sm:$0xf] %vm1876_vm2, %v2152_v20  ;;  %v2150_v26 = vpack.c.bf16 %v1717_v21, %v1717_v21  ;;  %v1722_v27 = vmax.f32 %v1690_v22, 0.0  ;;  %v1688_v28 = vadd.f32 %v3001_v59, %v1567_v23  ;;  %v1578_v29 = vadd.f32 %v2388_v25, %v2348_v24  ;;  %v1336_v30 = vpop.f32.mrf.mxu0 }
 0x24f   : > { %v1569_v31 = vpop.f32.mrf.mxu1 }
 0x250   : > { %1878 = vst.msk [vmem:[%s2796_s8 + $0x4] sm:$0xf] %vm1876_vm2, %v2150_v26  ;;  %v2155_v32 = vpack.c.bf16 %v1722_v27, %v1722_v27  ;;  %v1720_v33 = vmax.f32 %v1688_v28, 0.0  ;;  %v1691_v34 = vadd.f32 %v3001_v59, %v1578_v29  ;;  %v1570_v35 = vadd.f32 %v1569_v31, %v1336_v30  ;;  %v2351_v36 = vpop.f32.mrf.mxu0 }
 0x251   : > { %v2391_v37 = vpop.f32.mrf.mxu1 }
 0x252   : > { %1883 = vst.msk [vmem:[%s2796_s8 + $0x18] sm:$0xf] %vm1876_vm2, %v2155_v32  ;;  %v2153_v38 = vpack.c.bf16 %v1720_v33, %v1720_v33  ;;  %v1723_v39 = vmax.f32 %v1691_v34, 0.0  ;;  %v1689_v40 = vadd.f32 %v3001_v59, %v1570_v35  ;;  %v1591_v41 = vadd.f32 %v2391_v37, %v2351_v36  ;;  %v1349_v42 = vpop.f32.mrf.mxu0 }
 0x253   : > { %v1582_v43 = vpop.f32.mrf.mxu1 }
 0x254   : > { %1881 = vst.msk [vmem:[%s2796_s8 + $0x10] sm:$0xf] %vm1876_vm2, %v2153_v38  ;;  %v2156_v44 = vpack.c.bf16 %v1723_v39, %v1723_v39  ;;  %v1721_v45 = vmax.f32 %v1689_v40, 0.0  ;;  %v1694_v46 = vadd.f32 %v3001_v59, %v1591_v41  ;;  %v1583_v47 = vadd.f32 %v1582_v43, %v1349_v42  ;;  %v2352_v48 = vpop.f32.mrf.mxu0 }
 0x255   : > { %v2392_v49 = vpop.f32.mrf.mxu1 }
 0x256   : > { %1884 = vst.msk [vmem:[%s2796_s8 + $0x1c] sm:$0xf] %vm1876_vm2, %v2156_v44  ;;  %v2154_v50 = vpack.c.bf16 %v1721_v45, %v1721_v45  ;;  %v1726_v51 = vmax.f32 %v1694_v46, 0.0  ;;  %v1692_v52 = vadd.f32 %v3001_v59, %v1583_v47  ;;  %v1594_v53 = vadd.f32 %v2392_v49, %v2352_v48  ;;  %v1352_v54 = vpop.f32.mrf.mxu0 }
 0x257   : > { %v1585_v55 = vpop.f32.mrf.mxu1 }
 0x258   : > { %1882 = vst.msk [vmem:[%s2796_s8 + $0x14] sm:$0xf] %vm1876_vm2, %v2154_v50  ;;  %v2159_v56 = vpack.c.bf16 %v1726_v51, %v1726_v51  ;;  %v1724_v57 = vmax.f32 %v1692_v52, 0.0  ;;  %v1695_v58 = vadd.f32 %v3001_v59, %v1594_v53  ;;  %v1586_v60 = vadd.f32 %v1585_v55, %v1352_v54  ;;  %v2355_v61 = vpop.f32.mrf.mxu0 }
 0x259   : > { %v2395_v62 = vpop.f32.mrf.mxu1 }
 0x25a   : > { %1887 = vst.msk [vmem:[%s2796_s8 + $0x28] sm:$0xf] %vm1876_vm2, %v2159_v56  ;;  %v2157_v63 = vpack.c.bf16 %v1724_v57, %v1724_v57  ;;  %v1727_v0 = vmax.f32 %v1695_v58, 0.0  ;;  %v1693_v1 = vadd.f32 %v3001_v59, %v1586_v60  ;;  %v1607_v2 = vadd.f32 %v2395_v62, %v2355_v61  ;;  %v1365_v3 = vpop.f32.mrf.mxu0 }
 0x25b   : > { %v1598_v4 = vpop.f32.mrf.mxu1 }
 0x25c   : > { %1885 = vst.msk [vmem:[%s2796_s8 + $0x20] sm:$0xf] %vm1876_vm2, %v2157_v63  ;;  %v2160_v5 = vpack.c.bf16 %v1727_v0, %v1727_v0  ;;  %v1725_v6 = vmax.f32 %v1693_v1, 0.0  ;;  %v1698_v7 = vadd.f32 %v3001_v59, %v1607_v2  ;;  %v1599_v8 = vadd.f32 %v1598_v4, %v1365_v3  ;;  %v2356_v9 = vpop.f32.mrf.mxu0 }
 0x25d   : > { %v2396_v10 = vpop.f32.mrf.mxu1 }
 0x25e   : > { %1888 = vst.msk [vmem:[%s2796_s8 + $0x2c] sm:$0xf] %vm1876_vm2, %v2160_v5  ;;  %v2158_v11 = vpack.c.bf16 %v1725_v6, %v1725_v6  ;;  %v1730_v12 = vmax.f32 %v1698_v7, 0.0  ;;  %v1696_v13 = vadd.f32 %v3001_v59, %v1599_v8  ;;  %v1610_v14 = vadd.f32 %v2396_v10, %v2356_v9  ;;  %v1368_v15 = vpop.f32.mrf.mxu0 }
 0x25f   : > { %v1601_v16 = vpop.f32.mrf.mxu1 }
 0x260   : > { %1886 = vst.msk [vmem:[%s2796_s8 + $0x24] sm:$0xf] %vm1876_vm2, %v2158_v11  ;;  %v2163_v17 = vpack.c.bf16 %v1730_v12, %v1730_v12  ;;  %v1728_v18 = vmax.f32 %v1696_v13, 0.0  ;;  %v1699_v19 = vadd.f32 %v3001_v59, %v1610_v14  ;;  %v1602_v20 = vadd.f32 %v1601_v16, %v1368_v15  ;;  %v2359_v21 = vpop.f32.mrf.mxu0 }
 0x261   : > { %v2399_v22 = vpop.f32.mrf.mxu1 }
 0x262   : > { %1891 = vst.msk [vmem:[%s2796_s8 + $0x38] sm:$0xf] %vm1876_vm2, %v2163_v17  ;;  %v2161_v23 = vpack.c.bf16 %v1728_v18, %v1728_v18  ;;  %v1731_v24 = vmax.f32 %v1699_v19, 0.0  ;;  %v1697_v25 = vadd.f32 %v3001_v59, %v1602_v20  ;;  %v1623_v26 = vadd.f32 %v2399_v22, %v2359_v21  ;;  %v1381_v27 = vpop.f32.mrf.mxu0 }
 0x263   : > { %v1614_v28 = vpop.f32.mrf.mxu1 }
 0x264   : > { %1889 = vst.msk [vmem:[%s2796_s8 + $0x30] sm:$0xf] %vm1876_vm2, %v2161_v23  ;;  %v2164_v29 = vpack.c.bf16 %v1731_v24, %v1731_v24  ;;  %v1729_v30 = vmax.f32 %v1697_v25, 0.0  ;;  %v1702_v31 = vadd.f32 %v3001_v59, %v1623_v26  ;;  %v1615_v32 = vadd.f32 %v1614_v28, %v1381_v27  ;;  %v2360_v33 = vpop.f32.mrf.mxu0 }
 0x265   : > { %v2400_v34 = vpop.f32.mrf.mxu1 }
 0x266   : > { %1892 = vst.msk [vmem:[%s2796_s8 + $0x3c] sm:$0xf] %vm1876_vm2, %v2164_v29  ;;  %v2162_v35 = vpack.c.bf16 %v1729_v30, %v1729_v30  ;;  %v1734_v36 = vmax.f32 %v1702_v31, 0.0  ;;  %v1700_v37 = vadd.f32 %v3001_v59, %v1615_v32  ;;  %v1626_v38 = vadd.f32 %v2400_v34, %v2360_v33  ;;  %v1384_v39 = vpop.f32.mrf.mxu0 }
 0x267   : > { %v1617_v40 = vpop.f32.mrf.mxu1 }
 0x268   : > { %1890 = vst.msk [vmem:[%s2796_s8 + $0x34] sm:$0xf] %vm1876_vm2, %v2162_v35  ;;  %v2167_v41 = vpack.c.bf16 %v1734_v36, %v1734_v36  ;;  %v1732_v42 = vmax.f32 %v1700_v37, 0.0  ;;  %v1703_v43 = vadd.f32 %v3001_v59, %v1626_v38  ;;  %v1618_v44 = vadd.f32 %v1617_v40, %v1384_v39  ;;  %v2363_v45 = vpop.f32.mrf.mxu0 }
 0x269   : > { %v2403_v46 = vpop.f32.mrf.mxu1 }
 0x26a   : > { %1895 = vst.msk [vmem:[%s2796_s8 + $0x48] sm:$0xf] %vm1876_vm2, %v2167_v41  ;;  %v2165_v47 = vpack.c.bf16 %v1732_v42, %v1732_v42  ;;  %v1735_v48 = vmax.f32 %v1703_v43, 0.0  ;;  %v1701_v49 = vadd.f32 %v3001_v59, %v1618_v44  ;;  %v1639_v50 = vadd.f32 %v2403_v46, %v2363_v45  ;;  %v1397_v51 = vpop.f32.mrf.mxu0 }
 0x26b   : > { %v1630_v52 = vpop.f32.mrf.mxu1 }
 0x26c   : > { %1893 = vst.msk [vmem:[%s2796_s8 + $0x40] sm:$0xf] %vm1876_vm2, %v2165_v47  ;;  %v2168_v53 = vpack.c.bf16 %v1735_v48, %v1735_v48  ;;  %v1733_v54 = vmax.f32 %v1701_v49, 0.0  ;;  %v1706_v55 = vadd.f32 %v3001_v59, %v1639_v50  ;;  %v1631_v56 = vadd.f32 %v1630_v52, %v1397_v51  ;;  %v2364_v57 = vpop.f32.mrf.mxu0 }
 0x26d   : > { %v2404_v58 = vpop.f32.mrf.mxu1 }
 0x26e   : > { %1896 = vst.msk [vmem:[%s2796_s8 + $0x4c] sm:$0xf] %vm1876_vm2, %v2168_v53  ;;  %v2166_v60 = vpack.c.bf16 %v1733_v54, %v1733_v54  ;;  %v1738_v61 = vmax.f32 %v1706_v55, 0.0  ;;  %v1704_v62 = vadd.f32 %v3001_v59, %v1631_v56  ;;  %v1642_v63 = vadd.f32 %v2404_v58, %v2364_v57  ;;  %v1400_v0 = vpop.f32.mrf.mxu0 }
 0x26f   : > { %v1633_v1 = vpop.f32.mrf.mxu1 }
 0x270   : > { %1894 = vst.msk [vmem:[%s2796_s8 + $0x44] sm:$0xf] %vm1876_vm2, %v2166_v60  ;;  %v2171_v2 = vpack.c.bf16 %v1738_v61, %v1738_v61  ;;  %v1736_v3 = vmax.f32 %v1704_v62, 0.0  ;;  %v1707_v4 = vadd.f32 %v3001_v59, %v1642_v63  ;;  %v1634_v5 = vadd.f32 %v1633_v1, %v1400_v0  ;;  %v2367_v6 = vpop.f32.mrf.mxu0 }
 0x271   : > { %v2407_v7 = vpop.f32.mrf.mxu1 }
 0x272   : > { %1899 = vst.msk [vmem:[%s2796_s8 + $0x58] sm:$0xf] %vm1876_vm2, %v2171_v2  ;;  %v2169_v8 = vpack.c.bf16 %v1736_v3, %v1736_v3  ;;  %v1739_v9 = vmax.f32 %v1707_v4, 0.0  ;;  %v1705_v10 = vadd.f32 %v3001_v59, %v1634_v5  ;;  %v1655_v11 = vadd.f32 %v2407_v7, %v2367_v6  ;;  %v1413_v12 = vpop.f32.mrf.mxu0 }
 0x273   : > { %v1646_v13 = vpop.f32.mrf.mxu1 }
 0x274   : > { %1897 = vst.msk [vmem:[%s2796_s8 + $0x50] sm:$0xf] %vm1876_vm2, %v2169_v8  ;;  %v2172_v14 = vpack.c.bf16 %v1739_v9, %v1739_v9  ;;  %v1737_v15 = vmax.f32 %v1705_v10, 0.0  ;;  %v1710_v16 = vadd.f32 %v3001_v59, %v1655_v11  ;;  %v1647_v17 = vadd.f32 %v1646_v13, %v1413_v12  ;;  %v2368_v18 = vpop.f32.mrf.mxu0 }
 0x275   : > { %v2408_v19 = vpop.f32.mrf.mxu1 }
 0x276   : > { %1900 = vst.msk [vmem:[%s2796_s8 + $0x5c] sm:$0xf] %vm1876_vm2, %v2172_v14  ;;  %v2170_v20 = vpack.c.bf16 %v1737_v15, %v1737_v15  ;;  %v1742_v21 = vmax.f32 %v1710_v16, 0.0  ;;  %v1708_v22 = vadd.f32 %v3001_v59, %v1647_v17  ;;  %v1658_v23 = vadd.f32 %v2408_v19, %v2368_v18  ;;  %v1416_v24 = vpop.f32.mrf.mxu0 }
 0x277   : > { %v1649_v25 = vpop.f32.mrf.mxu1 }
 0x278   : > { %1898 = vst.msk [vmem:[%s2796_s8 + $0x54] sm:$0xf] %vm1876_vm2, %v2170_v20  ;;  %v2175_v26 = vpack.c.bf16 %v1742_v21, %v1742_v21  ;;  %v1740_v27 = vmax.f32 %v1708_v22, 0.0  ;;  %v1711_v28 = vadd.f32 %v3001_v59, %v1658_v23  ;;  %v1650_v29 = vadd.f32 %v1649_v25, %v1416_v24  ;;  %v2371_v30 = vpop.f32.mrf.mxu0 }
 0x279   : > { %v2411_v31 = vpop.f32.mrf.mxu1 }
 0x27a   : > { %1903 = vst.msk [vmem:[%s2796_s8 + $0x68] sm:$0xf] %vm1876_vm2, %v2175_v26  ;;  %v2173_v32 = vpack.c.bf16 %v1740_v27, %v1740_v27  ;;  %v1743_v33 = vmax.f32 %v1711_v28, 0.0  ;;  %v1709_v34 = vadd.f32 %v3001_v59, %v1650_v29  ;;  %v1671_v35 = vadd.f32 %v2411_v31, %v2371_v30  ;;  %v1429_v36 = vpop.f32.mrf.mxu0 }
 0x27b   : > { %v1662_v37 = vpop.f32.mrf.mxu1 }
 0x27c   : > { %1901 = vst.msk [vmem:[%s2796_s8 + $0x60] sm:$0xf] %vm1876_vm2, %v2173_v32  ;;  %v2176_v38 = vpack.c.bf16 %v1743_v33, %v1743_v33  ;;  %v1741_v39 = vmax.f32 %v1709_v34, 0.0  ;;  %v1714_v40 = vadd.f32 %v3001_v59, %v1671_v35  ;;  %v1663_v41 = vadd.f32 %v1662_v37, %v1429_v36  ;;  %v2372_v42 = vpop.f32.mrf.mxu0 }
 0x27d   : > { %v2412_v43 = vpop.f32.mrf.mxu1 }
 0x27e   : > { %1904 = vst.msk [vmem:[%s2796_s8 + $0x6c] sm:$0xf] %vm1876_vm2, %v2176_v38  ;;  %v2174_v44 = vpack.c.bf16 %v1741_v39, %v1741_v39  ;;  %v1746_v45 = vmax.f32 %v1714_v40, 0.0  ;;  %v1712_v46 = vadd.f32 %v3001_v59, %v1663_v41  ;;  %v1674_v47 = vadd.f32 %v2412_v43, %v2372_v42  ;;  %v1432_v48 = vpop.f32.mrf.mxu0 }
 0x27f   : > { %v1665_v49 = vpop.f32.mrf.mxu1 }
 0x280   : > { %1902 = vst.msk [vmem:[%s2796_s8 + $0x64] sm:$0xf] %vm1876_vm2, %v2174_v44  ;;  %v2179_v50 = vpack.c.bf16 %v1746_v45, %v1746_v45  ;;  %v1744_v51 = vmax.f32 %v1712_v46, 0.0  ;;  %v1715_v52 = vadd.f32 %v3001_v59, %v1674_v47  ;;  %v1666_v53 = vadd.f32 %v1665_v49, %v1432_v48 }
 0x282   : > { %1907 = vst.msk [vmem:[%s2796_s8 + $0x78] sm:$0xf] %vm1876_vm2, %v2179_v50  ;;  %v2177_v54 = vpack.c.bf16 %v1744_v51, %v1744_v51  ;;  %v1747_v55 = vmax.f32 %v1715_v52, 0.0  ;;  %v1713_v56 = vadd.f32 %v3001_v59, %v1666_v53 }
 0x284   : > { %1905 = vst.msk [vmem:[%s2796_s8 + $0x70] sm:$0xf] %vm1876_vm2, %v2177_v54  ;;  %v2180_v57 = vpack.c.bf16 %v1747_v55, %v1747_v55  ;;  %v1745_v58 = vmax.f32 %v1713_v56, 0.0 }
 0x286   : > { %1908 = vst.msk [vmem:[%s2796_s8 + $0x7c] sm:$0xf] %vm1876_vm2, %v2180_v57  ;;  %v2178_v60 = vpack.c.bf16 %v1745_v58, %v1745_v58 }
 0x288   : > { %1906 = vst.msk [vmem:[%s2796_s8 + $0x74] sm:$0xf] %vm1876_vm2, %v2178_v60 }
 0x289 PF: > { %s15_s24 = sadd.s32 1, %s2628_s24   ;;  %s3126_s18 = smov %s2608_s19 }
 0x28a   : > { %p12_p13 = scmp.ge.s32.totalorder %s15_s24, 6   ;;  %s3127_s19 = smov %s2712_s6 }
 0x28b   : > { %s3128_s20 = smov %s2620_s22  ;;  %s3129_s21 = smov %s2624_s23 }
 0x28c   : > { %s3130_s22 = smov %s3133_s25  ;;  %s3131_s23 = smov %s3137_s26 }
 0x28d   :  { %14 = sbr.rel (!%p12_p13) target bundleno = 4 (0x4), region = 123 }

</bundles_post_ra>
